<compile_context>
chip_gen: v7x
topology: tpu7x:2x2x1
jax: 0.10.0
libtpu: 0.0.40
codegen_flags: <defaults>
</compile_context>

<pallas_src>
import functools
import math

import jax
import jax.numpy as jnp
from jax.experimental import pallas as pl
from jax.experimental.pallas import tpu as pltpu

COMPUTE_DTYPE = jnp.bfloat16      # MXU operand dtype (accumulation is always f32)
NEG_INF = -1e30                   # finite mask value -> no NaNs on masked rows
_VMEM_BUDGET = 40 * 2**20         # weight-resident plan must fit this (v7x-safe)
_VMEM_LIMIT_CAP = 48 * 2**20      # never ask the compiler for more than this


def _round_up(x, m):
    return ((x + m - 1) // m) * m


def _pad_seq(s):
    """One-time sequence padding target: 128-multiples for real models, 8 for tiny."""
    return _round_up(s, 128) if s > 64 else _round_up(s, 8)


def _pick_k_tile(k):
    kr = _round_up(k, 128)
    for t in (512, 256, 128):
        if kr % t == 0:
            return t
    return 128


# ----------------------------------------------------------------------------
# Tiled linear:  y = act(x @ w + b) (+ residual)
#   - weight-resident path (tk=K): one MXU pass per M tile, weight DMA'd once
#   - K-streamed fallback path with an f32 accumulator scratch
# ----------------------------------------------------------------------------

def _make_linear_kernel(has_bias, has_residual, activation, k_streamed):
    def kernel(*refs):
        idx = 0
        x_ref = refs[idx]; idx += 1
        w_ref = refs[idx]; idx += 1
        b_ref = r_ref = None
        if has_bias:
            b_ref = refs[idx]; idx += 1
        if has_residual:
            r_ref = refs[idx]; idx += 1
        o_ref = refs[idx]; idx += 1

        def epilogue(y):
            if has_bias:
                y = y + b_ref[...].astype(jnp.float32)      # bias added in f32
            if activation == "quickgelu":
                y = y * jax.nn.sigmoid(1.702 * y)           # QuickGELU (f32 VPU/EUP)
            if has_residual:
                y = y + r_ref[...].astype(jnp.float32)      # fused residual add
            o_ref[...] = y.astype(o_ref.dtype)

        if k_streamed:
            acc_ref = refs[idx]
            k = pl.program_id(2)

            @pl.when(k == 0)
            def _():
                acc_ref[...] = jnp.zeros_like(acc_ref)

            acc_ref[...] += jnp.dot(x_ref[...], w_ref[...],
                                    preferred_element_type=jnp.float32)

            @pl.when(k == pl.num_programs(2) - 1)
            def _():
                epilogue(acc_ref[...])
        else:
            # weight-resident: full K in one step, f32 accumulation inside the dot
            epilogue(jnp.dot(x_ref[...], w_ref[...],
                             preferred_element_type=jnp.float32))

    return kernel


def pallas_linear(x, w, b=None, *, activation=None, residual=None,
                  operand_dtype=COMPUTE_DTYPE, out_dtype=None):
    """x: [M, K], w: [K, N], b: [N] or None, residual: [M, N] or None -> [M, N]."""
    M, K = x.shape
    K2, N = w.shape
    assert K2 == K
    out_dtype = out_dtype if out_dtype is not None else x.dtype
    op_bytes = jnp.dtype(operand_dtype).itemsize
    out_bytes = jnp.dtype(out_dtype).itemsize
    res_bytes = jnp.dtype(residual.dtype).itemsize if residual is not None else 0

    Mp = _round_up(M, 8)
    Kp = _round_up(K, 128)
    Np = _round_up(N, 128)

    tm = min(256, Mp)
    while Mp % tm:
        tm -= 8

    # --- weight-resident VMEM estimate (double-buffered worst case) ---
    def est(tn):
        e = 2 * Kp * tn * op_bytes            # resident weight
        e += 2 * tm * Kp * op_bytes           # streaming activation tiles
        e += 2 * tm * tn * out_bytes          # output tiles
        e += tm * tn * 4                      # f32 epilogue temporary
        if b is not None:
            e += 2 * Np * 4
        if residual is not None:
            e += 2 * tm * tn * res_bytes
        return e

    tn = None
    for cand in (Np, Np // 2, Np // 4):       # split N for very wide layers
        if cand >= 128 and cand % 128 == 0 and Np % cand == 0 and est(cand) <= _VMEM_BUDGET:
            tn = cand
            break
    resident = tn is not None

    if resident:
        tk = Kp
    else:
        tn = min(256, Np)
        while Np % tn:
            tn -= 128
        tk = _pick_k_tile(K)

    # padding below is a no-op for the (pre-padded) transformer shapes; it only
    # triggers for odd feature dims / tiny test shapes.
    xc = x.astype(operand_dtype)
    wc = w.astype(operand_dtype)
    if (Mp, Kp) != (M, K):
        xc = jnp.pad(xc, ((0, Mp - M), (0, Kp - K)))
    if (Kp, Np) != (K, N):
        wc = jnp.pad(wc, ((0, Kp - K), (0, Np - N)))

    if resident:
        if tn == Np:
            grid = (Mp // tm,)
            x_map = lambda i: (i, 0)
            w_map = lambda i: (0, 0)          # constant -> weight DMA'd once
            b_map = lambda i: (0, 0)
            o_map = lambda i: (i, 0)
            dims = ("parallel",)
        else:
            grid = (Np // tn, Mp // tm)       # n outer: weight stripe resident over m
            x_map = lambda n, m: (m, 0)
            w_map = lambda n, m: (0, n)
            b_map = lambda n, m: (0, n)
            o_map = lambda n, m: (m, n)
            dims = ("parallel", "parallel")
        scratch = []
    else:
        grid = (Mp // tm, Np // tn, Kp // tk)
        x_map = lambda i, j, k: (i, k)
        w_map = lambda i, j, k: (k, j)
        b_map = lambda i, j, k: (0, j)
        o_map = lambda i, j, k: (i, j)
        dims = ("parallel", "parallel", "arbitrary")
        scratch = [pltpu.VMEM((tm, tn), jnp.float32)]

    inputs = [xc, wc]
    in_specs = [pl.BlockSpec((tm, tk), x_map),
                pl.BlockSpec((tk, tn), w_map)]
    if b is not None:
        bc = b.astype(jnp.float32).reshape(1, N)
        if Np != N:
            bc = jnp.pad(bc, ((0, 0), (0, Np - N)))
        inputs.append(bc)
        in_specs.append(pl.BlockSpec((1, tn), b_map))
    if residual is not None:
        rc = residual
        if (Mp, Np) != (M, N):
            rc = jnp.pad(rc, ((0, Mp - M), (0, Np - N)))
        inputs.append(rc)
        in_specs.append(pl.BlockSpec((tm, tn), o_map))

    cp_kwargs = dict(dimension_semantics=dims)
    if resident:
        cp_kwargs["vmem_limit_bytes"] = int(
            min(_VMEM_LIMIT_CAP, max(32 * 2**20, est(tn) + 8 * 2**20)))

    out = pl.pallas_call(
        _make_linear_kernel(b is not None, residual is not None, activation,
                            k_streamed=not resident),
        out_shape=jax.ShapeDtypeStruct((Mp, Np), out_dtype),
        grid_spec=pltpu.PrefetchScalarGridSpec(
            num_scalar_prefetch=0,
            grid=grid,
            in_specs=in_specs,
            out_specs=pl.BlockSpec((tm, tn), o_map),
            scratch_shapes=scratch),
        compiler_params=pltpu.CompilerParams(**cp_kwargs),
    )(*inputs)

    if (Mp, Np) != (M, N):
        out = out[:M, :N]
    return out


# ----------------------------------------------------------------------------
# Gridded LayerNorm (always computed in f32, output in input dtype)
# ----------------------------------------------------------------------------

def _layernorm_kernel(x_ref, g_ref, b_ref, o_ref, *, eps):
    x = x_ref[...].astype(jnp.float32)
    mu = jnp.mean(x, axis=-1, keepdims=True)
    var = jnp.mean(jnp.square(x - mu), axis=-1, keepdims=True)
    y = (x - mu) * jax.lax.rsqrt(var + eps)
    y = y * g_ref[...].astype(jnp.float32) + b_ref[...].astype(jnp.float32)
    o_ref[...] = y.astype(o_ref.dtype)


def pallas_layernorm(x, g, b, *, eps=1e-5):
    """x: [M, D], g/b: [D] -> [M, D].  Row-tiled (up to 1024 rows/step), 'parallel'."""
    # TODO(synk): fuse this LN into the prologue of the consuming weight-resident
    # matmul (tk == K == D makes the whole row available) to save one HBM round trip.
    M, D = x.shape
    Mp = _round_up(M, 8)
    xp = jnp.pad(x, ((0, Mp - M), (0, 0))) if Mp != M else x
    tm = math.gcd(Mp, 1024)     # big memory-bound tiles amortize per-step overhead

    out = pl.pallas_call(
        functools.partial(_layernorm_kernel, eps=eps),
        out_shape=jax.ShapeDtypeStruct((Mp, D), x.dtype),
        grid_spec=pltpu.PrefetchScalarGridSpec(
            num_scalar_prefetch=0,
            grid=(Mp // tm,),
            in_specs=[pl.BlockSpec((tm, D), lambda i: (i, 0)),
                      pl.BlockSpec((1, D), lambda i: (0, 0)),
                      pl.BlockSpec((1, D), lambda i: (0, 0))],
            out_specs=pl.BlockSpec((tm, D), lambda i: (i, 0))),
        compiler_params=pltpu.CompilerParams(
            dimension_semantics=("parallel",),
            vmem_limit_bytes=32 * 2**20),
    )(xp, g.reshape(1, D), b.reshape(1, D))

    return out[:M] if Mp != M else out


# ----------------------------------------------------------------------------
# Flash attention (online softmax, in-kernel causal / padding mask,
# head-group batched, lane-dense [B, Sp, H*Dh] output)
# ----------------------------------------------------------------------------

def _flash_attention_kernel(q_ref, k_ref, v_ref, o_ref, m_scr, l_scr, acc_scr,
                            *, scale, causal, seq_len, tile, mask_kv,
                            head_dim, heads_per_block):
    qi = pl.program_id(2)
    ki = pl.program_id(3)

    @pl.when(ki == 0)
    def _():
        m_scr[...] = jnp.full_like(m_scr, NEG_INF)
        l_scr[...] = jnp.zeros_like(l_scr)
        acc_scr[...] = jnp.zeros_like(acc_scr)

    def compute():
        q = q_ref[0]                                   # (HB, tq, Dh) bf16
        k = k_ref[0]
        v = v_ref[0]
        s = jnp.einsum('hqd,hkd->hqk', q, k,
                       preferred_element_type=jnp.float32) * scale
        if causal or mask_kv:
            kv_idx = ki * tile + jax.lax.broadcasted_iota(jnp.int32, s.shape, 2)
            valid = None
            if mask_kv:                                # padded kv positions
                valid = kv_idx < seq_len
            if causal:                                 # in-kernel causal mask
                q_idx = qi * tile + jax.lax.broadcasted_iota(jnp.int32, s.shape, 1)
                c = kv_idx <= q_idx
                valid = c if valid is None else jnp.logical_and(valid, c)
            s = jnp.where(valid, s, NEG_INF)

        m_prev = m_scr[...]
        m_new = jnp.maximum(m_prev, jnp.max(s, axis=-1, keepdims=True))
        alpha = jnp.exp(m_prev - m_new)
        p = jnp.exp(s - m_new)
        l_scr[...] = alpha * l_scr[...] + jnp.sum(p, axis=-1, keepdims=True)
        acc_scr[...] = alpha * acc_scr[...] + jnp.einsum(
            'hqk,hkd->hqd', p.astype(v.dtype), v, preferred_element_type=jnp.float32)
        m_scr[...] = m_new

    if causal:
        # KV tiles fully above the diagonal skip compute (their DMA still happens;
        # acceptable for CLIP's short text sequences).
        pl.when(ki <= qi)(compute)
    else:
        compute()

    @pl.when(ki == pl.num_programs(3) - 1)
    def _():
        # every row sees >= 1 unmasked kv position (pad < tile), so l > 0 here.
        inv_l = pl.reciprocal(l_scr[...], approx=True)   # EUP slot, ~free
        o = acc_scr[...] * inv_l                         # (HB, tq, Dh) f32
        for h in range(heads_per_block):                 # static unroll, lane-dense block
            o_ref[0, :, h * head_dim:(h + 1) * head_dim] = o[h].astype(o_ref.dtype)


def pallas_flash_attention(q, k, v, *, scale, causal, seq_len):
    """q/k/v: [B, H, Sp, Dh] (Sp pre-padded) -> [B, Sp, H*Dh] without [S, S] scores."""
    B, H, Sp, Dh = q.shape
    D = H * Dh

    tile = min(256, Sp)
    while Sp % tile:
        tile -= 8

    # heads per grid step: biggest divisor of H with HB*Dh <= 512 and a lane-dense
    # (128-multiple or full-D) output stripe.
    HB = H
    for cand in range(H, 0, -1):
        if H % cand:
            continue
        if cand * Dh <= 512 and (cand == H or (cand * Dh) % 128 == 0):
            HB = cand
            break

    kernel = functools.partial(
        _flash_attention_kernel, scale=scale, causal=causal, seq_len=seq_len,
        tile=tile, mask_kv=(Sp != seq_len), head_dim=Dh, heads_per_block=HB)

    out = pl.pallas_call(
        kernel,
        out_shape=jax.ShapeDtypeStruct((B, Sp, D), q.dtype),
        grid_spec=pltpu.PrefetchScalarGridSpec(
            num_scalar_prefetch=0,
            grid=(B, H // HB, Sp // tile, Sp // tile),
            in_specs=[pl.BlockSpec((1, HB, tile, Dh), lambda b, hg, qi, ki: (b, hg, qi, 0)),
                      pl.BlockSpec((1, HB, tile, Dh), lambda b, hg, qi, ki: (b, hg, ki, 0)),
                      pl.BlockSpec((1, HB, tile, Dh), lambda b, hg, qi, ki: (b, hg, ki, 0))],
            out_specs=pl.BlockSpec((1, tile, HB * Dh), lambda b, hg, qi, ki: (b, qi, hg)),
            scratch_shapes=[pltpu.VMEM((HB, tile, 1), jnp.float32),
                            pltpu.VMEM((HB, tile, 1), jnp.float32),
                            pltpu.VMEM((HB, tile, Dh), jnp.float32)]),
        compiler_params=pltpu.CompilerParams(
            dimension_semantics=("parallel", "parallel", "parallel", "arbitrary"),
            vmem_limit_bytes=32 * 2**20),
    )(q, k, v)

    return out


# ----------------------------------------------------------------------------
# Model glue (reshapes / parameter plumbing in plain JAX, all under one jit).
# The sequence is padded ONCE per tower; every layer runs at the padded length.
# ----------------------------------------------------------------------------

def residual_attention_block(x, p, n_head, causal, seq_len):
    B, Sp, D = x.shape
    Dh = D // n_head
    xf = x.reshape(B * Sp, D)

    # --- attention branch (pre-LN) ---
    h = pallas_layernorm(xf, p["ln1_g"], p["ln1_b"])
    qkv = pallas_linear(h, p["in_w"], p["in_b"])                     # [B*Sp, 3D]
    # TODO(synk): read q/k/v straight from this slab with per-head column BlockSpecs
    # once sub-128-lane window blocks are safe; for now a single XLA transpose feeds
    # the head-major layout the attention kernel wants (the output side is already
    # transpose-free and lane-dense).
    qkv = qkv.reshape(B, Sp, 3, n_head, Dh).transpose(2, 0, 3, 1, 4)  # [3,B,H,Sp,Dh]
    o = pallas_flash_attention(qkv[0], qkv[1], qkv[2],
                               scale=1.0 / math.sqrt(Dh),
                               causal=causal, seq_len=seq_len)        # [B,Sp,D]
    x = pallas_linear(o.reshape(B * Sp, D), p["out_w"], p["out_b"], residual=xf)

    # --- MLP branch (pre-LN) ---
    hh = pallas_layernorm(x, p["ln2_g"], p["ln2_b"])
    m = pallas_linear(hh, p["fc_w"], p["fc_b"], activation="quickgelu")
    x = pallas_linear(m, p["proj_w"], p["proj_b"], residual=x)        # residual fused
    return x.reshape(B, Sp, D)


def encode_image(image, vp, n_head, patch_size):
    B, C, H, W = image.shape
    gh, gw = H // patch_size, W // patch_size
    width = vp["ln_pre_g"].shape[0]

    # patch-embedding conv (kernel == stride == patch, no bias) as a matmul
    # TODO(synk): fold this unfold into the patch-matmul BlockSpec index_map so the
    # rearrange rides the pipeline DMA instead of an extra HBM pass.
    img = image.astype(COMPUTE_DTYPE)
    patches = img.reshape(B, C, gh, patch_size, gw, patch_size)
    patches = patches.transpose(0, 2, 4, 1, 3, 5)
    patches = patches.reshape(B * gh * gw, C * patch_size * patch_size)
    x = pallas_linear(patches, vp["conv1_w"])                         # no bias
    x = x.reshape(B, gh * gw, width)

    cls = jnp.broadcast_to(vp["class_embedding"].astype(x.dtype)[None, None, :],
                           (B, 1, width))
    x = jnp.concatenate([cls, x], axis=1)
    x = x + vp["positional_embedding"].astype(x.dtype)[None]
    S = x.shape[1]

    # one-time sequence pad for the whole transformer stack (padded KV is masked
    # in-kernel; padded rows stay finite and never touch valid rows).
    Sp = _pad_seq(S)
    if Sp != S:
        x = jnp.pad(x, ((0, 0), (0, Sp - S), (0, 0)))

    x = pallas_layernorm(x.reshape(B * Sp, width), vp["ln_pre_g"], vp["ln_pre_b"])
    x = x.reshape(B, Sp, width)
    for blk in vp["blocks"]:
        x = residual_attention_block(x, blk, n_head, causal=False, seq_len=S)

    x0 = pallas_layernorm(x[:, 0, :], vp["ln_post_g"], vp["ln_post_b"])
    return pallas_linear(x0, vp["proj"], out_dtype=jnp.float32)       # no bias


def encode_text(text, tp, n_head):
    B, L = text.shape
    D = tp["positional_embedding"].shape[1]
    x = jnp.take(tp["token_embedding"], text, axis=0).astype(COMPUTE_DTYPE)
    x = x + tp["positional_embedding"].astype(COMPUTE_DTYPE)[None]

    Lp = _pad_seq(L)
    if Lp != L:
        x = jnp.pad(x, ((0, 0), (0, Lp - L), (0, 0)))                 # one-time pad

    for blk in tp["blocks"]:
        x = residual_attention_block(x, blk, n_head, causal=True, seq_len=L)

    x = pallas_layernorm(x.reshape(B * Lp, D), tp["ln_final_g"], tp["ln_final_b"])
    x = x.reshape(B, Lp, D)
    eot = jnp.argmax(text, axis=-1)   # CLIP convention: EOT token has the highest id
    feats = x[jnp.arange(B), eot]
    return pallas_linear(feats, tp["text_projection"], out_dtype=jnp.float32)


@functools.partial(jax.jit, static_argnames=("vision_heads", "text_heads", "patch_size"))
def clip_forward(params, image, text, *, vision_heads, text_heads, patch_size):
    image_features = encode_image(image, params["visual"], vision_heads, patch_size)
    text_features = encode_text(text, params["text"], text_heads)

    image_features = image_features / jnp.linalg.norm(image_features, axis=1, keepdims=True)
    text_features = text_features / jnp.linalg.norm(text_features, axis=1, keepdims=True)

    logit_scale = jnp.exp(params["logit_scale"])
    # tiny [B, B] matmul: plain XLA is faster than a pallas_call here
    logits_per_image = logit_scale * jnp.dot(image_features, text_features.T)
    logits_per_text = logits_per_image.T
    return logits_per_image, logits_per_text


# ----------------------------------------------------------------------------
# Deterministic parameter construction (shapes follow CLIP.__init__, ViT path).
# Matmul weights are stored pre-transposed ([in, out]) in the compute dtype;
# LayerNorm params and biases stay f32 (added in f32 inside the kernels).
# ----------------------------------------------------------------------------

def _normal(key, shape, std):
    return std * jax.random.normal(key, shape, dtype=jnp.float32)


def _init_block(key, d_model):
    ks = jax.random.split(key, 4)
    attn_std = d_model ** -0.5
    proj_std = d_model ** -0.5
    fc_std = (2 * d_model) ** -0.5
    return {
        "ln1_g": jnp.ones((d_model,), jnp.float32),
        "ln1_b": jnp.zeros((d_model,), jnp.float32),
        "in_w": _normal(ks[0], (d_model, 3 * d_model), attn_std).astype(COMPUTE_DTYPE),
        "in_b": jnp.zeros((3 * d_model,), jnp.float32),
        "out_w": _normal(ks[1], (d_model, d_model), proj_std).astype(COMPUTE_DTYPE),
        "out_b": jnp.zeros((d_model,), jnp.float32),
        "ln2_g": jnp.ones((d_model,), jnp.float32),
        "ln2_b": jnp.zeros((d_model,), jnp.float32),
        "fc_w": _normal(ks[2], (d_model, 4 * d_model), fc_std).astype(COMPUTE_DTYPE),
        "fc_b": jnp.zeros((4 * d_model,), jnp.float32),
        "proj_w": _normal(ks[3], (4 * d_model, d_model), proj_std).astype(COMPUTE_DTYPE),
        "proj_b": jnp.zeros((d_model,), jnp.float32),
    }


def init_clip_params(key, *, embed_dim, image_resolution, vision_layers, vision_width,
                     vision_patch_size, context_length, vocab_size, transformer_width,
                     transformer_heads, transformer_layers):
    del transformer_heads  # heads are passed statically to the forward
    keys = jax.random.split(key, 16)
    grid = image_resolution // vision_patch_size
    vscale = vision_width ** -0.5

    visual = {
        "conv1_w": _normal(keys[0], (3 * vision_patch_size * vision_patch_size,
                                     vision_width), 0.02).astype(COMPUTE_DTYPE),
        "class_embedding": _normal(keys[1], (vision_width,), vscale),
        "positional_embedding": _normal(keys[2], (grid * grid + 1, vision_width), vscale),
        "ln_pre_g": jnp.ones((vision_width,), jnp.float32),
        "ln_pre_b": jnp.zeros((vision_width,), jnp.float32),
        "blocks": [_init_block(k, vision_width)
                   for k in jax.random.split(keys[3], vision_layers)],
        "ln_post_g": jnp.ones((vision_width,), jnp.float32),
        "ln_post_b": jnp.zeros((vision_width,), jnp.float32),
        "proj": _normal(keys[4], (vision_width, embed_dim), vscale).astype(COMPUTE_DTYPE),
    }

    text = {
        "token_embedding": _normal(keys[5], (vocab_size, transformer_width), 0.02),
        "positional_embedding": _normal(keys[6], (context_length, transformer_width), 0.01),
        "blocks": [_init_block(k, transformer_width)
                   for k in jax.random.split(keys[7], transformer_layers)],
        "ln_final_g": jnp.ones((transformer_width,), jnp.float32),
        "ln_final_b": jnp.zeros((transformer_width,), jnp.float32),
        "text_projection": _normal(keys[8], (transformer_width, embed_dim),
                                   transformer_width ** -0.5).astype(COMPUTE_DTYPE),
    }

    return {"visual": visual, "text": text,
            "logit_scale": jnp.asarray(math.log(1.0 / 0.07), jnp.float32)}


# TODO(synk): the ModifiedResNet visual tower (Bottleneck / AttentionPool2d) is only
# used when vision_layers is a tuple; this script exercises the ViT path.

if __name__ == "__main__":
    key = jax.random.PRNGKey(0)
    k_param, k_img, k_txt = jax.random.split(key, 3)

    cfg = dict(
        embed_dim=32,
        image_resolution=16,
        vision_layers=2,          # int -> VisionTransformer tower
        vision_width=64,          # ViT path: vision_heads = 64 // 64 = 1
        vision_patch_size=8,
        context_length=8,
        vocab_size=64,
        transformer_width=32,
        transformer_heads=4,
        transformer_layers=2,
    )

    params = init_clip_params(k_param, **cfg)

    image = jax.random.normal(
        k_img, (2, 3, cfg["image_resolution"], cfg["image_resolution"]), dtype=jnp.float32)
    text = jax.random.randint(
        k_txt, (2, cfg["context_length"]), 1, cfg["vocab_size"], dtype=jnp.int32)

    logits_per_image, logits_per_text = clip_forward(
        params, image, text,
        vision_heads=cfg["vision_width"] // 64,
        text_heads=cfg["transformer_heads"],
        patch_size=cfg["vision_patch_size"])
    jax.block_until_ready((logits_per_image, logits_per_text))

    assert logits_per_image.shape == (2, 2) and logits_per_text.shape == (2, 2)
    assert bool(jnp.all(jnp.isfinite(logits_per_image)))
    print("KERNEL_OK")
</pallas_src>

<mosaic_0001>
module attributes {stable_mosaic.version = 11 : i64} {
  func.func @kernel(%arg0: i32, %arg1: memref<8x256xbf16, #tpu.memory_space<vmem>>, %arg2: memref<256x128xbf16, #tpu.memory_space<vmem>>, %arg3: memref<8x128xbf16, #tpu.memory_space<vmem>>) attributes {dimension_semantics = [#tpu.dimension_semantics<parallel>], iteration_bounds = array<i64: 1>, scalar_prefetch = 0 : i64, scratch_operands = 0 : i64, tpu.core_type = #tpu.core_type<tc>, window_params = [{transform_indices = @transform_0, window_bounds = array<i64: 8, 256>}, {pipeline_mode = #tpu.pipeline_mode<synchronous>, transform_indices = @transform_1, window_bounds = array<i64: 256, 128>}, {transform_indices = @transform_2, window_bounds = array<i64: 8, 128>}]} {
    %c0 = arith.constant 0 : index
    %c0_0 = arith.constant 0 : index
    %0 = vector.load %arg1[%c0, %c0_0] : memref<8x256xbf16, #tpu.memory_space<vmem>>, vector<8x256xbf16>
    %c0_1 = arith.constant 0 : index
    %c0_2 = arith.constant 0 : index
    %1 = vector.load %arg2[%c0_1, %c0_2] : memref<256x128xbf16, #tpu.memory_space<vmem>>, vector<256x128xbf16>
    %cst = arith.constant dense<0.000000e+00> : vector<8x128xf32>
    %2 = tpu.matmul %0, %1, %cst {dimension_numbers = #tpu.dot_dimension_numbers<[1], [0], [0], [1], [0, 0, 1, 1], [], []>} : vector<8x256xbf16>, vector<256x128xbf16>, vector<8x128xf32> -> vector<8x128xf32>
    %3 = arith.truncf %2 : vector<8x128xf32> to vector<8x128xbf16>
    %c0_3 = arith.constant 0 : index
    %c0_4 = arith.constant 0 : index
    %4 = vector.load %arg3[%c0_3, %c0_4] : memref<8x128xbf16, #tpu.memory_space<vmem>>, vector<8x128xbf16>
    tpu.vector_store %arg3[%c0_3, %c0_4], %3 {strides = array<i32>} : memref<8x128xbf16, #tpu.memory_space<vmem>>, vector<8x128xbf16>,
    return
  }
  func.func @transform_0(%arg0: i32) -> (i32, i32) {
    %c0_i32 = arith.constant 0 : i32
    %c0_i32_0 = arith.constant 0 : i32
    return %arg0, %c0_i32 : i32, i32
  }
  func.func @transform_1(%arg0: i32) -> (i32, i32) {
    %c0_i32 = arith.constant 0 : i32
    %c0_i32_0 = arith.constant 0 : i32
    %c0_i32_1 = arith.constant 0 : i32
    return %c0_i32, %c0_i32_0 : i32, i32
  }
  func.func @transform_2(%arg0: i32) -> (i32, i32) {
    %c0_i32 = arith.constant 0 : i32
    %c0_i32_0 = arith.constant 0 : i32
    return %arg0, %c0_i32 : i32, i32
  }
}

module attributes {stable_mosaic.version = 11 : i64} {
  func.func @_layernorm_kernel(%arg0: i32, %arg1: memref<16x64xbf16, #tpu.memory_space<vmem>>, %arg2: memref<1x64xf32, #tpu.memory_space<vmem>>, %arg3: memref<1x64xf32, #tpu.memory_space<vmem>>, %arg4: memref<16x64xbf16, #tpu.memory_space<vmem>>) attributes {dimension_semantics = [#tpu.dimension_semantics<parallel>], iteration_bounds = array<i64: 1>, scalar_prefetch = 0 : i64, scratch_operands = 0 : i64, tpu.core_type = #tpu.core_type<tc>, window_params = [{transform_indices = @transform_0, window_bounds = array<i64: 16, 64>}, {pipeline_mode = #tpu.pipeline_mode<synchronous>, transform_indices = @transform_1, window_bounds = array<i64: 1, 64>}, {pipeline_mode = #tpu.pipeline_mode<synchronous>, transform_indices = @transform_2, window_bounds = array<i64: 1, 64>}, {transform_indices = @transform_3, window_bounds = array<i64: 16, 64>}]} {
    %c0 = arith.constant 0 : index
    %c0_0 = arith.constant 0 : index
    %0 = vector.load %arg1[%c0, %c0_0] : memref<16x64xbf16, #tpu.memory_space<vmem>>, vector<16x64xbf16>
    %1 = arith.extf %0 : vector<16x64xbf16> to vector<16x64xf32>
    %cst = arith.constant dense<0.000000e+00> : vector<16xf32>
    %2 = vector.multi_reduction <add>, %1, %cst [1] : vector<16x64xf32> to vector<16xf32>
    %3 = vector.shape_cast %2 : vector<16xf32> to vector<16x1xf32>
    %cst_1 = arith.constant 6.400000e+01 : f32
    %4 = vector.broadcast %cst_1 : f32 to vector<16x1xf32>
    %5 = arith.divf %3, %4 : vector<16x1xf32>
    %6 = vector.broadcast %5 : vector<16x1xf32> to vector<16x64xf32>
    %7 = arith.subf %1, %6 : vector<16x64xf32>
    %8 = arith.mulf %7, %7 : vector<16x64xf32>
    %cst_2 = arith.constant dense<0.000000e+00> : vector<16xf32>
    %9 = vector.multi_reduction <add>, %8, %cst_2 [1] : vector<16x64xf32> to vector<16xf32>
    %10 = vector.shape_cast %9 : vector<16xf32> to vector<16x1xf32>
    %cst_3 = arith.constant 6.400000e+01 : f32
    %11 = vector.broadcast %cst_3 : f32 to vector<16x1xf32>
    %12 = arith.divf %10, %11 : vector<16x1xf32>
    %13 = vector.broadcast %5 : vector<16x1xf32> to vector<16x64xf32>
    %14 = arith.subf %1, %13 : vector<16x64xf32>
    %cst_4 = arith.constant 9.99999974E-6 : f32
    %15 = vector.broadcast %cst_4 : f32 to vector<16x1xf32>
    %16 = arith.addf %12, %15 : vector<16x1xf32>
    %17 = math.rsqrt %16 : vector<16x1xf32>
    %18 = vector.broadcast %17 : vector<16x1xf32> to vector<16x64xf32>
    %19 = arith.mulf %14, %18 : vector<16x64xf32>
    %c0_5 = arith.constant 0 : index
    %c0_6 = arith.constant 0 : index
    %20 = vector.load %arg2[%c0_5, %c0_6] : memref<1x64xf32, #tpu.memory_space<vmem>>, vector<1x64xf32>
    %21 = vector.broadcast %20 : vector<1x64xf32> to vector<16x64xf32>
    %22 = arith.mulf %19, %21 : vector<16x64xf32>
    %c0_7 = arith.constant 0 : index
    %c0_8 = arith.constant 0 : index
    %23 = vector.load %arg3[%c0_7, %c0_8] : memref<1x64xf32, #tpu.memory_space<vmem>>, vector<1x64xf32>
    %24 = vector.broadcast %23 : vector<1x64xf32> to vector<16x64xf32>
    %25 = arith.addf %22, %24 : vector<16x64xf32>
    %26 = arith.truncf %25 : vector<16x64xf32> to vector<16x64xbf16>
    %c0_9 = arith.constant 0 : index
    %c0_10 = arith.constant 0 : index
    %27 = vector.load %arg4[%c0_9, %c0_10] : memref<16x64xbf16, #tpu.memory_space<vmem>>, vector<16x64xbf16>
    tpu.vector_store %arg4[%c0_9, %c0_10], %26 {strides = array<i32>} : memref<16x64xbf16, #tpu.memory_space<vmem>>, vector<16x64xbf16>,
    return
  }
  func.func @transform_0(%arg0: i32) -> (i32, i32) {
    %c0_i32 = arith.constant 0 : i32
    %c0_i32_0 = arith.constant 0 : i32
    return %arg0, %c0_i32 : i32, i32
  }
  func.func @transform_1(%arg0: i32) -> (i32, i32) {
    %c0_i32 = arith.constant 0 : i32
    %c0_i32_0 = arith.constant 0 : i32
    %c0_i32_1 = arith.constant 0 : i32
    return %c0_i32, %c0_i32_0 : i32, i32
  }
  func.func @transform_2(%arg0: i32) -> (i32, i32) {
    %c0_i32 = arith.constant 0 : i32
    %c0_i32_0 = arith.constant 0 : i32
    %c0_i32_1 = arith.constant 0 : i32
    return %c0_i32, %c0_i32_0 : i32, i32
  }
  func.func @transform_3(%arg0: i32) -> (i32, i32) {
    %c0_i32 = arith.constant 0 : i32
    %c0_i32_0 = arith.constant 0 : i32
    return %arg0, %c0_i32 : i32, i32
  }
}

module attributes {stable_mosaic.version = 11 : i64} {
  func.func @kernel(%arg0: i32, %arg1: memref<16x128xbf16, #tpu.memory_space<vmem>>, %arg2: memref<128x256xbf16, #tpu.memory_space<vmem>>, %arg3: memref<1x256xf32, #tpu.memory_space<vmem>>, %arg4: memref<16x256xbf16, #tpu.memory_space<vmem>>) attributes {dimension_semantics = [#tpu.dimension_semantics<parallel>], iteration_bounds = array<i64: 1>, scalar_prefetch = 0 : i64, scratch_operands = 0 : i64, tpu.core_type = #tpu.core_type<tc>, window_params = [{transform_indices = @transform_0, window_bounds = array<i64: 16, 128>}, {pipeline_mode = #tpu.pipeline_mode<synchronous>, transform_indices = @transform_1, window_bounds = array<i64: 128, 256>}, {pipeline_mode = #tpu.pipeline_mode<synchronous>, transform_indices = @transform_2, window_bounds = array<i64: 1, 256>}, {transform_indices = @transform_3, window_bounds = array<i64: 16, 256>}]} {
    %c0 = arith.constant 0 : index
    %c0_0 = arith.constant 0 : index
    %0 = vector.load %arg1[%c0, %c0_0] : memref<16x128xbf16, #tpu.memory_space<vmem>>, vector<16x128xbf16>
    %c0_1 = arith.constant 0 : index
    %c0_2 = arith.constant 0 : index
    %1 = vector.load %arg2[%c0_1, %c0_2] : memref<128x256xbf16, #tpu.memory_space<vmem>>, vector<128x256xbf16>
    %cst = arith.constant dense<0.000000e+00> : vector<16x256xf32>
    %2 = tpu.matmul %0, %1, %cst {dimension_numbers = #tpu.dot_dimension_numbers<[1], [0], [0], [1], [0, 0, 1, 1], [], []>} : vector<16x128xbf16>, vector<128x256xbf16>, vector<16x256xf32> -> vector<16x256xf32>
    %c0_3 = arith.constant 0 : index
    %c0_4 = arith.constant 0 : index
    %3 = vector.load %arg3[%c0_3, %c0_4] : memref<1x256xf32, #tpu.memory_space<vmem>>, vector<1x256xf32>
    %4 = vector.broadcast %3 : vector<1x256xf32> to vector<16x256xf32>
    %5 = arith.addf %2, %4 : vector<16x256xf32>
    %6 = arith.truncf %5 : vector<16x256xf32> to vector<16x256xbf16>
    %c0_5 = arith.constant 0 : index
    %c0_6 = arith.constant 0 : index
    %7 = vector.load %arg4[%c0_5, %c0_6] : memref<16x256xbf16, #tpu.memory_space<vmem>>, vector<16x256xbf16>
    tpu.vector_store %arg4[%c0_5, %c0_6], %6 {strides = array<i32>} : memref<16x256xbf16, #tpu.memory_space<vmem>>, vector<16x256xbf16>,
    return
  }
  func.func @transform_0(%arg0: i32) -> (i32, i32) {
    %c0_i32 = arith.constant 0 : i32
    %c0_i32_0 = arith.constant 0 : i32
    return %arg0, %c0_i32 : i32, i32
  }
  func.func @transform_1(%arg0: i32) -> (i32, i32) {
    %c0_i32 = arith.constant 0 : i32
    %c0_i32_0 = arith.constant 0 : i32
    %c0_i32_1 = arith.constant 0 : i32
    return %c0_i32, %c0_i32_0 : i32, i32
  }
  func.func @transform_2(%arg0: i32) -> (i32, i32) {
    %c0_i32 = arith.constant 0 : i32
    %c0_i32_0 = arith.constant 0 : i32
    %c0_i32_1 = arith.constant 0 : i32
    return %c0_i32, %c0_i32_0 : i32, i32
  }
  func.func @transform_3(%arg0: i32) -> (i32, i32) {
    %c0_i32 = arith.constant 0 : i32
    %c0_i32_0 = arith.constant 0 : i32
    return %arg0, %c0_i32 : i32, i32
  }
}

module attributes {stable_mosaic.version = 11 : i64} {
  func.func @_flash_attention_kernel(%arg0: i32, %arg1: i32, %arg2: i32, %arg3: i32, %arg4: memref<1x1x8x64xbf16, #tpu.memory_space<vmem>>, %arg5: memref<1x1x8x64xbf16, #tpu.memory_space<vmem>>, %arg6: memref<1x1x8x64xbf16, #tpu.memory_space<vmem>>, %arg7: memref<1x8x64xbf16, #tpu.memory_space<vmem>>, %arg8: memref<1x8x1xf32, #tpu.memory_space<vmem>>, %arg9: memref<1x8x1xf32, #tpu.memory_space<vmem>>, %arg10: memref<1x8x64xf32, #tpu.memory_space<vmem>>) attributes {dimension_semantics = [#tpu.dimension_semantics<parallel>, #tpu.dimension_semantics<parallel>, #tpu.dimension_semantics<parallel>, #tpu.dimension_semantics<arbitrary>], iteration_bounds = array<i64: 2, 1, 1, 1>, scalar_prefetch = 0 : i64, scratch_operands = 3 : i64, tpu.core_type = #tpu.core_type<tc>, window_params = [{transform_indices = @transform_0, window_bounds = array<i64: 1, 1, 8, 64>}, {transform_indices = @transform_1, window_bounds = array<i64: 1, 1, 8, 64>}, {transform_indices = @transform_2, window_bounds = array<i64: 1, 1, 8, 64>}, {transform_indices = @transform_3, window_bounds = array<i64: 1, 8, 64>}]} {
    %c0_i32 = arith.constant 0 : i32
    %0 = arith.cmpi eq, %arg3, %c0_i32 : i32
    %1 = arith.extui %0 : i1 to i32
    %c0_i32_0 = arith.constant 0 : i32
    %2 = arith.cmpi ne, %1, %c0_i32_0 : i32
    scf.if %2 {
      %cst_37 = arith.constant -1.000000e+30 : f32
      %46 = vector.broadcast %cst_37 : f32 to vector<1x8x1xf32>
      %c0_38 = arith.constant 0 : index
      %c0_39 = arith.constant 0 : index
      %c0_40 = arith.constant 0 : index
      %47 = vector.load %arg8[%c0_38, %c0_39, %c0_40] : memref<1x8x1xf32, #tpu.memory_space<vmem>>, vector<1x8x1xf32>
      tpu.vector_store %arg8[%c0_38, %c0_39, %c0_40], %46 {strides = array<i32>} : memref<1x8x1xf32, #tpu.memory_space<vmem>>, vector<1x8x1xf32>,
      %cst_41 = arith.constant 0.000000e+00 : f32
      %48 = vector.broadcast %cst_41 : f32 to vector<1x8x1xf32>
      %c0_42 = arith.constant 0 : index
      %c0_43 = arith.constant 0 : index
      %c0_44 = arith.constant 0 : index
      %49 = vector.load %arg9[%c0_42, %c0_43, %c0_44] : memref<1x8x1xf32, #tpu.memory_space<vmem>>, vector<1x8x1xf32>
      tpu.vector_store %arg9[%c0_42, %c0_43, %c0_44], %48 {strides = array<i32>} : memref<1x8x1xf32, #tpu.memory_space<vmem>>, vector<1x8x1xf32>,
      %cst_45 = arith.constant 0.000000e+00 : f32
      %50 = vector.broadcast %cst_45 : f32 to vector<1x8x64xf32>
      %c0_46 = arith.constant 0 : index
      %c0_47 = arith.constant 0 : index
      %c0_48 = arith.constant 0 : index
      %51 = vector.load %arg10[%c0_46, %c0_47, %c0_48] : memref<1x8x64xf32, #tpu.memory_space<vmem>>, vector<1x8x64xf32>
      tpu.vector_store %arg10[%c0_46, %c0_47, %c0_48], %50 {strides = array<i32>} : memref<1x8x64xf32, #tpu.memory_space<vmem>>, vector<1x8x64xf32>,
    } else {
    }
    %c0 = arith.constant 0 : index
    %c0_1 = arith.constant 0 : index
    %c0_2 = arith.constant 0 : index
    %c0_3 = arith.constant 0 : index
    %3 = vector.load %arg4[%c0, %c0_1, %c0_2, %c0_3] : memref<1x1x8x64xbf16, #tpu.memory_space<vmem>>, vector<1x1x8x64xbf16>
    %4 = vector.shape_cast %3 : vector<1x1x8x64xbf16> to vector<1x8x64xbf16>
    %c0_4 = arith.constant 0 : index
    %c0_5 = arith.constant 0 : index
    %c0_6 = arith.constant 0 : index
    %c0_7 = arith.constant 0 : index
    %5 = vector.load %arg5[%c0_4, %c0_5, %c0_6, %c0_7] : memref<1x1x8x64xbf16, #tpu.memory_space<vmem>>, vector<1x1x8x64xbf16>
    %6 = vector.shape_cast %5 : vector<1x1x8x64xbf16> to vector<1x8x64xbf16>
    %c0_8 = arith.constant 0 : index
    %c0_9 = arith.constant 0 : index
    %c0_10 = arith.constant 0 : index
    %c0_11 = arith.constant 0 : index
    %7 = vector.load %arg6[%c0_8, %c0_9, %c0_10, %c0_11] : memref<1x1x8x64xbf16, #tpu.memory_space<vmem>>, vector<1x1x8x64xbf16>
    %8 = vector.shape_cast %7 : vector<1x1x8x64xbf16> to vector<1x8x64xbf16>
    "tpu.trace_start"() <{level = 10 : i32, message = "hqd,hkd->hqk"}> : () -> ()
    %cst = arith.constant dense<0.000000e+00> : vector<1x8x8xf32>
    %9 = tpu.matmul %4, %6, %cst {dimension_numbers = #tpu.dot_dimension_numbers<[2], [2], [1], [1], [0, 0, 0, 1, 1, 1], [0], [0]>} : vector<1x8x64xbf16>, vector<1x8x64xbf16>, vector<1x8x8xf32> -> vector<1x8x8xf32>
    "tpu.trace_stop"() : () -> ()
    %cst_12 = arith.constant 1.250000e-01 : f32
    %10 = vector.broadcast %cst_12 : f32 to vector<1x8x8xf32>
    %11 = arith.mulf %9, %10 : vector<1x8x8xf32>
    %c8_i32 = arith.constant 8 : i32
    %12 = arith.muli %arg3, %c8_i32 : i32
    %13 = tpu.iota {dimensions = array<i32: 2>} : vector<1x8x8xi32>
    %14 = vector.broadcast %12 : i32 to vector<1x8x8xi32>
    %15 = arith.addi %14, %13 : vector<1x8x8xi32>
    %c5_i32 = arith.constant 5 : i32
    %16 = vector.broadcast %c5_i32 : i32 to vector<1x8x8xi32>
    %17 = arith.cmpi slt, %15, %16 : vector<1x8x8xi32>
    %cst_13 = arith.constant -1.000000e+30 : f32
    %18 = vector.broadcast %cst_13 : f32 to vector<1x8x8xf32>
    %19 = arith.select %17, %11, %18 : vector<1x8x8xi1>, vector<1x8x8xf32>
    %c0_14 = arith.constant 0 : index
    %c0_15 = arith.constant 0 : index
    %c0_16 = arith.constant 0 : index
    %20 = vector.load %arg8[%c0_14, %c0_15, %c0_16] : memref<1x8x1xf32, #tpu.memory_space<vmem>>, vector<1x8x1xf32>
    %cst_17 = arith.constant dense<0xFF800000> : vector<1x8xf32>
    %21 = vector.multi_reduction <maximumf>, %19, %cst_17 [2] : vector<1x8x8xf32> to vector<1x8xf32>
    %22 = vector.shape_cast %21 : vector<1x8xf32> to vector<1x8x1xf32>
    %23 = arith.maximumf %20, %22 : vector<1x8x1xf32>
    %24 = arith.subf %20, %23 : vector<1x8x1xf32>
    %25 = math.exp %24 : vector<1x8x1xf32>
    %26 = vector.broadcast %23 : vector<1x8x1xf32> to vector<1x8x8xf32>
    %27 = arith.subf %19, %26 : vector<1x8x8xf32>
    %28 = math.exp %27 : vector<1x8x8xf32>
    %c0_18 = arith.constant 0 : index
    %c0_19 = arith.constant 0 : index
    %c0_20 = arith.constant 0 : index
    %29 = vector.load %arg9[%c0_18, %c0_19, %c0_20] : memref<1x8x1xf32, #tpu.memory_space<vmem>>, vector<1x8x1xf32>
    %30 = arith.mulf %25, %29 : vector<1x8x1xf32>
    %cst_21 = arith.constant dense<0.000000e+00> : vector<1x8xf32>
    %31 = vector.multi_reduction <add>, %28, %cst_21 [2] : vector<1x8x8xf32> to vector<1x8xf32>
    %32 = vector.shape_cast %31 : vector<1x8xf32> to vector<1x8x1xf32>
    %33 = arith.addf %30, %32 : vector<1x8x1xf32>
    %c0_22 = arith.constant 0 : index
    %c0_23 = arith.constant 0 : index
    %c0_24 = arith.constant 0 : index
    %34 = vector.load %arg9[%c0_22, %c0_23, %c0_24] : memref<1x8x1xf32, #tpu.memory_space<vmem>>, vector<1x8x1xf32>
    tpu.vector_store %arg9[%c0_22, %c0_23, %c0_24], %33 {strides = array<i32>} : memref<1x8x1xf32, #tpu.memory_space<vmem>>, vector<1x8x1xf32>,
    %c0_25 = arith.constant 0 : index
    %c0_26 = arith.constant 0 : index
    %c0_27 = arith.constant 0 : index
    %35 = vector.load %arg10[%c0_25, %c0_26, %c0_27] : memref<1x8x64xf32, #tpu.memory_space<vmem>>, vector<1x8x64xf32>
    %36 = vector.broadcast %25 : vector<1x8x1xf32> to vector<1x8x64xf32>
    %37 = arith.mulf %36, %35 : vector<1x8x64xf32>
    %38 = arith.truncf %28 : vector<1x8x8xf32> to vector<1x8x8xbf16>
    "tpu.trace_start"() <{level = 10 : i32, message = "hqk,hkd->hqd"}> : () -> ()
    %cst_28 = arith.constant dense<0.000000e+00> : vector<1x8x64xf32>
    %39 = tpu.matmul %38, %8, %cst_28 {dimension_numbers = #tpu.dot_dimension_numbers<[2], [1], [1], [2], [0, 0, 0, 1, 1, 2], [0], [0]>} : vector<1x8x8xbf16>, vector<1x8x64xbf16>, vector<1x8x64xf32> -> vector<1x8x64xf32>
    "tpu.trace_stop"() : () -> ()
    %40 = arith.addf %37, %39 : vector<1x8x64xf32>
    %c0_29 = arith.constant 0 : index
    %c0_30 = arith.constant 0 : index
    %c0_31 = arith.constant 0 : index
    %41 = vector.load %arg10[%c0_29, %c0_30, %c0_31] : memref<1x8x64xf32, #tpu.memory_space<vmem>>, vector<1x8x64xf32>
    tpu.vector_store %arg10[%c0_29, %c0_30, %c0_31], %40 {strides = array<i32>} : memref<1x8x64xf32, #tpu.memory_space<vmem>>, vector<1x8x64xf32>,
    %c0_32 = arith.constant 0 : index
    %c0_33 = arith.constant 0 : index
    %c0_34 = arith.constant 0 : index
    %42 = vector.load %arg8[%c0_32, %c0_33, %c0_34] : memref<1x8x1xf32, #tpu.memory_space<vmem>>, vector<1x8x1xf32>
    tpu.vector_store %arg8[%c0_32, %c0_33, %c0_34], %23 {strides = array<i32>} : memref<1x8x1xf32, #tpu.memory_space<vmem>>, vector<1x8x1xf32>,
    %c0_i32_35 = arith.constant 0 : i32
    %43 = arith.cmpi eq, %arg3, %c0_i32_35 : i32
    %44 = arith.extui %43 : i1 to i32
    %c0_i32_36 = arith.constant 0 : i32
    %45 = arith.cmpi ne, %44, %c0_i32_36 : i32
    scf.if %45 {
      %c0_37 = arith.constant 0 : index
      %c0_38 = arith.constant 0 : index
      %c0_39 = arith.constant 0 : index
      %46 = vector.load %arg9[%c0_37, %c0_38, %c0_39] : memref<1x8x1xf32, #tpu.memory_space<vmem>>, vector<1x8x1xf32>
      %47 = tpu.reciprocal %46 {approx = true} : vector<1x8x1xf32> -> vector<1x8x1xf32>
      %c0_40 = arith.constant 0 : index
      %c0_41 = arith.constant 0 : index
      %c0_42 = arith.constant 0 : index
      %48 = vector.load %arg10[%c0_40, %c0_41, %c0_42] : memref<1x8x64xf32, #tpu.memory_space<vmem>>, vector<1x8x64xf32>
      %49 = vector.broadcast %47 : vector<1x8x1xf32> to vector<1x8x64xf32>
      %50 = arith.mulf %48, %49 : vector<1x8x64xf32>
      %51 = vector.shape_cast %50 : vector<1x8x64xf32> to vector<8x64xf32>
      %52 = arith.truncf %51 : vector<8x64xf32> to vector<8x64xbf16>
      %c0_43 = arith.constant 0 : index
      %c0_44 = arith.constant 0 : index
      %c0_45 = arith.constant 0 : index
      %53 = vector.load %arg7[%c0_43, %c0_44, %c0_45] : memref<1x8x64xbf16, #tpu.memory_space<vmem>>, vector<1x8x64xbf16>
      %54 = vector.shape_cast %53 : vector<1x8x64xbf16> to vector<8x64xbf16>
      %55 = vector.shape_cast %52 : vector<8x64xbf16> to vector<1x8x64xbf16>
      tpu.vector_store %arg7[%c0_43, %c0_44, %c0_45], %55 {strides = array<i32>} : memref<1x8x64xbf16, #tpu.memory_space<vmem>>, vector<1x8x64xbf16>,
    } else {
    }
    return
  }
  func.func @transform_0(%arg0: i32, %arg1: i32, %arg2: i32, %arg3: i32) -> (i32, i32, i32, i32) {
    %c0_i32 = arith.constant 0 : i32
    %c0_i32_0 = arith.constant 0 : i32
    return %arg0, %arg1, %arg2, %c0_i32 : i32, i32, i32, i32
  }
  func.func @transform_1(%arg0: i32, %arg1: i32, %arg2: i32, %arg3: i32) -> (i32, i32, i32, i32) {
    %c0_i32 = arith.constant 0 : i32
    %c0_i32_0 = arith.constant 0 : i32
    return %arg0, %arg1, %arg3, %c0_i32 : i32, i32, i32, i32
  }
  func.func @transform_2(%arg0: i32, %arg1: i32, %arg2: i32, %arg3: i32) -> (i32, i32, i32, i32) {
    %c0_i32 = arith.constant 0 : i32
    %c0_i32_0 = arith.constant 0 : i32
    return %arg0, %arg1, %arg3, %c0_i32 : i32, i32, i32, i32
  }
  func.func @transform_3(%arg0: i32, %arg1: i32, %arg2: i32, %arg3: i32) -> (i32, i32, i32) {
    %c0_i32 = arith.constant 0 : i32
    return %arg0, %arg2, %arg1 : i32, i32, i32
  }
}

module attributes {stable_mosaic.version = 11 : i64} {
  func.func @kernel(%arg0: i32, %arg1: memref<16x128xbf16, #tpu.memory_space<vmem>>, %arg2: memref<128x128xbf16, #tpu.memory_space<vmem>>, %arg3: memref<1x128xf32, #tpu.memory_space<vmem>>, %arg4: memref<16x128xbf16, #tpu.memory_space<vmem>>, %arg5: memref<16x128xbf16, #tpu.memory_space<vmem>>) attributes {dimension_semantics = [#tpu.dimension_semantics<parallel>], iteration_bounds = array<i64: 1>, scalar_prefetch = 0 : i64, scratch_operands = 0 : i64, tpu.core_type = #tpu.core_type<tc>, window_params = [{transform_indices = @transform_0, window_bounds = array<i64: 16, 128>}, {pipeline_mode = #tpu.pipeline_mode<synchronous>, transform_indices = @transform_1, window_bounds = array<i64: 128, 128>}, {pipeline_mode = #tpu.pipeline_mode<synchronous>, transform_indices = @transform_2, window_bounds = array<i64: 1, 128>}, {transform_indices = @transform_3, window_bounds = array<i64: 16, 128>}, {transform_indices = @transform_4, window_bounds = array<i64: 16, 128>}]} {
    %c0 = arith.constant 0 : index
    %c0_0 = arith.constant 0 : index
    %0 = vector.load %arg1[%c0, %c0_0] : memref<16x128xbf16, #tpu.memory_space<vmem>>, vector<16x128xbf16>
    %c0_1 = arith.constant 0 : index
    %c0_2 = arith.constant 0 : index
    %1 = vector.load %arg2[%c0_1, %c0_2] : memref<128x128xbf16, #tpu.memory_space<vmem>>, vector<128x128xbf16>
    %cst = arith.constant dense<0.000000e+00> : vector<16x128xf32>
    %2 = tpu.matmul %0, %1, %cst {dimension_numbers = #tpu.dot_dimension_numbers<[1], [0], [0], [1], [0, 0, 1, 1], [], []>} : vector<16x128xbf16>, vector<128x128xbf16>, vector<16x128xf32> -> vector<16x128xf32>
    %c0_3 = arith.constant 0 : index
    %c0_4 = arith.constant 0 : index
    %3 = vector.load %arg3[%c0_3, %c0_4] : memref<1x128xf32, #tpu.memory_space<vmem>>, vector<1x128xf32>
    %4 = vector.broadcast %3 : vector<1x128xf32> to vector<16x128xf32>
    %5 = arith.addf %2, %4 : vector<16x128xf32>
    %c0_5 = arith.constant 0 : index
    %c0_6 = arith.constant 0 : index
    %6 = vector.load %arg4[%c0_5, %c0_6] : memref<16x128xbf16, #tpu.memory_space<vmem>>, vector<16x128xbf16>
    %7 = arith.extf %6 : vector<16x128xbf16> to vector<16x128xf32>
    %8 = arith.addf %5, %7 : vector<16x128xf32>
    %9 = arith.truncf %8 : vector<16x128xf32> to vector<16x128xbf16>
    %c0_7 = arith.constant 0 : index
    %c0_8 = arith.constant 0 : index
    %10 = vector.load %arg5[%c0_7, %c0_8] : memref<16x128xbf16, #tpu.memory_space<vmem>>, vector<16x128xbf16>
    tpu.vector_store %arg5[%c0_7, %c0_8], %9 {strides = array<i32>} : memref<16x128xbf16, #tpu.memory_space<vmem>>, vector<16x128xbf16>,
    return
  }
  func.func @transform_0(%arg0: i32) -> (i32, i32) {
    %c0_i32 = arith.constant 0 : i32
    %c0_i32_0 = arith.constant 0 : i32
    return %arg0, %c0_i32 : i32, i32
  }
  func.func @transform_1(%arg0: i32) -> (i32, i32) {
    %c0_i32 = arith.constant 0 : i32
    %c0_i32_0 = arith.constant 0 : i32
    %c0_i32_1 = arith.constant 0 : i32
    return %c0_i32, %c0_i32_0 : i32, i32
  }
  func.func @transform_2(%arg0: i32) -> (i32, i32) {
    %c0_i32 = arith.constant 0 : i32
    %c0_i32_0 = arith.constant 0 : i32
    %c0_i32_1 = arith.constant 0 : i32
    return %c0_i32, %c0_i32_0 : i32, i32
  }
  func.func @transform_3(%arg0: i32) -> (i32, i32) {
    %c0_i32 = arith.constant 0 : i32
    %c0_i32_0 = arith.constant 0 : i32
    return %arg0, %c0_i32 : i32, i32
  }
  func.func @transform_4(%arg0: i32) -> (i32, i32) {
    %c0_i32 = arith.constant 0 : i32
    %c0_i32_0 = arith.constant 0 : i32
    return %arg0, %c0_i32 : i32, i32
  }
}

module attributes {stable_mosaic.version = 11 : i64} {
  func.func @kernel(%arg0: i32, %arg1: memref<16x128xbf16, #tpu.memory_space<vmem>>, %arg2: memref<128x256xbf16, #tpu.memory_space<vmem>>, %arg3: memref<1x256xf32, #tpu.memory_space<vmem>>, %arg4: memref<16x256xbf16, #tpu.memory_space<vmem>>) attributes {dimension_semantics = [#tpu.dimension_semantics<parallel>], iteration_bounds = array<i64: 1>, scalar_prefetch = 0 : i64, scratch_operands = 0 : i64, tpu.core_type = #tpu.core_type<tc>, window_params = [{transform_indices = @transform_0, window_bounds = array<i64: 16, 128>}, {pipeline_mode = #tpu.pipeline_mode<synchronous>, transform_indices = @transform_1, window_bounds = array<i64: 128, 256>}, {pipeline_mode = #tpu.pipeline_mode<synchronous>, transform_indices = @transform_2, window_bounds = array<i64: 1, 256>}, {transform_indices = @transform_3, window_bounds = array<i64: 16, 256>}]} {
    %c0 = arith.constant 0 : index
    %c0_0 = arith.constant 0 : index
    %0 = vector.load %arg1[%c0, %c0_0] : memref<16x128xbf16, #tpu.memory_space<vmem>>, vector<16x128xbf16>
    %c0_1 = arith.constant 0 : index
    %c0_2 = arith.constant 0 : index
    %1 = vector.load %arg2[%c0_1, %c0_2] : memref<128x256xbf16, #tpu.memory_space<vmem>>, vector<128x256xbf16>
    %cst = arith.constant dense<0.000000e+00> : vector<16x256xf32>
    %2 = tpu.matmul %0, %1, %cst {dimension_numbers = #tpu.dot_dimension_numbers<[1], [0], [0], [1], [0, 0, 1, 1], [], []>} : vector<16x128xbf16>, vector<128x256xbf16>, vector<16x256xf32> -> vector<16x256xf32>
    %c0_3 = arith.constant 0 : index
    %c0_4 = arith.constant 0 : index
    %3 = vector.load %arg3[%c0_3, %c0_4] : memref<1x256xf32, #tpu.memory_space<vmem>>, vector<1x256xf32>
    %4 = vector.broadcast %3 : vector<1x256xf32> to vector<16x256xf32>
    %5 = arith.addf %2, %4 : vector<16x256xf32>
    %cst_5 = arith.constant 1.702000e+00 : f32
    %6 = vector.broadcast %cst_5 : f32 to vector<16x256xf32>
    %7 = arith.mulf %6, %5 : vector<16x256xf32>
    %8 = arith.negf %7 : vector<16x256xf32>
    %9 = math.exp %8 : vector<16x256xf32>
    %cst_6 = arith.constant 1.000000e+00 : f32
    %10 = vector.broadcast %cst_6 : f32 to vector<16x256xf32>
    %11 = arith.addf %10, %9 : vector<16x256xf32>
    %12 = arith.divf %10, %11 : vector<16x256xf32>
    %13 = arith.mulf %5, %12 : vector<16x256xf32>
    %14 = arith.truncf %13 : vector<16x256xf32> to vector<16x256xbf16>
    %c0_7 = arith.constant 0 : index
    %c0_8 = arith.constant 0 : index
    %15 = vector.load %arg4[%c0_7, %c0_8] : memref<16x256xbf16, #tpu.memory_space<vmem>>, vector<16x256xbf16>
    tpu.vector_store %arg4[%c0_7, %c0_8], %14 {strides = array<i32>} : memref<16x256xbf16, #tpu.memory_space<vmem>>, vector<16x256xbf16>,
    return
  }
  func.func @transform_0(%arg0: i32) -> (i32, i32) {
    %c0_i32 = arith.constant 0 : i32
    %c0_i32_0 = arith.constant 0 : i32
    return %arg0, %c0_i32 : i32, i32
  }
  func.func @transform_1(%arg0: i32) -> (i32, i32) {
    %c0_i32 = arith.constant 0 : i32
    %c0_i32_0 = arith.constant 0 : i32
    %c0_i32_1 = arith.constant 0 : i32
    return %c0_i32, %c0_i32_0 : i32, i32
  }
  func.func @transform_2(%arg0: i32) -> (i32, i32) {
    %c0_i32 = arith.constant 0 : i32
    %c0_i32_0 = arith.constant 0 : i32
    %c0_i32_1 = arith.constant 0 : i32
    return %c0_i32, %c0_i32_0 : i32, i32
  }
  func.func @transform_3(%arg0: i32) -> (i32, i32) {
    %c0_i32 = arith.constant 0 : i32
    %c0_i32_0 = arith.constant 0 : i32
    return %arg0, %c0_i32 : i32, i32
  }
}

module attributes {stable_mosaic.version = 11 : i64} {
  func.func @kernel(%arg0: i32, %arg1: memref<16x256xbf16, #tpu.memory_space<vmem>>, %arg2: memref<256x128xbf16, #tpu.memory_space<vmem>>, %arg3: memref<1x128xf32, #tpu.memory_space<vmem>>, %arg4: memref<16x128xbf16, #tpu.memory_space<vmem>>, %arg5: memref<16x128xbf16, #tpu.memory_space<vmem>>) attributes {dimension_semantics = [#tpu.dimension_semantics<parallel>], iteration_bounds = array<i64: 1>, scalar_prefetch = 0 : i64, scratch_operands = 0 : i64, tpu.core_type = #tpu.core_type<tc>, window_params = [{transform_indices = @transform_0, window_bounds = array<i64: 16, 256>}, {pipeline_mode = #tpu.pipeline_mode<synchronous>, transform_indices = @transform_1, window_bounds = array<i64: 256, 128>}, {pipeline_mode = #tpu.pipeline_mode<synchronous>, transform_indices = @transform_2, window_bounds = array<i64: 1, 128>}, {transform_indices = @transform_3, window_bounds = array<i64: 16, 128>}, {transform_indices = @transform_4, window_bounds = array<i64: 16, 128>}]} {
    %c0 = arith.constant 0 : index
    %c0_0 = arith.constant 0 : index
    %0 = vector.load %arg1[%c0, %c0_0] : memref<16x256xbf16, #tpu.memory_space<vmem>>, vector<16x256xbf16>
    %c0_1 = arith.constant 0 : index
    %c0_2 = arith.constant 0 : index
    %1 = vector.load %arg2[%c0_1, %c0_2] : memref<256x128xbf16, #tpu.memory_space<vmem>>, vector<256x128xbf16>
    %cst = arith.constant dense<0.000000e+00> : vector<16x128xf32>
    %2 = tpu.matmul %0, %1, %cst {dimension_numbers = #tpu.dot_dimension_numbers<[1], [0], [0], [1], [0, 0, 1, 1], [], []>} : vector<16x256xbf16>, vector<256x128xbf16>, vector<16x128xf32> -> vector<16x128xf32>
    %c0_3 = arith.constant 0 : index
    %c0_4 = arith.constant 0 : index
    %3 = vector.load %arg3[%c0_3, %c0_4] : memref<1x128xf32, #tpu.memory_space<vmem>>, vector<1x128xf32>
    %4 = vector.broadcast %3 : vector<1x128xf32> to vector<16x128xf32>
    %5 = arith.addf %2, %4 : vector<16x128xf32>
    %c0_5 = arith.constant 0 : index
    %c0_6 = arith.constant 0 : index
    %6 = vector.load %arg4[%c0_5, %c0_6] : memref<16x128xbf16, #tpu.memory_space<vmem>>, vector<16x128xbf16>
    %7 = arith.extf %6 : vector<16x128xbf16> to vector<16x128xf32>
    %8 = arith.addf %5, %7 : vector<16x128xf32>
    %9 = arith.truncf %8 : vector<16x128xf32> to vector<16x128xbf16>
    %c0_7 = arith.constant 0 : index
    %c0_8 = arith.constant 0 : index
    %10 = vector.load %arg5[%c0_7, %c0_8] : memref<16x128xbf16, #tpu.memory_space<vmem>>, vector<16x128xbf16>
    tpu.vector_store %arg5[%c0_7, %c0_8], %9 {strides = array<i32>} : memref<16x128xbf16, #tpu.memory_space<vmem>>, vector<16x128xbf16>,
    return
  }
  func.func @transform_0(%arg0: i32) -> (i32, i32) {
    %c0_i32 = arith.constant 0 : i32
    %c0_i32_0 = arith.constant 0 : i32
    return %arg0, %c0_i32 : i32, i32
  }
  func.func @transform_1(%arg0: i32) -> (i32, i32) {
    %c0_i32 = arith.constant 0 : i32
    %c0_i32_0 = arith.constant 0 : i32
    %c0_i32_1 = arith.constant 0 : i32
    return %c0_i32, %c0_i32_0 : i32, i32
  }
  func.func @transform_2(%arg0: i32) -> (i32, i32) {
    %c0_i32 = arith.constant 0 : i32
    %c0_i32_0 = arith.constant 0 : i32
    %c0_i32_1 = arith.constant 0 : i32
    return %c0_i32, %c0_i32_0 : i32, i32
  }
  func.func @transform_3(%arg0: i32) -> (i32, i32) {
    %c0_i32 = arith.constant 0 : i32
    %c0_i32_0 = arith.constant 0 : i32
    return %arg0, %c0_i32 : i32, i32
  }
  func.func @transform_4(%arg0: i32) -> (i32, i32) {
    %c0_i32 = arith.constant 0 : i32
    %c0_i32_0 = arith.constant 0 : i32
    return %arg0, %c0_i32 : i32, i32
  }
}

module attributes {stable_mosaic.version = 11 : i64} {
  func.func @_layernorm_kernel(%arg0: i32, %arg1: memref<8x64xbf16, #tpu.memory_space<vmem>>, %arg2: memref<1x64xf32, #tpu.memory_space<vmem>>, %arg3: memref<1x64xf32, #tpu.memory_space<vmem>>, %arg4: memref<8x64xbf16, #tpu.memory_space<vmem>>) attributes {dimension_semantics = [#tpu.dimension_semantics<parallel>], iteration_bounds = array<i64: 1>, scalar_prefetch = 0 : i64, scratch_operands = 0 : i64, tpu.core_type = #tpu.core_type<tc>, window_params = [{transform_indices = @transform_0, window_bounds = array<i64: 8, 64>}, {pipeline_mode = #tpu.pipeline_mode<synchronous>, transform_indices = @transform_1, window_bounds = array<i64: 1, 64>}, {pipeline_mode = #tpu.pipeline_mode<synchronous>, transform_indices = @transform_2, window_bounds = array<i64: 1, 64>}, {transform_indices = @transform_3, window_bounds = array<i64: 8, 64>}]} {
    %c0 = arith.constant 0 : index
    %c0_0 = arith.constant 0 : index
    %0 = vector.load %arg1[%c0, %c0_0] : memref<8x64xbf16, #tpu.memory_space<vmem>>, vector<8x64xbf16>
    %1 = arith.extf %0 : vector<8x64xbf16> to vector<8x64xf32>
    %cst = arith.constant dense<0.000000e+00> : vector<8xf32>
    %2 = vector.multi_reduction <add>, %1, %cst [1] : vector<8x64xf32> to vector<8xf32>
    %3 = vector.shape_cast %2 : vector<8xf32> to vector<8x1xf32>
    %cst_1 = arith.constant 6.400000e+01 : f32
    %4 = vector.broadcast %cst_1 : f32 to vector<8x1xf32>
    %5 = arith.divf %3, %4 : vector<8x1xf32>
    %6 = vector.broadcast %5 : vector<8x1xf32> to vector<8x64xf32>
    %7 = arith.subf %1, %6 : vector<8x64xf32>
    %8 = arith.mulf %7, %7 : vector<8x64xf32>
    %cst_2 = arith.constant dense<0.000000e+00> : vector<8xf32>
    %9 = vector.multi_reduction <add>, %8, %cst_2 [1] : vector<8x64xf32> to vector<8xf32>
    %10 = vector.shape_cast %9 : vector<8xf32> to vector<8x1xf32>
    %cst_3 = arith.constant 6.400000e+01 : f32
    %11 = vector.broadcast %cst_3 : f32 to vector<8x1xf32>
    %12 = arith.divf %10, %11 : vector<8x1xf32>
    %13 = vector.broadcast %5 : vector<8x1xf32> to vector<8x64xf32>
    %14 = arith.subf %1, %13 : vector<8x64xf32>
    %cst_4 = arith.constant 9.99999974E-6 : f32
    %15 = vector.broadcast %cst_4 : f32 to vector<8x1xf32>
    %16 = arith.addf %12, %15 : vector<8x1xf32>
    %17 = math.rsqrt %16 : vector<8x1xf32>
    %18 = vector.broadcast %17 : vector<8x1xf32> to vector<8x64xf32>
    %19 = arith.mulf %14, %18 : vector<8x64xf32>
    %c0_5 = arith.constant 0 : index
    %c0_6 = arith.constant 0 : index
    %20 = vector.load %arg2[%c0_5, %c0_6] : memref<1x64xf32, #tpu.memory_space<vmem>>, vector<1x64xf32>
    %21 = vector.broadcast %20 : vector<1x64xf32> to vector<8x64xf32>
    %22 = arith.mulf %19, %21 : vector<8x64xf32>
    %c0_7 = arith.constant 0 : index
    %c0_8 = arith.constant 0 : index
    %23 = vector.load %arg3[%c0_7, %c0_8] : memref<1x64xf32, #tpu.memory_space<vmem>>, vector<1x64xf32>
    %24 = vector.broadcast %23 : vector<1x64xf32> to vector<8x64xf32>
    %25 = arith.addf %22, %24 : vector<8x64xf32>
    %26 = arith.truncf %25 : vector<8x64xf32> to vector<8x64xbf16>
    %c0_9 = arith.constant 0 : index
    %c0_10 = arith.constant 0 : index
    %27 = vector.load %arg4[%c0_9, %c0_10] : memref<8x64xbf16, #tpu.memory_space<vmem>>, vector<8x64xbf16>
    tpu.vector_store %arg4[%c0_9, %c0_10], %26 {strides = array<i32>} : memref<8x64xbf16, #tpu.memory_space<vmem>>, vector<8x64xbf16>,
    return
  }
  func.func @transform_0(%arg0: i32) -> (i32, i32) {
    %c0_i32 = arith.constant 0 : i32
    %c0_i32_0 = arith.constant 0 : i32
    return %arg0, %c0_i32 : i32, i32
  }
  func.func @transform_1(%arg0: i32) -> (i32, i32) {
    %c0_i32 = arith.constant 0 : i32
    %c0_i32_0 = arith.constant 0 : i32
    %c0_i32_1 = arith.constant 0 : i32
    return %c0_i32, %c0_i32_0 : i32, i32
  }
  func.func @transform_2(%arg0: i32) -> (i32, i32) {
    %c0_i32 = arith.constant 0 : i32
    %c0_i32_0 = arith.constant 0 : i32
    %c0_i32_1 = arith.constant 0 : i32
    return %c0_i32, %c0_i32_0 : i32, i32
  }
  func.func @transform_3(%arg0: i32) -> (i32, i32) {
    %c0_i32 = arith.constant 0 : i32
    %c0_i32_0 = arith.constant 0 : i32
    return %arg0, %c0_i32 : i32, i32
  }
}

module attributes {stable_mosaic.version = 11 : i64} {
  func.func @kernel(%arg0: i32, %arg1: memref<8x128xbf16, #tpu.memory_space<vmem>>, %arg2: memref<128x128xbf16, #tpu.memory_space<vmem>>, %arg3: memref<8x128xf32, #tpu.memory_space<vmem>>) attributes {dimension_semantics = [#tpu.dimension_semantics<parallel>], iteration_bounds = array<i64: 1>, scalar_prefetch = 0 : i64, scratch_operands = 0 : i64, tpu.core_type = #tpu.core_type<tc>, window_params = [{transform_indices = @transform_0, window_bounds = array<i64: 8, 128>}, {pipeline_mode = #tpu.pipeline_mode<synchronous>, transform_indices = @transform_1, window_bounds = array<i64: 128, 128>}, {transform_indices = @transform_2, window_bounds = array<i64: 8, 128>}]} {
    %c0 = arith.constant 0 : index
    %c0_0 = arith.constant 0 : index
    %0 = vector.load %arg1[%c0, %c0_0] : memref<8x128xbf16, #tpu.memory_space<vmem>>, vector<8x128xbf16>
    %c0_1 = arith.constant 0 : index
    %c0_2 = arith.constant 0 : index
    %1 = vector.load %arg2[%c0_1, %c0_2] : memref<128x128xbf16, #tpu.memory_space<vmem>>, vector<128x128xbf16>
    %cst = arith.constant dense<0.000000e+00> : vector<8x128xf32>
    %2 = tpu.matmul %0, %1, %cst {dimension_numbers = #tpu.dot_dimension_numbers<[1], [0], [0], [1], [0, 0, 1, 1], [], []>} : vector<8x128xbf16>, vector<128x128xbf16>, vector<8x128xf32> -> vector<8x128xf32>
    %c0_3 = arith.constant 0 : index
    %c0_4 = arith.constant 0 : index
    %3 = vector.load %arg3[%c0_3, %c0_4] : memref<8x128xf32, #tpu.memory_space<vmem>>, vector<8x128xf32>
    tpu.vector_store %arg3[%c0_3, %c0_4], %2 {strides = array<i32>} : memref<8x128xf32, #tpu.memory_space<vmem>>, vector<8x128xf32>,
    return
  }
  func.func @transform_0(%arg0: i32) -> (i32, i32) {
    %c0_i32 = arith.constant 0 : i32
    %c0_i32_0 = arith.constant 0 : i32
    return %arg0, %c0_i32 : i32, i32
  }
  func.func @transform_1(%arg0: i32) -> (i32, i32) {
    %c0_i32 = arith.constant 0 : i32
    %c0_i32_0 = arith.constant 0 : i32
    %c0_i32_1 = arith.constant 0 : i32
    return %c0_i32, %c0_i32_0 : i32, i32
  }
  func.func @transform_2(%arg0: i32) -> (i32, i32) {
    %c0_i32 = arith.constant 0 : i32
    %c0_i32_0 = arith.constant 0 : i32
    return %arg0, %c0_i32 : i32, i32
  }
}

module attributes {stable_mosaic.version = 11 : i64} {
  func.func @kernel(%arg0: i32, %arg1: memref<16x128xbf16, #tpu.memory_space<vmem>>, %arg2: memref<128x128xbf16, #tpu.memory_space<vmem>>, %arg3: memref<1x128xf32, #tpu.memory_space<vmem>>, %arg4: memref<16x128xbf16, #tpu.memory_space<vmem>>) attributes {dimension_semantics = [#tpu.dimension_semantics<parallel>], iteration_bounds = array<i64: 1>, scalar_prefetch = 0 : i64, scratch_operands = 0 : i64, tpu.core_type = #tpu.core_type<tc>, window_params = [{transform_indices = @transform_0, window_bounds = array<i64: 16, 128>}, {pipeline_mode = #tpu.pipeline_mode<synchronous>, transform_indices = @transform_1, window_bounds = array<i64: 128, 128>}, {pipeline_mode = #tpu.pipeline_mode<synchronous>, transform_indices = @transform_2, window_bounds = array<i64: 1, 128>}, {transform_indices = @transform_3, window_bounds = array<i64: 16, 128>}]} {
    %c0 = arith.constant 0 : index
    %c0_0 = arith.constant 0 : index
    %0 = vector.load %arg1[%c0, %c0_0] : memref<16x128xbf16, #tpu.memory_space<vmem>>, vector<16x128xbf16>
    %c0_1 = arith.constant 0 : index
    %c0_2 = arith.constant 0 : index
    %1 = vector.load %arg2[%c0_1, %c0_2] : memref<128x128xbf16, #tpu.memory_space<vmem>>, vector<128x128xbf16>
    %cst = arith.constant dense<0.000000e+00> : vector<16x128xf32>
    %2 = tpu.matmul %0, %1, %cst {dimension_numbers = #tpu.dot_dimension_numbers<[1], [0], [0], [1], [0, 0, 1, 1], [], []>} : vector<16x128xbf16>, vector<128x128xbf16>, vector<16x128xf32> -> vector<16x128xf32>
    %c0_3 = arith.constant 0 : index
    %c0_4 = arith.constant 0 : index
    %3 = vector.load %arg3[%c0_3, %c0_4] : memref<1x128xf32, #tpu.memory_space<vmem>>, vector<1x128xf32>
    %4 = vector.broadcast %3 : vector<1x128xf32> to vector<16x128xf32>
    %5 = arith.addf %2, %4 : vector<16x128xf32>
    %6 = arith.truncf %5 : vector<16x128xf32> to vector<16x128xbf16>
    %c0_5 = arith.constant 0 : index
    %c0_6 = arith.constant 0 : index
    %7 = vector.load %arg4[%c0_5, %c0_6] : memref<16x128xbf16, #tpu.memory_space<vmem>>, vector<16x128xbf16>
    tpu.vector_store %arg4[%c0_5, %c0_6], %6 {strides = array<i32>} : memref<16x128xbf16, #tpu.memory_space<vmem>>, vector<16x128xbf16>,
    return
  }
  func.func @transform_0(%arg0: i32) -> (i32, i32) {
    %c0_i32 = arith.constant 0 : i32
    %c0_i32_0 = arith.constant 0 : i32
    return %arg0, %c0_i32 : i32, i32
  }
  func.func @transform_1(%arg0: i32) -> (i32, i32) {
    %c0_i32 = arith.constant 0 : i32
    %c0_i32_0 = arith.constant 0 : i32
    %c0_i32_1 = arith.constant 0 : i32
    return %c0_i32, %c0_i32_0 : i32, i32
  }
  func.func @transform_2(%arg0: i32) -> (i32, i32) {
    %c0_i32 = arith.constant 0 : i32
    %c0_i32_0 = arith.constant 0 : i32
    %c0_i32_1 = arith.constant 0 : i32
    return %c0_i32, %c0_i32_0 : i32, i32
  }
  func.func @transform_3(%arg0: i32) -> (i32, i32) {
    %c0_i32 = arith.constant 0 : i32
    %c0_i32_0 = arith.constant 0 : i32
    return %arg0, %c0_i32 : i32, i32
  }
}

module attributes {stable_mosaic.version = 11 : i64} {
  func.func @_layernorm_kernel(%arg0: i32, %arg1: memref<16x32xbf16, #tpu.memory_space<vmem>>, %arg2: memref<1x32xf32, #tpu.memory_space<vmem>>, %arg3: memref<1x32xf32, #tpu.memory_space<vmem>>, %arg4: memref<16x32xbf16, #tpu.memory_space<vmem>>) attributes {dimension_semantics = [#tpu.dimension_semantics<parallel>], iteration_bounds = array<i64: 1>, scalar_prefetch = 0 : i64, scratch_operands = 0 : i64, tpu.core_type = #tpu.core_type<tc>, window_params = [{transform_indices = @transform_0, window_bounds = array<i64: 16, 32>}, {pipeline_mode = #tpu.pipeline_mode<synchronous>, transform_indices = @transform_1, window_bounds = array<i64: 1, 32>}, {pipeline_mode = #tpu.pipeline_mode<synchronous>, transform_indices = @transform_2, window_bounds = array<i64: 1, 32>}, {transform_indices = @transform_3, window_bounds = array<i64: 16, 32>}]} {
    %c0 = arith.constant 0 : index
    %c0_0 = arith.constant 0 : index
    %0 = vector.load %arg1[%c0, %c0_0] : memref<16x32xbf16, #tpu.memory_space<vmem>>, vector<16x32xbf16>
    %1 = arith.extf %0 : vector<16x32xbf16> to vector<16x32xf32>
    %cst = arith.constant dense<0.000000e+00> : vector<16xf32>
    %2 = vector.multi_reduction <add>, %1, %cst [1] : vector<16x32xf32> to vector<16xf32>
    %3 = vector.shape_cast %2 : vector<16xf32> to vector<16x1xf32>
    %cst_1 = arith.constant 3.200000e+01 : f32
    %4 = vector.broadcast %cst_1 : f32 to vector<16x1xf32>
    %5 = arith.divf %3, %4 : vector<16x1xf32>
    %6 = vector.broadcast %5 : vector<16x1xf32> to vector<16x32xf32>
    %7 = arith.subf %1, %6 : vector<16x32xf32>
    %8 = arith.mulf %7, %7 : vector<16x32xf32>
    %cst_2 = arith.constant dense<0.000000e+00> : vector<16xf32>
    %9 = vector.multi_reduction <add>, %8, %cst_2 [1] : vector<16x32xf32> to vector<16xf32>
    %10 = vector.shape_cast %9 : vector<16xf32> to vector<16x1xf32>
    %cst_3 = arith.constant 3.200000e+01 : f32
    %11 = vector.broadcast %cst_3 : f32 to vector<16x1xf32>
    %12 = arith.divf %10, %11 : vector<16x1xf32>
    %13 = vector.broadcast %5 : vector<16x1xf32> to vector<16x32xf32>
    %14 = arith.subf %1, %13 : vector<16x32xf32>
    %cst_4 = arith.constant 9.99999974E-6 : f32
    %15 = vector.broadcast %cst_4 : f32 to vector<16x1xf32>
    %16 = arith.addf %12, %15 : vector<16x1xf32>
    %17 = math.rsqrt %16 : vector<16x1xf32>
    %18 = vector.broadcast %17 : vector<16x1xf32> to vector<16x32xf32>
    %19 = arith.mulf %14, %18 : vector<16x32xf32>
    %c0_5 = arith.constant 0 : index
    %c0_6 = arith.constant 0 : index
    %20 = vector.load %arg2[%c0_5, %c0_6] : memref<1x32xf32, #tpu.memory_space<vmem>>, vector<1x32xf32>
    %21 = vector.broadcast %20 : vector<1x32xf32> to vector<16x32xf32>
    %22 = arith.mulf %19, %21 : vector<16x32xf32>
    %c0_7 = arith.constant 0 : index
    %c0_8 = arith.constant 0 : index
    %23 = vector.load %arg3[%c0_7, %c0_8] : memref<1x32xf32, #tpu.memory_space<vmem>>, vector<1x32xf32>
    %24 = vector.broadcast %23 : vector<1x32xf32> to vector<16x32xf32>
    %25 = arith.addf %22, %24 : vector<16x32xf32>
    %26 = arith.truncf %25 : vector<16x32xf32> to vector<16x32xbf16>
    %c0_9 = arith.constant 0 : index
    %c0_10 = arith.constant 0 : index
    %27 = vector.load %arg4[%c0_9, %c0_10] : memref<16x32xbf16, #tpu.memory_space<vmem>>, vector<16x32xbf16>
    tpu.vector_store %arg4[%c0_9, %c0_10], %26 {strides = array<i32>} : memref<16x32xbf16, #tpu.memory_space<vmem>>, vector<16x32xbf16>,
    return
  }
  func.func @transform_0(%arg0: i32) -> (i32, i32) {
    %c0_i32 = arith.constant 0 : i32
    %c0_i32_0 = arith.constant 0 : i32
    return %arg0, %c0_i32 : i32, i32
  }
  func.func @transform_1(%arg0: i32) -> (i32, i32) {
    %c0_i32 = arith.constant 0 : i32
    %c0_i32_0 = arith.constant 0 : i32
    %c0_i32_1 = arith.constant 0 : i32
    return %c0_i32, %c0_i32_0 : i32, i32
  }
  func.func @transform_2(%arg0: i32) -> (i32, i32) {
    %c0_i32 = arith.constant 0 : i32
    %c0_i32_0 = arith.constant 0 : i32
    %c0_i32_1 = arith.constant 0 : i32
    return %c0_i32, %c0_i32_0 : i32, i32
  }
  func.func @transform_3(%arg0: i32) -> (i32, i32) {
    %c0_i32 = arith.constant 0 : i32
    %c0_i32_0 = arith.constant 0 : i32
    return %arg0, %c0_i32 : i32, i32
  }
}

module attributes {stable_mosaic.version = 11 : i64} {
  func.func @_flash_attention_kernel(%arg0: i32, %arg1: i32, %arg2: i32, %arg3: i32, %arg4: memref<1x4x8x8xbf16, #tpu.memory_space<vmem>>, %arg5: memref<1x4x8x8xbf16, #tpu.memory_space<vmem>>, %arg6: memref<1x4x8x8xbf16, #tpu.memory_space<vmem>>, %arg7: memref<1x8x32xbf16, #tpu.memory_space<vmem>>, %arg8: memref<4x8x1xf32, #tpu.memory_space<vmem>>, %arg9: memref<4x8x1xf32, #tpu.memory_space<vmem>>, %arg10: memref<4x8x8xf32, #tpu.memory_space<vmem>>) attributes {dimension_semantics = [#tpu.dimension_semantics<parallel>, #tpu.dimension_semantics<parallel>, #tpu.dimension_semantics<parallel>, #tpu.dimension_semantics<arbitrary>], iteration_bounds = array<i64: 2, 1, 1, 1>, scalar_prefetch = 0 : i64, scratch_operands = 3 : i64, tpu.core_type = #tpu.core_type<tc>, window_params = [{transform_indices = @transform_0, window_bounds = array<i64: 1, 4, 8, 8>}, {transform_indices = @transform_1, window_bounds = array<i64: 1, 4, 8, 8>}, {transform_indices = @transform_2, window_bounds = array<i64: 1, 4, 8, 8>}, {transform_indices = @transform_3, window_bounds = array<i64: 1, 8, 32>}]} {
    %c0_i32 = arith.constant 0 : i32
    %0 = arith.cmpi eq, %arg3, %c0_i32 : i32
    %1 = arith.extui %0 : i1 to i32
    %c0_i32_0 = arith.constant 0 : i32
    %2 = arith.cmpi ne, %1, %c0_i32_0 : i32
    scf.if %2 {
      %cst = arith.constant -1.000000e+30 : f32
      %9 = vector.broadcast %cst : f32 to vector<4x8x1xf32>
      %c0 = arith.constant 0 : index
      %c0_4 = arith.constant 0 : index
      %c0_5 = arith.constant 0 : index
      %10 = vector.load %arg8[%c0, %c0_4, %c0_5] : memref<4x8x1xf32, #tpu.memory_space<vmem>>, vector<4x8x1xf32>
      tpu.vector_store %arg8[%c0, %c0_4, %c0_5], %9 {strides = array<i32>} : memref<4x8x1xf32, #tpu.memory_space<vmem>>, vector<4x8x1xf32>,
      %cst_6 = arith.constant 0.000000e+00 : f32
      %11 = vector.broadcast %cst_6 : f32 to vector<4x8x1xf32>
      %c0_7 = arith.constant 0 : index
      %c0_8 = arith.constant 0 : index
      %c0_9 = arith.constant 0 : index
      %12 = vector.load %arg9[%c0_7, %c0_8, %c0_9] : memref<4x8x1xf32, #tpu.memory_space<vmem>>, vector<4x8x1xf32>
      tpu.vector_store %arg9[%c0_7, %c0_8, %c0_9], %11 {strides = array<i32>} : memref<4x8x1xf32, #tpu.memory_space<vmem>>, vector<4x8x1xf32>,
      %cst_10 = arith.constant 0.000000e+00 : f32
      %13 = vector.broadcast %cst_10 : f32 to vector<4x8x8xf32>
      %c0_11 = arith.constant 0 : index
      %c0_12 = arith.constant 0 : index
      %c0_13 = arith.constant 0 : index
      %14 = vector.load %arg10[%c0_11, %c0_12, %c0_13] : memref<4x8x8xf32, #tpu.memory_space<vmem>>, vector<4x8x8xf32>
      tpu.vector_store %arg10[%c0_11, %c0_12, %c0_13], %13 {strides = array<i32>} : memref<4x8x8xf32, #tpu.memory_space<vmem>>, vector<4x8x8xf32>,
    } else {
    }
    %3 = arith.cmpi sle, %arg3, %arg2 : i32
    %4 = arith.extui %3 : i1 to i32
    %c0_i32_1 = arith.constant 0 : i32
    %5 = arith.cmpi ne, %4, %c0_i32_1 : i32
    scf.if %5 {
      %c0 = arith.constant 0 : index
      %c0_4 = arith.constant 0 : index
      %c0_5 = arith.constant 0 : index
      %c0_6 = arith.constant 0 : index
      %9 = vector.load %arg4[%c0, %c0_4, %c0_5, %c0_6] : memref<1x4x8x8xbf16, #tpu.memory_space<vmem>>, vector<1x4x8x8xbf16>
      %10 = vector.shape_cast %9 : vector<1x4x8x8xbf16> to vector<4x8x8xbf16>
      %c0_7 = arith.constant 0 : index
      %c0_8 = arith.constant 0 : index
      %c0_9 = arith.constant 0 : index
      %c0_10 = arith.constant 0 : index
      %11 = vector.load %arg5[%c0_7, %c0_8, %c0_9, %c0_10] : memref<1x4x8x8xbf16, #tpu.memory_space<vmem>>, vector<1x4x8x8xbf16>
      %12 = vector.shape_cast %11 : vector<1x4x8x8xbf16> to vector<4x8x8xbf16>
      %c0_11 = arith.constant 0 : index
      %c0_12 = arith.constant 0 : index
      %c0_13 = arith.constant 0 : index
      %c0_14 = arith.constant 0 : index
      %13 = vector.load %arg6[%c0_11, %c0_12, %c0_13, %c0_14] : memref<1x4x8x8xbf16, #tpu.memory_space<vmem>>, vector<1x4x8x8xbf16>
      %14 = vector.shape_cast %13 : vector<1x4x8x8xbf16> to vector<4x8x8xbf16>
      "tpu.trace_start"() <{level = 10 : i32, message = "hqd,hkd->hqk"}> : () -> ()
      %cst = arith.constant dense<0.000000e+00> : vector<4x8x8xf32>
      %15 = tpu.matmul %10, %12, %cst {dimension_numbers = #tpu.dot_dimension_numbers<[2], [2], [1], [1], [0, 0, 0, 1, 1, 1], [0], [0]>} : vector<4x8x8xbf16>, vector<4x8x8xbf16>, vector<4x8x8xf32> -> vector<4x8x8xf32>
      "tpu.trace_stop"() : () -> ()
      %cst_15 = arith.constant 0.353553385 : f32
      %16 = vector.broadcast %cst_15 : f32 to vector<4x8x8xf32>
      %17 = arith.mulf %15, %16 : vector<4x8x8xf32>
      %c8_i32 = arith.constant 8 : i32
      %18 = arith.muli %arg3, %c8_i32 : i32
      %19 = tpu.iota {dimensions = array<i32: 2>} : vector<4x8x8xi32>
      %20 = vector.broadcast %18 : i32 to vector<4x8x8xi32>
      %21 = arith.addi %20, %19 : vector<4x8x8xi32>
      %c8_i32_16 = arith.constant 8 : i32
      %22 = arith.muli %arg2, %c8_i32_16 : i32
      %23 = tpu.iota {dimensions = array<i32: 1>} : vector<4x8x8xi32>
      %24 = vector.broadcast %22 : i32 to vector<4x8x8xi32>
      %25 = arith.addi %24, %23 : vector<4x8x8xi32>
      %26 = arith.cmpi sle, %21, %25 : vector<4x8x8xi32>
      %cst_17 = arith.constant -1.000000e+30 : f32
      %27 = vector.broadcast %cst_17 : f32 to vector<4x8x8xf32>
      %28 = arith.select %26, %17, %27 : vector<4x8x8xi1>, vector<4x8x8xf32>
      %c0_18 = arith.constant 0 : index
      %c0_19 = arith.constant 0 : index
      %c0_20 = arith.constant 0 : index
      %29 = vector.load %arg8[%c0_18, %c0_19, %c0_20] : memref<4x8x1xf32, #tpu.memory_space<vmem>>, vector<4x8x1xf32>
      %cst_21 = arith.constant dense<0xFF800000> : vector<4x8xf32>
      %30 = vector.multi_reduction <maximumf>, %28, %cst_21 [2] : vector<4x8x8xf32> to vector<4x8xf32>
      %31 = vector.shape_cast %30 : vector<4x8xf32> to vector<4x8x1xf32>
      %32 = arith.maximumf %29, %31 : vector<4x8x1xf32>
      %33 = arith.subf %29, %32 : vector<4x8x1xf32>
      %34 = math.exp %33 : vector<4x8x1xf32>
      %35 = vector.broadcast %32 : vector<4x8x1xf32> to vector<4x8x8xf32>
      %36 = arith.subf %28, %35 : vector<4x8x8xf32>
      %37 = math.exp %36 : vector<4x8x8xf32>
      %c0_22 = arith.constant 0 : index
      %c0_23 = arith.constant 0 : index
      %c0_24 = arith.constant 0 : index
      %38 = vector.load %arg9[%c0_22, %c0_23, %c0_24] : memref<4x8x1xf32, #tpu.memory_space<vmem>>, vector<4x8x1xf32>
      %39 = arith.mulf %34, %38 : vector<4x8x1xf32>
      %cst_25 = arith.constant dense<0.000000e+00> : vector<4x8xf32>
      %40 = vector.multi_reduction <add>, %37, %cst_25 [2] : vector<4x8x8xf32> to vector<4x8xf32>
      %41 = vector.shape_cast %40 : vector<4x8xf32> to vector<4x8x1xf32>
      %42 = arith.addf %39, %41 : vector<4x8x1xf32>
      %c0_26 = arith.constant 0 : index
      %c0_27 = arith.constant 0 : index
      %c0_28 = arith.constant 0 : index
      %43 = vector.load %arg9[%c0_26, %c0_27, %c0_28] : memref<4x8x1xf32, #tpu.memory_space<vmem>>, vector<4x8x1xf32>
      tpu.vector_store %arg9[%c0_26, %c0_27, %c0_28], %42 {strides = array<i32>} : memref<4x8x1xf32, #tpu.memory_space<vmem>>, vector<4x8x1xf32>,
      %c0_29 = arith.constant 0 : index
      %c0_30 = arith.constant 0 : index
      %c0_31 = arith.constant 0 : index
      %44 = vector.load %arg10[%c0_29, %c0_30, %c0_31] : memref<4x8x8xf32, #tpu.memory_space<vmem>>, vector<4x8x8xf32>
      %45 = vector.broadcast %34 : vector<4x8x1xf32> to vector<4x8x8xf32>
      %46 = arith.mulf %45, %44 : vector<4x8x8xf32>
      %47 = arith.truncf %37 : vector<4x8x8xf32> to vector<4x8x8xbf16>
      "tpu.trace_start"() <{level = 10 : i32, message = "hqk,hkd->hqd"}> : () -> ()
      %cst_32 = arith.constant dense<0.000000e+00> : vector<4x8x8xf32>
      %48 = tpu.matmul %47, %14, %cst_32 {dimension_numbers = #tpu.dot_dimension_numbers<[2], [1], [1], [2], [0, 0, 0, 1, 1, 2], [0], [0]>} : vector<4x8x8xbf16>, vector<4x8x8xbf16>, vector<4x8x8xf32> -> vector<4x8x8xf32>
      "tpu.trace_stop"() : () -> ()
      %49 = arith.addf %46, %48 : vector<4x8x8xf32>
      %c0_33 = arith.constant 0 : index
      %c0_34 = arith.constant 0 : index
      %c0_35 = arith.constant 0 : index
      %50 = vector.load %arg10[%c0_33, %c0_34, %c0_35] : memref<4x8x8xf32, #tpu.memory_space<vmem>>, vector<4x8x8xf32>
      tpu.vector_store %arg10[%c0_33, %c0_34, %c0_35], %49 {strides = array<i32>} : memref<4x8x8xf32, #tpu.memory_space<vmem>>, vector<4x8x8xf32>,
      %c0_36 = arith.constant 0 : index
      %c0_37 = arith.constant 0 : index
      %c0_38 = arith.constant 0 : index
      %51 = vector.load %arg8[%c0_36, %c0_37, %c0_38] : memref<4x8x1xf32, #tpu.memory_space<vmem>>, vector<4x8x1xf32>
      tpu.vector_store %arg8[%c0_36, %c0_37, %c0_38], %32 {strides = array<i32>} : memref<4x8x1xf32, #tpu.memory_space<vmem>>, vector<4x8x1xf32>,
    } else {
    }
    %c0_i32_2 = arith.constant 0 : i32
    %6 = arith.cmpi eq, %arg3, %c0_i32_2 : i32
    %7 = arith.extui %6 : i1 to i32
    %c0_i32_3 = arith.constant 0 : i32
    %8 = arith.cmpi ne, %7, %c0_i32_3 : i32
    scf.if %8 {
      %c0 = arith.constant 0 : index
      %c0_4 = arith.constant 0 : index
      %c0_5 = arith.constant 0 : index
      %9 = vector.load %arg9[%c0, %c0_4, %c0_5] : memref<4x8x1xf32, #tpu.memory_space<vmem>>, vector<4x8x1xf32>
      %10 = tpu.reciprocal %9 {approx = true} : vector<4x8x1xf32> -> vector<4x8x1xf32>
      %c0_6 = arith.constant 0 : index
      %c0_7 = arith.constant 0 : index
      %c0_8 = arith.constant 0 : index
      %11 = vector.load %arg10[%c0_6, %c0_7, %c0_8] : memref<4x8x8xf32, #tpu.memory_space<vmem>>, vector<4x8x8xf32>
      %12 = vector.broadcast %10 : vector<4x8x1xf32> to vector<4x8x8xf32>
      %13 = arith.mulf %11, %12 : vector<4x8x8xf32>
      %14 = vector.extract_strided_slice %13 {offsets = [0, 0, 0], sizes = [1, 8, 8], strides = [1, 1, 1]} : vector<4x8x8xf32> to vector<1x8x8xf32>
      %15 = vector.shape_cast %14 : vector<1x8x8xf32> to vector<8x8xf32>
      %16 = arith.truncf %15 : vector<8x8xf32> to vector<8x8xbf16>
      %c0_9 = arith.constant 0 : index
      %c0_10 = arith.constant 0 : index
      %c0_11 = arith.constant 0 : index
      %17 = vector.load %arg7[%c0_9, %c0_10, %c0_11] : memref<1x8x32xbf16, #tpu.memory_space<vmem>>, vector<1x8x8xbf16>
      %18 = vector.shape_cast %17 : vector<1x8x8xbf16> to vector<8x8xbf16>
      %19 = vector.shape_cast %16 : vector<8x8xbf16> to vector<1x8x8xbf16>
      tpu.vector_store %arg7[%c0_9, %c0_10, %c0_11], %19 {strides = array<i32>} : memref<1x8x32xbf16, #tpu.memory_space<vmem>>, vector<1x8x8xbf16>,
      %20 = vector.extract_strided_slice %13 {offsets = [1, 0, 0], sizes = [1, 8, 8], strides = [1, 1, 1]} : vector<4x8x8xf32> to vector<1x8x8xf32>
      %21 = vector.shape_cast %20 : vector<1x8x8xf32> to vector<8x8xf32>
      %22 = arith.truncf %21 : vector<8x8xf32> to vector<8x8xbf16>
      %c0_12 = arith.constant 0 : index
      %c0_13 = arith.constant 0 : index
      %c8 = arith.constant 8 : index
      %23 = vector.load %arg7[%c0_12, %c0_13, %c8] : memref<1x8x32xbf16, #tpu.memory_space<vmem>>, vector<1x8x8xbf16>
      %24 = vector.shape_cast %23 : vector<1x8x8xbf16> to vector<8x8xbf16>
      %25 = vector.shape_cast %22 : vector<8x8xbf16> to vector<1x8x8xbf16>
      tpu.vector_store %arg7[%c0_12, %c0_13, %c8], %25 {strides = array<i32>} : memref<1x8x32xbf16, #tpu.memory_space<vmem>>, vector<1x8x8xbf16>,
      %26 = vector.extract_strided_slice %13 {offsets = [2, 0, 0], sizes = [1, 8, 8], strides = [1, 1, 1]} : vector<4x8x8xf32> to vector<1x8x8xf32>
      %27 = vector.shape_cast %26 : vector<1x8x8xf32> to vector<8x8xf32>
      %28 = arith.truncf %27 : vector<8x8xf32> to vector<8x8xbf16>
      %c0_14 = arith.constant 0 : index
      %c0_15 = arith.constant 0 : index
      %c16 = arith.constant 16 : index
      %29 = vector.load %arg7[%c0_14, %c0_15, %c16] : memref<1x8x32xbf16, #tpu.memory_space<vmem>>, vector<1x8x8xbf16>
      %30 = vector.shape_cast %29 : vector<1x8x8xbf16> to vector<8x8xbf16>
      %31 = vector.shape_cast %28 : vector<8x8xbf16> to vector<1x8x8xbf16>
      tpu.vector_store %arg7[%c0_14, %c0_15, %c16], %31 {strides = array<i32>} : memref<1x8x32xbf16, #tpu.memory_space<vmem>>, vector<1x8x8xbf16>,
      %32 = vector.extract_strided_slice %13 {offsets = [3, 0, 0], sizes = [1, 8, 8], strides = [1, 1, 1]} : vector<4x8x8xf32> to vector<1x8x8xf32>
      %33 = vector.shape_cast %32 : vector<1x8x8xf32> to vector<8x8xf32>
      %34 = arith.truncf %33 : vector<8x8xf32> to vector<8x8xbf16>
      %c0_16 = arith.constant 0 : index
      %c0_17 = arith.constant 0 : index
      %c24 = arith.constant 24 : index
      %35 = vector.load %arg7[%c0_16, %c0_17, %c24] : memref<1x8x32xbf16, #tpu.memory_space<vmem>>, vector<1x8x8xbf16>
      %36 = vector.shape_cast %35 : vector<1x8x8xbf16> to vector<8x8xbf16>
      %37 = vector.shape_cast %34 : vector<8x8xbf16> to vector<1x8x8xbf16>
      tpu.vector_store %arg7[%c0_16, %c0_17, %c24], %37 {strides = array<i32>} : memref<1x8x32xbf16, #tpu.memory_space<vmem>>, vector<1x8x8xbf16>,
    } else {
    }
    return
  }
  func.func @transform_0(%arg0: i32, %arg1: i32, %arg2: i32, %arg3: i32) -> (i32, i32, i32, i32) {
    %c0_i32 = arith.constant 0 : i32
    %c0_i32_0 = arith.constant 0 : i32
    return %arg0, %arg1, %arg2, %c0_i32 : i32, i32, i32, i32
  }
  func.func @transform_1(%arg0: i32, %arg1: i32, %arg2: i32, %arg3: i32) -> (i32, i32, i32, i32) {
    %c0_i32 = arith.constant 0 : i32
    %c0_i32_0 = arith.constant 0 : i32
    return %arg0, %arg1, %arg3, %c0_i32 : i32, i32, i32, i32
  }
  func.func @transform_2(%arg0: i32, %arg1: i32, %arg2: i32, %arg3: i32) -> (i32, i32, i32, i32) {
    %c0_i32 = arith.constant 0 : i32
    %c0_i32_0 = arith.constant 0 : i32
    return %arg0, %arg1, %arg3, %c0_i32 : i32, i32, i32, i32
  }
  func.func @transform_3(%arg0: i32, %arg1: i32, %arg2: i32, %arg3: i32) -> (i32, i32, i32) {
    %c0_i32 = arith.constant 0 : i32
    return %arg0, %arg2, %arg1 : i32, i32, i32
  }
}

module attributes {stable_mosaic.version = 11 : i64} {
  func.func @kernel(%arg0: i32, %arg1: memref<16x128xbf16, #tpu.memory_space<vmem>>, %arg2: memref<128x128xbf16, #tpu.memory_space<vmem>>, %arg3: memref<1x128xf32, #tpu.memory_space<vmem>>, %arg4: memref<16x128xbf16, #tpu.memory_space<vmem>>) attributes {dimension_semantics = [#tpu.dimension_semantics<parallel>], iteration_bounds = array<i64: 1>, scalar_prefetch = 0 : i64, scratch_operands = 0 : i64, tpu.core_type = #tpu.core_type<tc>, window_params = [{transform_indices = @transform_0, window_bounds = array<i64: 16, 128>}, {pipeline_mode = #tpu.pipeline_mode<synchronous>, transform_indices = @transform_1, window_bounds = array<i64: 128, 128>}, {pipeline_mode = #tpu.pipeline_mode<synchronous>, transform_indices = @transform_2, window_bounds = array<i64: 1, 128>}, {transform_indices = @transform_3, window_bounds = array<i64: 16, 128>}]} {
    %c0 = arith.constant 0 : index
    %c0_0 = arith.constant 0 : index
    %0 = vector.load %arg1[%c0, %c0_0] : memref<16x128xbf16, #tpu.memory_space<vmem>>, vector<16x128xbf16>
    %c0_1 = arith.constant 0 : index
    %c0_2 = arith.constant 0 : index
    %1 = vector.load %arg2[%c0_1, %c0_2] : memref<128x128xbf16, #tpu.memory_space<vmem>>, vector<128x128xbf16>
    %cst = arith.constant dense<0.000000e+00> : vector<16x128xf32>
    %2 = tpu.matmul %0, %1, %cst {dimension_numbers = #tpu.dot_dimension_numbers<[1], [0], [0], [1], [0, 0, 1, 1], [], []>} : vector<16x128xbf16>, vector<128x128xbf16>, vector<16x128xf32> -> vector<16x128xf32>
    %c0_3 = arith.constant 0 : index
    %c0_4 = arith.constant 0 : index
    %3 = vector.load %arg3[%c0_3, %c0_4] : memref<1x128xf32, #tpu.memory_space<vmem>>, vector<1x128xf32>
    %4 = vector.broadcast %3 : vector<1x128xf32> to vector<16x128xf32>
    %5 = arith.addf %2, %4 : vector<16x128xf32>
    %cst_5 = arith.constant 1.702000e+00 : f32
    %6 = vector.broadcast %cst_5 : f32 to vector<16x128xf32>
    %7 = arith.mulf %6, %5 : vector<16x128xf32>
    %8 = arith.negf %7 : vector<16x128xf32>
    %9 = math.exp %8 : vector<16x128xf32>
    %cst_6 = arith.constant 1.000000e+00 : f32
    %10 = vector.broadcast %cst_6 : f32 to vector<16x128xf32>
    %11 = arith.addf %10, %9 : vector<16x128xf32>
    %12 = arith.divf %10, %11 : vector<16x128xf32>
    %13 = arith.mulf %5, %12 : vector<16x128xf32>
    %14 = arith.truncf %13 : vector<16x128xf32> to vector<16x128xbf16>
    %c0_7 = arith.constant 0 : index
    %c0_8 = arith.constant 0 : index
    %15 = vector.load %arg4[%c0_7, %c0_8] : memref<16x128xbf16, #tpu.memory_space<vmem>>, vector<16x128xbf16>
    tpu.vector_store %arg4[%c0_7, %c0_8], %14 {strides = array<i32>} : memref<16x128xbf16, #tpu.memory_space<vmem>>, vector<16x128xbf16>,
    return
  }
  func.func @transform_0(%arg0: i32) -> (i32, i32) {
    %c0_i32 = arith.constant 0 : i32
    %c0_i32_0 = arith.constant 0 : i32
    return %arg0, %c0_i32 : i32, i32
  }
  func.func @transform_1(%arg0: i32) -> (i32, i32) {
    %c0_i32 = arith.constant 0 : i32
    %c0_i32_0 = arith.constant 0 : i32
    %c0_i32_1 = arith.constant 0 : i32
    return %c0_i32, %c0_i32_0 : i32, i32
  }
  func.func @transform_2(%arg0: i32) -> (i32, i32) {
    %c0_i32 = arith.constant 0 : i32
    %c0_i32_0 = arith.constant 0 : i32
    %c0_i32_1 = arith.constant 0 : i32
    return %c0_i32, %c0_i32_0 : i32, i32
  }
  func.func @transform_3(%arg0: i32) -> (i32, i32) {
    %c0_i32 = arith.constant 0 : i32
    %c0_i32_0 = arith.constant 0 : i32
    return %arg0, %c0_i32 : i32, i32
  }
}

</mosaic_0001>

<bundles_post_ra>
// kernel: clip_forward.34
= control target key start
LH: loop header
LB: loop body
LE: loop exit
PB: predicated region body
PF: predicated region fallthrough
CT: control target
= control target key end

     0   :  { %s321_s1 = inlined_call_operand.vmem [shape: bf16[256,128], index: 1, kind: input, shape index: {}]   ;;  %s322_s0 = inlined_call_operand.vmem [shape: bf16[8,256], index: 0, kind: input, shape index: {}]   ;;  %s323_s2 = inlined_call_operand.vmem [shape: bf16[8,128], index: 2, kind: output, shape index: {}]  }
   0x1   :  { %v234_v0 = vld [vmem:[%s321_s1 + $0x40] sm:$0xff]   ;;  %v236_v2 = vld [vmem:[%s321_s1 + $0x48] sm:$0xff]   ;;  %v238_v4 = vld [vmem:[%s321_s1 + $0x50] sm:$0xff]  }
   0x2   :  { %v235_v1 = vld [vmem:[%s321_s1] sm:$0xff]   ;;  %212 = vmatprep.subr.bf16.mxu0 %v234_v0  ;;  %v237_v3 = vld [vmem:[%s321_s1 + $0x8] sm:$0xff]   ;;  %v239_v5 = vld [vmem:[%s321_s1 + $0x10] sm:$0xff]  }
   0x3   :  { %213 = vmatpush3.bf16.msra.mxu0 %v235_v1  ;;  %v240_v6 = vld [vmem:[%s321_s1 + $0x58] sm:$0xff]   ;;  %v242_v8 = vld [vmem:[%s321_s1 + $0x60] sm:$0xff]   ;;  %v244_v10 = vld [vmem:[%s321_s1 + $0x68] sm:$0xff]  }
   0x4   :  { %214 = vmatprep.subr.bf16.mxu0 %v236_v2  ;;  %v241_v7 = vld [vmem:[%s321_s1 + $0x18] sm:$0xff]   ;;  %v243_v9 = vld [vmem:[%s321_s1 + $0x20] sm:$0xff]   ;;  %v245_v13 = vld [vmem:[%s321_s1 + $0x28] sm:$0xff]  }
   0x5   :  { %v12_v11 = vld [vmem:[%s322_s0] sm:$0xff]  ;;  %v246_v14 = vld [vmem:[%s321_s1 + $0x70] sm:$0xff]   ;;  %v248_v16 = vld [vmem:[%s321_s1 + $0x78] sm:$0xff]  }
   0x6   :  { %v195_v12 = vcombine.high %v12_v11, %v12_v11  ;;  %v247_v15 = vld [vmem:[%s321_s1 + $0x30] sm:$0xff]   ;;  %v249_v17 = vld [vmem:[%s321_s1 + $0x38] sm:$0xff]   ;;  %v194_v18 = vcombine.low %v12_v11, %v12_v11 }
   0x7   :  { %215 = vmatpush3.bf16.msra.mxu0 %v237_v3 }
   0x8   :  { %216 = vmatprep.subr.bf16.mxu0 %v238_v4  ;;  %180 = vmatprep.mubr.bf16.mxu0 %v195_v12 }
   0xb   :  { %217 = vmatpush3.bf16.msra.mxu0 %v239_v5 }
   0xc   :  { %218 = vmatprep.subr.bf16.mxu0 %v240_v6 }
   0xf   :  { %219 = vmatpush3.bf16.msra.mxu0 %v241_v7 }
  0x10   :  { %220 = vmatprep.subr.bf16.mxu0 %v242_v8 }
  0x13   :  { %221 = vmatpush3.bf16.msra.mxu0 %v243_v9 }
  0x14   :  { %222 = vmatprep.subr.bf16.mxu0 %v244_v10 }
  0x17   :  { %223 = vmatpush3.bf16.msra.mxu0 %v245_v13 }
  0x18   :  { %224 = vmatprep.subr.bf16.mxu0 %v246_v14 }
  0x1b   :  { %225 = vmatpush3.bf16.msra.mxu0 %v247_v15 }
  0x1c   :  { %226 = vmatprep.subr.bf16.mxu0 %v248_v16 }
  0x1f   :  { %227 = vmatpush3.bf16.msra.mxu0 %v249_v17 }
  0x22   :  { %181 = vmatmul.mubr.bf16.vlgmr.msra.gmra.mrb[0].mxu0 %v194_v18 }
  0xf5   :  { %v228_v19 = vpop.f32.mrb[0].mxu0 }
  0xf6   :  { %v229_v20 = vpop.f32.mrb[1].mxu0 }
  0xf7   :  { %v230_v21 = vadd.f32 %v229_v20, %v228_v19  ;;  %v231_v22 = vpop.f32.mrb[2].mxu0 }
  0xf8   :  { %v232_v23 = vpop.f32.mrb[3].mxu0 }
  0xf9   :  { %v188_v24 = vpack.c.bf16 %v230_v21, %v230_v21 }
  0xfb   :  { %189 = vst [vmem:[%s323_s2] sm:$0xf] %v188_v24 }

// kernel: clip_forward.35
= control target key start
LH: loop header
LB: loop body
LE: loop exit
PB: predicated region body
PF: predicated region fallthrough
CT: control target
= control target key end

     0   :  { %vm18_vm0 = vcmask 523264   ;;  %vm72_vm1 = vcmask 519168   ;;  %s132_s0 = inlined_call_operand.vmem [shape: bf16[16,64], index: 0, kind: input, shape index: {}]   ;;  %s133_s1 = inlined_call_operand.vmem [shape: f32[1,64], index: 1, kind: input, shape index: {}]   ;;  %s134_s2 = inlined_call_operand.vmem [shape: f32[1,64], index: 2, kind: input, shape index: {}]   ;;  %s135_s3 = inlined_call_operand.vmem [shape: bf16[16,64], index: 3, kind: output, shape index: {}]  }
   0x1   :  { %v86_v0 = vld [vmem:[%s132_s0] sm:$0xff]  }
   0x2   :  { %v87_v1 = vunpack.c.l.bf16 %v86_v0  ;;  %v88_v2 = vunpack.c.h.bf16 %v86_v0  ;;  %v79_v22 = vld [vmem:[%s133_s1] ss:$0 sm:$0xff] }
   0x3   :  { %v80_v24 = vld [vmem:[%s134_s2] ss:$0 sm:$0xff] }
   0x4   :  { %v19_v3 = vsel %vm18_vm0, %v87_v1, 0.0  ;;  %v22_v4 = vsel %vm18_vm0, %v88_v2, 0.0 }
   0x5   :  { %20 = vadd.xlane.f32.xlu0 %v19_v3 }
   0x9   :  { %23 = vadd.xlane.f32.xlu0 %v22_v4 }
  0x92   :  { %v21_v5 = vpop.xlane.xlu0 %20 }
  0x93   :  { %v26_v6 = vmul.f32 0.015625, %v21_v5 }
  0x95   :  { %v28_v7 = vsub.f32 %v87_v1, %v26_v6 }
  0x96   :  { %v24_v8 = vpop.xlane.xlu0 %23 }
  0x97   :  { %v27_v9 = vmul.f32 0.015625, %v24_v8  ;;  %v30_v10 = vmul.f32 %v28_v7, %v28_v7 }
  0x99   :  { %v29_v11 = vsub.f32 %v88_v2, %v27_v9  ;;  %v32_v12 = vsel %vm18_vm0, %v30_v10, 0.0 }
  0x9a   :  { %33 = vadd.xlane.f32.xlu1 %v32_v12 }
  0x9b   :  { %v31_v13 = vmul.f32 %v29_v11, %v29_v11 }
  0x9d   :  { %v35_v14 = vsel %vm18_vm0, %v31_v13, 0.0 }
  0x9e   :  { %36 = vadd.xlane.f32.xlu1 %v35_v14 }
 0x127   :  { %v34_v15 = vpop.xlane.xlu1 %33 }
 0x128   :  { %v38_v16 = vmul.f32 0.015625, %v34_v15 }
 0x12a   :  { %v40_v17 = vadd.f32 1e-05, %v38_v16 }
 0x12b   :  { %v37_v18 = vpop.xlane.xlu1 %36 }
 0x12c   :  { %89 = vrsqrt.f32 %v40_v17  ;;  %v39_v19 = vmul.f32 0.015625, %v37_v18 }
 0x12e   :  { %v41_v20 = vadd.f32 1e-05, %v39_v19 }
 0x130   :  { %91 = vrsqrt.f32 %v41_v20 }
 0x136   :  { %v90_v21 = vpop.eup %89 }
 0x137   :  { %v44_v23 = vmul.f32 %v90_v21, %v28_v7 }
 0x139   :  { %v53_v25 = vmul.f32 %v79_v22, %v44_v23 }
 0x13a   :  { %v92_v26 = vpop.eup %91 }
 0x13b   :  { %v62_v27 = vadd.f32 %v80_v24, %v53_v25  ;;  %v45_v28 = vmul.f32 %v92_v26, %v29_v11 }
 0x13d   :  { %v83_v29 = vpack.c.bf16 %v62_v27, %v62_v27  ;;  %v54_v30 = vmul.f32 %v79_v22, %v45_v28 }
 0x13f   :  { %73 = vst.msk [vmem:[%s135_s3] sm:$0xf] %vm72_vm1, %v83_v29  ;;  %v63_v31 = vadd.f32 %v80_v24, %v54_v30 }
 0x141   :  { %v84_v32 = vpack.c.bf16 %v63_v31, %v63_v31 }
 0x143   :  { %74 = vst.msk [vmem:[%s135_s3 + $0x4] sm:$0xf] %vm72_vm1, %v84_v32 }

// kernel: clip_forward.37
= control target key start
LH: loop header
LB: loop body
LE: loop exit
PB: predicated region body
PF: predicated region fallthrough
CT: control target
= control target key end

     0   :  { %v239_v1 = vmov 0   ;;  %v35_v18 = vlaneseq  ;;  %s320_s1 = inlined_call_operand.vmem [shape: bf16[128,256], index: 1, kind: input, shape index: {}]   ;;  %s321_s0 = inlined_call_operand.vmem [shape: bf16[16,128], index: 0, kind: input, shape index: {}]   ;;  %s322_s2 = inlined_call_operand.vmem [shape: f32[1,256], index: 2, kind: input, shape index: {}]   ;;  %s323_s3 = inlined_call_operand.vmem [shape: bf16[16,256], index: 3, kind: output, shape index: {}]  }
   0x1   :  { %v214_v0 = vld [vmem:[%s320_s1 + $0x4] ss:$8 sps:$4 sm:$0xff]   ;;  %163 = vmatprep.mubr.bf16.mxu0 %v239_v1  ;;  %v216_v2 = vld [vmem:[%s320_s1] ss:$8 sps:$4 sm:$0xff]   ;;  %v217_v3 = vld [vmem:[%s320_s1 + $0x14] ss:$8 sps:$4 sm:$0xff]  }
   0x2   :  { %131 = vmatprep.subr.bf16.mxu0 %v214_v0  ;;  %v219_v4 = vld [vmem:[%s320_s1 + $0x10] ss:$8 sps:$4 sm:$0xff]   ;;  %v220_v5 = vld [vmem:[%s320_s1 + $0x24] ss:$8 sps:$4 sm:$0xff]   ;;  %v222_v6 = vld [vmem:[%s320_s1 + $0x20] ss:$8 sps:$4 sm:$0xff]  }
   0x3   :  { %132 = vmatpush1.bf16.msra.mxu0 %v216_v2  ;;  %v223_v7 = vld [vmem:[%s320_s1 + $0x34] ss:$8 sps:$4 sm:$0xff]   ;;  %v225_v8 = vld [vmem:[%s320_s1 + $0x30] ss:$8 sps:$4 sm:$0xff]   ;;  %v226_v9 = vld [vmem:[%s320_s1 + $0x44] ss:$8 sps:$4 sm:$0xff]  }
   0x4   :  { %133 = vmatprep.subr.bf16.mxu0 %v217_v3  ;;  %v228_v10 = vld [vmem:[%s320_s1 + $0x40] ss:$8 sps:$4 sm:$0xff]   ;;  %v229_v11 = vld [vmem:[%s320_s1 + $0x54] ss:$8 sps:$4 sm:$0xff]   ;;  %v231_v12 = vld [vmem:[%s320_s1 + $0x50] ss:$8 sps:$4 sm:$0xff]  }
   0x5   :  { %v232_v13 = vld [vmem:[%s320_s1 + $0x64] ss:$8 sps:$4 sm:$0xff]   ;;  %v234_v14 = vld [vmem:[%s320_s1 + $0x60] ss:$8 sps:$4 sm:$0xff]   ;;  %v235_v15 = vld [vmem:[%s320_s1 + $0x74] ss:$8 sps:$4 sm:$0xff]  }
   0x6   :  { %v237_v16 = vld [vmem:[%s320_s1 + $0x70] ss:$8 sps:$4 sm:$0xff]   ;;  %v238_v17 = vld [vmem:[%s321_s0] sm:$0xff]   ;;  %v36_v19 = vshrl.u32 %v35_v18, 7 }
   0x7   :  { %134 = vmatpush1.bf16.msra.mxu0 %v219_v4  ;;  %v33_v21 = vld [vmem:[%s322_s2] sm:$0x3] }
   0x8   :  { %135 = vmatprep.subr.bf16.mxu0 %v220_v5  ;;  %v37_v20 = vsub.s32 0, %v36_v19  ;;  %v41_v22 = vsub.s32 1, %v36_v19 }
   0xa   :  { %v38_v23 = vrot.slane %v33_v21, %v37_v20  ;;  %v42_v24 = vrot.slane %v33_v21, %v41_v22 }
   0xb   :  { %136 = vmatpush1.bf16.msra.mxu0 %v222_v6 }
   0xc   :  { %137 = vmatprep.subr.bf16.mxu0 %v223_v7 }
   0xf   :  { %138 = vmatpush1.bf16.msra.mxu0 %v225_v8 }
  0x10   :  { %139 = vmatprep.subr.bf16.mxu0 %v226_v9 }
  0x13   :  { %140 = vmatpush1.bf16.msra.mxu0 %v228_v10 }
  0x14   :  { %141 = vmatprep.subr.bf16.mxu0 %v229_v11 }
  0x17   :  { %142 = vmatpush1.bf16.msra.mxu0 %v231_v12 }
  0x18   :  { %143 = vmatprep.subr.bf16.mxu0 %v232_v13 }
  0x1b   :  { %144 = vmatpush1.bf16.msra.mxu0 %v234_v14 }
  0x1c   :  { %145 = vmatprep.subr.bf16.mxu0 %v235_v15 }
  0x1f   :  { %146 = vmatpush1.bf16.msra.mxu0 %v237_v16 }
  0x22   :  { %164 = vmatmul.mubr.bf16.vlgmr.msra.gmra.mrb[0].mxu0 %v238_v17 }
  0xf5   :  { %v165_v25 = vpop.f32.mrb[0].mxu0 }
  0xf6   :  { %v166_v26 = vadd.f32 %v165_v25, %v38_v23  ;;  %v167_v27 = vpop.f32.mrb[1].mxu0 }
  0xf7   :  { %v168_v28 = vadd.f32 %v167_v27, %v42_v24  ;;  %v169_v29 = vpop.f32.mrb[2].mxu0 }
  0xf8   :  { %v170_v30 = vadd.f32 %v169_v29, %v38_v23  ;;  %v171_v31 = vpop.f32.mrb[3].mxu0 }
  0xf9   :  { %v211_v32 = vpack.c.bf16 %v168_v28, %v166_v26  ;;  %v172_v33 = vadd.f32 %v171_v31, %v42_v24 }
  0xfb   :  { %186 = vst [vmem:[%s323_s3] sm:$0xff] %v211_v32  ;;  %v212_v34 = vpack.c.bf16 %v172_v33, %v170_v30 }
  0xfd   :  { %187 = vst [vmem:[%s323_s3 + $0x8] sm:$0xff] %v212_v34 }

// kernel: clip_forward.38
= control target key start
LH: loop header
LB: loop body
LE: loop exit
PB: predicated region body
PF: predicated region fallthrough
CT: control target
= control target key end

     0   :  { %s716_s12 = smov 0   ;;  %s718_s13 = smov 0   ;;  %s772_s0 = inlined_call_operand.vmem [shape: bf16[2,1,8,64], index: 0, kind: input, shape index: {}]   ;;  %s773_s1 = inlined_call_operand.vmem [shape: bf16[2,1,8,64], index: 1, kind: input, shape index: {}]   ;;  %s774_s2 = inlined_call_operand.vmem [shape: bf16[2,1,8,64], index: 2, kind: input, shape index: {}]   ;;  %s775_s3 = inlined_call_operand.vmem [shape: bf16[2,8,64], index: 3, kind: output, shape index: {}]  }
   0x1   :  { %s720_s14 = smov 0  }
   0x2 LB: > { %s39_s15 = sadd.s32 1, %s686_s13  ;;  %p607_p0 = scmp.ge.s32.totalorder %s690_s14, 1  ;;  %s690_s14 = sphi %s720_s14, %s13_s14   ;;  %s686_s13 = sphi %s718_s13, %s777_s13   ;;  %s682_s12 = sphi %s716_s12, %s776_s12  }
   0x3   : > { %p41_p1 = scmp.ge.s32.totalorder %s39_s15, 2  ;;  %p214_p2 = scmp.lt.s32.totalorder %s690_s14, 3 }
   0x5   : > { %s779_s15 = smov (%p41_p1, %s39_s15), 0  ;;  %p215_p3 = pnand %p607_p0, %p214_p2 }
   0x6   : > { %p268_p4 = scmp.lt.s32.totalorder (!%p215_p3), %s682_s12, 1  ;;  %vm316_vm0 = vcmask (!%p215_p3), 523264   ;;  %v692_v0 = vmov (!%p215_p3), 0.0   ;;  %vm693_vm1 = vmmov (!%p215_p3), 0   ;;  %vm313_vm2 = vcmask (!%p215_p3), 7168  }
   0x7   : > { %218 = sbr.rel (%p215_p3) target bundleno = 826 (0x33a), region = 32  ;;  %620 = vmatprep.subr.bf16.mxu0 (!%p215_p3), %v692_v0  ;;  %317 = vst.msk [vmem:[#allocation4] sm:$0xff] (!%p215_p3), %vm316_vm0, %v692_v0  ;;  %622 = vmatprep.mubr.msk.bf16.mxu0 (!%p215_p3), %vm693_vm1, %v692_v0  ;;  %v694_v4 = vmov (!%p215_p3), -1e+30   ;;  %v370_v5 = vlaneseq (!%p215_p3)  ;;  %vm377_vm4 = vcmask (!%p215_p3), 64512   ;;  %v695_v14 = vmov (!%p215_p3), 0  }
   0x8   : > { %626 = vmatprep.subr.bf16.mxu1 (!%p215_p3), %v692_v0  ;;  %628 = vmatprep.mubr.msk.bf16.mxu1 (!%p215_p3), %vm693_vm1, %v692_v0  ;;  %314 = vst.msk [vmem:[#allocation2] sm:$0xff] (!%p215_p3), %vm313_vm2, %v694_v4  ;;  %315 = vst.msk [vmem:[#allocation3] sm:$0xff] (!%p215_p3), %vm313_vm2, %v692_v0  ;;  %vm412_vm5 = vcmask (!%p215_p3), 1043456   ;;  %vm472_vm6 = vcmask (!%p215_p3), 519168  }
   0x9   : > { %v371_v6 = vand.u32 (!%p215_p3), 127, %v370_v5  ;;  %660 = vset.pattern.permute.xlu0 (!%p215_p3), %v695_v14  ;;  %661 = vset.pattern.permute.xlu1 (!%p215_p3), %v695_v14 }
   0xb   : > { %vm374_vm3 = vcmp.lt.s32.totalorder (!%p215_p3), %v371_v6, 5 }
   0xe   : > { %s781_s12 = smov (!%p268_p4, %s682_s12), 1  ;;  %v401_v35 = vld [vmem:[#allocation4] sm:$0xff] }
   0xf   : > { %s735_s16 = sshll.u32 %s781_s12, 2  ;;  %v376_v15 = vld [vmem:[#allocation2] sm:$0xff]  ;;  %v393_v29 = vld [vmem:[#allocation3] sm:$0xff] }
  0x10   : > { %s287_s19 = scalar_lea.vmem %s773_s1, %s735_s16  ;;  %s277_s22 = scalar_lea.vmem %s772_s0, %s735_s16 }
  0x11   : > { %v319_v1 = vld [vmem:[%s287_s19] sm:$0xf]  ;;  %s297_s25 = scalar_lea.vmem %s774_s2, %s735_s16  ;;  %s307_s28 = scalar_lea.vmem %s775_s3, %s735_s16 }
  0x12   : > { %v326_v2 = vsel %vm316_vm0, %v319_v1, 0  ;;  %v318_v3 = vld [vmem:[%s277_s22] sm:$0xf] }
  0x13   : > { %621 = vmatpush3.bf16.xpose.msra.mxu0 %v326_v2  ;;  %v320_v19 = vld [vmem:[%s297_s25] sm:$0xf] }
  0x14   : > { %v414_v20 = vsel %vm412_vm5, %v320_v19, 0 }
  0x15   : > { %627 = vmatpush3.bf16.msra.mxu1 %v414_v20 }
  0x1a   : > { %623 = vmatmul.mubr.msk.bf16.vlgmr.msra.gmra.mrb[0].mxu0 %vm316_vm0, %v318_v3 }
  0xed   : > { %v362_v7 = vpop.f32.mrb[0].mxu0 }
  0xee   : > { %v368_v8 = vmul.f32 0.125, %v362_v7  ;;  %v624_v9 = vpop.f32.mrb[1].mxu0 }
  0xef   : > { %v365_v10 = vpop.f32.mrb[2].mxu0 }
  0xf0   : > { %v625_v11 = vpop.f32.mrb[3].mxu0  ;;  %v375_v12 = vsel %vm374_vm3, %v368_v8, -1e+30 }
  0xf1   : > { %v378_v13 = vsel %vm377_vm4, %v375_v12, -inf }
  0xf2   : > { %379 = vmax.xlane.f32.xlu0 %v378_v13 }
 0x17f   : > { %v380_v16 = vpop.xlane.xlu0 %379 }
 0x180   : > { %v381_v17 = vmax.f32 %v376_v15, %v380_v16 }
 0x182   : > { %v382_v18 = vsub.f32 %v376_v15, %v381_v17  ;;  %458 = vst.msk [vmem:[#allocation2] sm:$0xff] %vm313_vm2, %v381_v17  ;;  %387 = vperm.xlu0 %660, %v381_v17  }
 0x184   : > { %v383_v27 = vmul.f32 1.442695, %v382_v18 }
 0x201   : > { %v388_v21 = vpop.permute.xlu0 %387 }
 0x202   : > { %v390_v22 = vsub.f32 %v375_v12, %v388_v21 }
 0x204   : > { %v391_v23 = vmul.f32 1.442695, %v390_v22 }
 0x206   : > { %662 = vpow2.f32 %v391_v23 }
 0x207   : > { %664 = vpow2.f32 %v383_v27 }
 0x210   : > { %v663_v24 = vpop.eup %662 }
 0x211   : > { %v395_v25 = vsel %vm377_vm4, %v663_v24, 0.0  ;;  %v408_v26 = vpack.c.bf16 %v663_v24, %v663_v24  ;;  %v665_v28 = vpop.eup %664 }
 0x212   : > { %396 = vadd.xlane.f32.xlu1 %v395_v25  ;;  %v394_v30 = vmul.f32 %v665_v28, %v393_v29 }
 0x213   : > { %629 = vmatmul.mubr.msk.bf16.vlgmr.msra.gmra.mrb[0].mxu1 %vm377_vm4, %v408_v26 }
 0x223   : > { %404 = vperm.xlu1 %661, %v665_v28  }
 0x29f   : > { %v397_v31 = vpop.xlane.xlu1 %396 }
 0x2a0   : > { %v398_v32 = vadd.f32 %v397_v31, %v394_v30 }
 0x2a2   : > { %400 = vst.msk [vmem:[#allocation3] sm:$0xff] %vm313_vm2, %v398_v32 }
 0x2a3   : > { %v405_v36 = vpop.permute.xlu1 %404 }
 0x2a4   : > { %v407_v37 = vmul.f32 %v405_v36, %v401_v35 }
 0x2a9   : > { %v462_v33 = vld [vmem:[#allocation3] sm:$0xff] }
 0x2aa   : > { %666 = vrcp.f32 %v462_v33 }
 0x2b4   : > { %v667_v34 = vpop.eup %666 }
 0x2b5   : > { %467 = vperm.xlu1 %661, %v667_v34  }
 0x2e6   : > { %v450_v38 = vpop.f32.mrb[0].mxu1 }
 0x2e7   : > { %v456_v39 = vadd.f32 %v450_v38, %v407_v37  ;;  %v630_v40 = vpop.f32.mrb[1].mxu1 }
 0x2e8   : > { %v453_v41 = vpop.f32.mrb[2].mxu1 }
 0x2e9   : > { %457 = vst.msk [vmem:[#allocation4] sm:$0xff] %vm316_vm0, %v456_v39  ;;  %v631_v42 = vpop.f32.mrb[3].mxu1 }
 0x2f0   : > { %v464_v43 = vld [vmem:[#allocation4] sm:$0xff] }
 0x334   : > { %v468_v44 = vpop.permute.xlu1 %467 }
 0x335   : > { %v470_v45 = vmul.f32 %v468_v44, %v464_v43 }
 0x337   : > { %v471_v46 = vpack.c.bf16 %v470_v45, %v470_v45 }
 0x339   : > { %473 = vst.msk [vmem:[%s307_s28] sm:$0xf] %vm472_vm6, %v471_v46 }
 0x33a PF: > { %s13_s14 = sadd.s32 1, %s690_s14   ;;  %s776_s12 = smov %s686_s13 }
 0x33b   : > { %p10_p5 = scmp.ge.s32.totalorder %s13_s14, 4   ;;  %s777_s13 = smov %s779_s15 }
 0x33d   :  { %12 = sbr.rel (!%p10_p5) target bundleno = 2 (0x2), region = 76 }

// kernel: clip_forward.39
= control target key start
LH: loop header
LB: loop body
LE: loop exit
PB: predicated region body
PF: predicated region fallthrough
CT: control target
= control target key end

     0   :  { %v221_v0 = vmov 0.0   ;;  %vm222_vm0 = vmmov 0   ;;  %s284_s1 = inlined_call_operand.vmem [shape: bf16[128,128], index: 1, kind: input, shape index: {}]   ;;  %s285_s0 = inlined_call_operand.vmem [shape: bf16[16,128], index: 0, kind: input, shape index: {}]   ;;  %s286_s2 = inlined_call_operand.vmem [shape: f32[1,128], index: 2, kind: input, shape index: {}]   ;;  %s287_s3 = inlined_call_operand.vmem [shape: bf16[16,128], index: 3, kind: input, shape index: {}]   ;;  %s288_s4 = inlined_call_operand.vmem [shape: bf16[16,128], index: 4, kind: output, shape index: {}]  }
   0x1   :  { %190 = vmatprep.subr.bf16.mxu0 %v221_v0  ;;  %v212_v1 = vld [vmem:[%s284_s1] sm:$0xff]   ;;  %206 = vmatprep.mubr.msk.bf16.mxu0 %vm222_vm0, %v221_v0  ;;  %v213_v2 = vld [vmem:[%s284_s1 + $0x8] sm:$0xff]   ;;  %v214_v3 = vld [vmem:[%s284_s1 + $0x10] sm:$0xff]  }
   0x2   :  { %191 = vmatpush3.bf16.msra.mxu0 %v212_v1  ;;  %v215_v4 = vld [vmem:[%s284_s1 + $0x18] sm:$0xff]   ;;  %v216_v5 = vld [vmem:[%s284_s1 + $0x20] sm:$0xff]   ;;  %v217_v6 = vld [vmem:[%s284_s1 + $0x28] sm:$0xff]  }
   0x3   :  { %192 = vmatprep.subr.bf16.mxu0 %v221_v0  ;;  %v218_v7 = vld [vmem:[%s284_s1 + $0x30] sm:$0xff]   ;;  %v219_v8 = vld [vmem:[%s284_s1 + $0x38] sm:$0xff]   ;;  %v220_v9 = vld [vmem:[%s285_s0] sm:$0xff]  }
   0x4   :  { %v158_v10 = vld [vmem:[%s286_s2] ss:$0 sm:$0xff] }
   0x5   :  { %v173_v11 = vld [vmem:[%s287_s3] sm:$0xff]  }
   0x6   :  { %193 = vmatpush3.bf16.msra.mxu0 %v213_v2  ;;  %v174_v14 = vunpack.c.l.bf16 %v173_v11  ;;  %v175_v16 = vunpack.c.h.bf16 %v173_v11 }
   0x7   :  { %194 = vmatprep.subr.bf16.mxu0 %v221_v0 }
   0xa   :  { %195 = vmatpush3.bf16.msra.mxu0 %v214_v3 }
   0xb   :  { %196 = vmatprep.subr.bf16.mxu0 %v221_v0 }
   0xe   :  { %197 = vmatpush3.bf16.msra.mxu0 %v215_v4 }
   0xf   :  { %198 = vmatprep.subr.bf16.mxu0 %v221_v0 }
  0x12   :  { %199 = vmatpush3.bf16.msra.mxu0 %v216_v5 }
  0x13   :  { %200 = vmatprep.subr.bf16.mxu0 %v221_v0 }
  0x16   :  { %201 = vmatpush3.bf16.msra.mxu0 %v217_v6 }
  0x17   :  { %202 = vmatprep.subr.bf16.mxu0 %v221_v0 }
  0x1a   :  { %203 = vmatpush3.bf16.msra.mxu0 %v218_v7 }
  0x1b   :  { %204 = vmatprep.subr.bf16.mxu0 %v221_v0 }
  0x1e   :  { %205 = vmatpush3.bf16.msra.mxu0 %v219_v8 }
  0x21   :  { %207 = vmatmul.mubr.bf16.vlgmr.msra.gmra.mrb[0].mxu0 %v220_v9 }
  0xf4   :  { %v131_v12 = vpop.f32.mrb[0].mxu0 }
  0xf5   :  { %v132_v13 = vadd.f32 %v158_v10, %v131_v12  ;;  %v208_v15 = vpop.f32.mrb[1].mxu0 }
  0xf6   :  { %v134_v17 = vpop.f32.mrb[2].mxu0 }
  0xf7   :  { %v135_v18 = vadd.f32 %v158_v10, %v134_v17  ;;  %v209_v19 = vpop.f32.mrb[3].mxu0  ;;  %v142_v20 = vadd.f32 %v174_v14, %v132_v13 }
  0xf9   :  { %v143_v21 = vadd.f32 %v175_v16, %v135_v18 }
  0xfb   :  { %v179_v22 = vpack.c.bf16 %v143_v21, %v142_v20 }
  0xfd   :  { %180 = vst [vmem:[%s288_s4] sm:$0xff] %v179_v22  }

// kernel: clip_forward.41
= control target key start
LH: loop header
LB: loop body
LE: loop exit
PB: predicated region body
PF: predicated region fallthrough
CT: control target
= control target key end

     0   :  { %v291_v1 = vmov 0   ;;  %v35_v18 = vlaneseq  ;;  %s372_s1 = inlined_call_operand.vmem [shape: bf16[128,256], index: 1, kind: input, shape index: {}]   ;;  %s373_s0 = inlined_call_operand.vmem [shape: bf16[16,128], index: 0, kind: input, shape index: {}]   ;;  %s374_s2 = inlined_call_operand.vmem [shape: f32[1,256], index: 2, kind: input, shape index: {}]   ;;  %s375_s3 = inlined_call_operand.vmem [shape: bf16[16,256], index: 3, kind: output, shape index: {}]  }
   0x1   :  { %v250_v0 = vld [vmem:[%s372_s1 + $0x4] ss:$8 sps:$4 sm:$0xff]   ;;  %163 = vmatprep.mubr.bf16.mxu0 %v291_v1  ;;  %v252_v2 = vld [vmem:[%s372_s1] ss:$8 sps:$4 sm:$0xff]   ;;  %v253_v3 = vld [vmem:[%s372_s1 + $0x14] ss:$8 sps:$4 sm:$0xff]  }
   0x2   :  { %131 = vmatprep.subr.bf16.mxu0 %v250_v0  ;;  %v255_v4 = vld [vmem:[%s372_s1 + $0x10] ss:$8 sps:$4 sm:$0xff]   ;;  %v256_v5 = vld [vmem:[%s372_s1 + $0x24] ss:$8 sps:$4 sm:$0xff]   ;;  %v258_v6 = vld [vmem:[%s372_s1 + $0x20] ss:$8 sps:$4 sm:$0xff]  }
   0x3   :  { %132 = vmatpush1.bf16.msra.mxu0 %v252_v2  ;;  %v259_v7 = vld [vmem:[%s372_s1 + $0x34] ss:$8 sps:$4 sm:$0xff]   ;;  %v261_v8 = vld [vmem:[%s372_s1 + $0x30] ss:$8 sps:$4 sm:$0xff]   ;;  %v262_v9 = vld [vmem:[%s372_s1 + $0x44] ss:$8 sps:$4 sm:$0xff]  }
   0x4   :  { %133 = vmatprep.subr.bf16.mxu0 %v253_v3  ;;  %v264_v10 = vld [vmem:[%s372_s1 + $0x40] ss:$8 sps:$4 sm:$0xff]   ;;  %v265_v11 = vld [vmem:[%s372_s1 + $0x54] ss:$8 sps:$4 sm:$0xff]   ;;  %v267_v12 = vld [vmem:[%s372_s1 + $0x50] ss:$8 sps:$4 sm:$0xff]  }
   0x5   :  { %v268_v13 = vld [vmem:[%s372_s1 + $0x64] ss:$8 sps:$4 sm:$0xff]   ;;  %v270_v14 = vld [vmem:[%s372_s1 + $0x60] ss:$8 sps:$4 sm:$0xff]   ;;  %v271_v15 = vld [vmem:[%s372_s1 + $0x74] ss:$8 sps:$4 sm:$0xff]  }
   0x6   :  { %v273_v16 = vld [vmem:[%s372_s1 + $0x70] ss:$8 sps:$4 sm:$0xff]   ;;  %v274_v17 = vld [vmem:[%s373_s0] sm:$0xff]   ;;  %v36_v19 = vshrl.u32 %v35_v18, 7 }
   0x7   :  { %134 = vmatpush1.bf16.msra.mxu0 %v255_v4  ;;  %v33_v21 = vld [vmem:[%s374_s2] sm:$0x3] }
   0x8   :  { %135 = vmatprep.subr.bf16.mxu0 %v256_v5  ;;  %v37_v20 = vsub.s32 0, %v36_v19  ;;  %v41_v22 = vsub.s32 1, %v36_v19 }
   0xa   :  { %v38_v23 = vrot.slane %v33_v21, %v37_v20  ;;  %v42_v24 = vrot.slane %v33_v21, %v41_v22 }
   0xb   :  { %136 = vmatpush1.bf16.msra.mxu0 %v258_v6 }
   0xc   :  { %137 = vmatprep.subr.bf16.mxu0 %v259_v7 }
   0xf   :  { %138 = vmatpush1.bf16.msra.mxu0 %v261_v8 }
  0x10   :  { %139 = vmatprep.subr.bf16.mxu0 %v262_v9 }
  0x13   :  { %140 = vmatpush1.bf16.msra.mxu0 %v264_v10 }
  0x14   :  { %141 = vmatprep.subr.bf16.mxu0 %v265_v11 }
  0x17   :  { %142 = vmatpush1.bf16.msra.mxu0 %v267_v12 }
  0x18   :  { %143 = vmatprep.subr.bf16.mxu0 %v268_v13 }
  0x1b   :  { %144 = vmatpush1.bf16.msra.mxu0 %v270_v14 }
  0x1c   :  { %145 = vmatprep.subr.bf16.mxu0 %v271_v15 }
  0x1f   :  { %146 = vmatpush1.bf16.msra.mxu0 %v273_v16 }
  0x22   :  { %164 = vmatmul.mubr.bf16.vlgmr.msra.gmra.mrb[0].mxu0 %v274_v17 }
  0xf5   :  { %v165_v25 = vpop.f32.mrb[0].mxu0 }
  0xf6   :  { %v166_v26 = vadd.f32 %v165_v25, %v38_v23  ;;  %v167_v27 = vpop.f32.mrb[1].mxu0 }
  0xf7   :  { %v168_v28 = vadd.f32 %v167_v27, %v42_v24  ;;  %v169_v29 = vpop.f32.mrb[2].mxu0 }
  0xf8   :  { %v241_v30 = vmul.f32 -1.702, %v166_v26  ;;  %v170_v31 = vadd.f32 %v169_v29, %v38_v23  ;;  %v171_v32 = vpop.f32.mrb[3].mxu0 }
  0xf9   :  { %v242_v33 = vmul.f32 -1.702, %v168_v28  ;;  %v172_v34 = vadd.f32 %v171_v32, %v42_v24 }
  0xfa   :  { %v182_v35 = vmul.f32 1.442695, %v241_v30  ;;  %v243_v36 = vmul.f32 -1.702, %v170_v31 }
  0xfb   :  { %v184_v37 = vmul.f32 1.442695, %v242_v33  ;;  %v244_v38 = vmul.f32 -1.702, %v172_v34 }
  0xfc   :  { %275 = vpow2.f32 %v182_v35  ;;  %v186_v39 = vmul.f32 1.442695, %v243_v36 }
  0xfd   :  { %277 = vpow2.f32 %v184_v37  ;;  %v188_v40 = vmul.f32 1.442695, %v244_v38 }
  0xfe   :  { %279 = vpow2.f32 %v186_v39 }
  0xff   :  { %281 = vpow2.f32 %v188_v40 }
 0x106   :  { %v276_v41 = vpop.eup %275 }
 0x107   :  { %v278_v42 = vpop.eup %277  ;;  %v190_v43 = vadd.f32 1.0, %v276_v41 }
 0x108   :  { %v280_v44 = vpop.eup %279  ;;  %v191_v45 = vadd.f32 1.0, %v278_v42 }
 0x109   :  { %v282_v46 = vpop.eup %281  ;;  %283 = vrcp.f32 %v190_v43  ;;  %v192_v47 = vadd.f32 1.0, %v280_v44 }
 0x10a   :  { %285 = vrcp.f32 %v191_v45  ;;  %v193_v48 = vadd.f32 1.0, %v282_v46 }
 0x10b   :  { %287 = vrcp.f32 %v192_v47 }
 0x10c   :  { %289 = vrcp.f32 %v193_v48 }
 0x113   :  { %v284_v49 = vpop.eup %283 }
 0x114   :  { %v286_v50 = vpop.eup %285  ;;  %v202_v51 = vmul.f32 %v284_v49, %v166_v26 }
 0x115   :  { %v288_v52 = vpop.eup %287  ;;  %v203_v53 = vmul.f32 %v286_v50, %v168_v28 }
 0x116   :  { %v290_v54 = vpop.eup %289  ;;  %v204_v55 = vmul.f32 %v288_v52, %v170_v31 }
 0x117   :  { %v247_v56 = vpack.c.bf16 %v203_v53, %v202_v51  ;;  %v205_v57 = vmul.f32 %v290_v54, %v172_v34 }
 0x119   :  { %218 = vst [vmem:[%s375_s3] sm:$0xff] %v247_v56  ;;  %v248_v58 = vpack.c.bf16 %v205_v57, %v204_v55 }
 0x11b   :  { %219 = vst [vmem:[%s375_s3 + $0x8] sm:$0xff] %v248_v58 }

// kernel: clip_forward.42
= control target key start
LH: loop header
LB: loop body
LE: loop exit
PB: predicated region body
PF: predicated region fallthrough
CT: control target
= control target key end

     0   :  { %s387_s1 = inlined_call_operand.vmem [shape: bf16[256,128], index: 1, kind: input, shape index: {}]   ;;  %s388_s0 = inlined_call_operand.vmem [shape: bf16[16,256], index: 0, kind: input, shape index: {}]   ;;  %s389_s2 = inlined_call_operand.vmem [shape: f32[1,128], index: 2, kind: input, shape index: {}]   ;;  %s390_s3 = inlined_call_operand.vmem [shape: bf16[16,128], index: 3, kind: input, shape index: {}]   ;;  %s391_s4 = inlined_call_operand.vmem [shape: bf16[16,128], index: 4, kind: output, shape index: {}]  }
   0x1   :  { %v280_v0 = vld [vmem:[%s387_s1 + $0x40] sm:$0xff]   ;;  %v282_v2 = vld [vmem:[%s387_s1 + $0x48] sm:$0xff]   ;;  %v284_v4 = vld [vmem:[%s387_s1 + $0x50] sm:$0xff]  }
   0x2   :  { %v281_v1 = vld [vmem:[%s387_s1] sm:$0xff]   ;;  %258 = vmatprep.subr.bf16.mxu0 %v280_v0  ;;  %v283_v3 = vld [vmem:[%s387_s1 + $0x8] sm:$0xff]   ;;  %v285_v5 = vld [vmem:[%s387_s1 + $0x10] sm:$0xff]  }
   0x3   :  { %259 = vmatpush3.bf16.msra.mxu0 %v281_v1  ;;  %v286_v6 = vld [vmem:[%s387_s1 + $0x58] sm:$0xff]   ;;  %v288_v8 = vld [vmem:[%s387_s1 + $0x60] sm:$0xff]   ;;  %v290_v10 = vld [vmem:[%s387_s1 + $0x68] sm:$0xff]  }
   0x4   :  { %260 = vmatprep.subr.bf16.mxu0 %v282_v2  ;;  %v287_v7 = vld [vmem:[%s387_s1 + $0x18] sm:$0xff]   ;;  %v289_v9 = vld [vmem:[%s387_s1 + $0x20] sm:$0xff]   ;;  %v291_v12 = vld [vmem:[%s387_s1 + $0x28] sm:$0xff]  }
   0x5   :  { %v298_v11 = vld [vmem:[%s388_s0 + $0x4] ss:$8 sps:$4 sm:$0xff]   ;;  %v292_v13 = vld [vmem:[%s387_s1 + $0x70] sm:$0xff]   ;;  %v294_v15 = vld [vmem:[%s387_s1 + $0x78] sm:$0xff]  }
   0x6   :  { %197 = vmatprep.mubr.bf16.mxu0 %v298_v11  ;;  %v293_v14 = vld [vmem:[%s387_s1 + $0x30] sm:$0xff]   ;;  %v295_v16 = vld [vmem:[%s387_s1 + $0x38] sm:$0xff]   ;;  %v296_v17 = vld [vmem:[%s388_s0] ss:$8 sps:$4 sm:$0xff]  }
   0x7   :  { %261 = vmatpush3.bf16.msra.mxu0 %v283_v3  ;;  %v226_v19 = vld [vmem:[%s389_s2] ss:$0 sm:$0xff] }
   0x8   :  { %262 = vmatprep.subr.bf16.mxu0 %v284_v4  ;;  %v250_v21 = vld [vmem:[%s390_s3] sm:$0xff]  }
   0x9   :  { %v251_v26 = vunpack.c.l.bf16 %v250_v21  ;;  %v252_v28 = vunpack.c.h.bf16 %v250_v21 }
   0xb   :  { %263 = vmatpush3.bf16.msra.mxu0 %v285_v5 }
   0xc   :  { %264 = vmatprep.subr.bf16.mxu0 %v286_v6 }
   0xf   :  { %265 = vmatpush3.bf16.msra.mxu0 %v287_v7 }
  0x10   :  { %266 = vmatprep.subr.bf16.mxu0 %v288_v8 }
  0x13   :  { %267 = vmatpush3.bf16.msra.mxu0 %v289_v9 }
  0x14   :  { %268 = vmatprep.subr.bf16.mxu0 %v290_v10 }
  0x17   :  { %269 = vmatpush3.bf16.msra.mxu0 %v291_v12 }
  0x18   :  { %270 = vmatprep.subr.bf16.mxu0 %v292_v13 }
  0x1b   :  { %271 = vmatpush3.bf16.msra.mxu0 %v293_v14 }
  0x1c   :  { %272 = vmatprep.subr.bf16.mxu0 %v294_v15 }
  0x1f   :  { %273 = vmatpush3.bf16.msra.mxu0 %v295_v16 }
  0x22   :  { %198 = vmatmul.mubr.bf16.vlgmr.msra.gmra.mrb[0].mxu0 %v296_v17 }
  0xf5   :  { %v274_v18 = vpop.f32.mrb[0].mxu0 }
  0xf6   :  { %v275_v20 = vpop.f32.mrb[1].mxu0 }
  0xf7   :  { %v276_v22 = vadd.f32 %v275_v20, %v274_v18  ;;  %v277_v23 = vpop.f32.mrb[2].mxu0 }
  0xf8   :  { %v278_v24 = vpop.f32.mrb[3].mxu0 }
  0xf9   :  { %v200_v25 = vadd.f32 %v276_v22, %v226_v19  ;;  %v279_v27 = vadd.f32 %v278_v24, %v277_v23 }
  0xfb   :  { %v203_v29 = vadd.f32 %v279_v27, %v226_v19  ;;  %v210_v30 = vadd.f32 %v251_v26, %v200_v25 }
  0xfd   :  { %v211_v31 = vadd.f32 %v252_v28, %v203_v29 }
  0xff   :  { %v256_v32 = vpack.c.bf16 %v211_v31, %v210_v30 }
 0x101   :  { %257 = vst [vmem:[%s391_s4] sm:$0xff] %v256_v32  }

// kernel: clip_forward.50
= control target key start
LH: loop header
LB: loop body
LE: loop exit
PB: predicated region body
PF: predicated region fallthrough
CT: control target
= control target key end

     0   :  { %vm16_vm0 = vcmask 523264   ;;  %vm48_vm1 = vcmask 519168   ;;  %s90_s0 = inlined_call_operand.vmem [shape: bf16[8,64], index: 0, kind: input, shape index: {}]   ;;  %s91_s1 = inlined_call_operand.vmem [shape: f32[1,64], index: 1, kind: input, shape index: {}]   ;;  %s92_s2 = inlined_call_operand.vmem [shape: f32[1,64], index: 2, kind: input, shape index: {}]   ;;  %s93_s3 = inlined_call_operand.vmem [shape: bf16[8,64], index: 3, kind: output, shape index: {}]  }
   0x1   :  { %v14_v0 = vld [vmem:[%s90_s0] sm:$0xf] }
   0x2   :  { %v15_v1 = vunpack.c.l.bf16 %v14_v0  ;;  %v54_v12 = vld [vmem:[%s91_s1] ss:$0 sm:$0xff] }
   0x3   :  { %v55_v14 = vld [vmem:[%s92_s2] ss:$0 sm:$0xff] }
   0x4   :  { %v17_v2 = vsel %vm16_vm0, %v15_v1, 0.0 }
   0x5   :  { %18 = vadd.xlane.f32.xlu0 %v17_v2 }
  0x92   :  { %v19_v3 = vpop.xlane.xlu0 %18 }
  0x93   :  { %v21_v4 = vmul.f32 0.015625, %v19_v3 }
  0x95   :  { %v22_v5 = vsub.f32 %v15_v1, %v21_v4 }
  0x97   :  { %v23_v6 = vmul.f32 %v22_v5, %v22_v5 }
  0x99   :  { %v24_v7 = vsel %vm16_vm0, %v23_v6, 0.0 }
  0x9a   :  { %25 = vadd.xlane.f32.xlu0 %v24_v7 }
 0x127   :  { %v26_v8 = vpop.xlane.xlu0 %25 }
 0x128   :  { %v27_v9 = vmul.f32 0.015625, %v26_v8 }
 0x12a   :  { %v28_v10 = vadd.f32 1e-05, %v27_v9 }
 0x12c   :  { %56 = vrsqrt.f32 %v28_v10 }
 0x136   :  { %v57_v11 = vpop.eup %56 }
 0x137   :  { %v30_v13 = vmul.f32 %v57_v11, %v22_v5 }
 0x139   :  { %v38_v15 = vmul.f32 %v54_v12, %v30_v13 }
 0x13b   :  { %v46_v16 = vadd.f32 %v55_v14, %v38_v15 }
 0x13d   :  { %v47_v17 = vpack.c.bf16 %v46_v16, %v46_v16 }
 0x13f   :  { %49 = vst.msk [vmem:[%s93_s3] sm:$0xf] %vm48_vm1, %v47_v17 }

// kernel: clip_forward.51
= control target key start
LH: loop header
LB: loop body
LE: loop exit
PB: predicated region body
PF: predicated region fallthrough
CT: control target
= control target key end

     0   :  { %v169_v0 = vmov 0.0   ;;  %vm170_vm0 = vmmov 0   ;;  %s216_s1 = inlined_call_operand.vmem [shape: bf16[128,128], index: 1, kind: input, shape index: {}]   ;;  %s217_s0 = inlined_call_operand.vmem [shape: bf16[8,128], index: 0, kind: input, shape index: {}]   ;;  %s218_s2 = inlined_call_operand.vmem [shape: f32[8,128], index: 2, kind: output, shape index: {}]  }
   0x1   :  { %139 = vmatprep.subr.bf16.mxu0 %v169_v0  ;;  %v161_v1 = vld [vmem:[%s216_s1] sm:$0xff]   ;;  %155 = vmatprep.mubr.msk.bf16.mxu0 %vm170_vm0, %v169_v0  ;;  %v162_v2 = vld [vmem:[%s216_s1 + $0x8] sm:$0xff]   ;;  %v163_v3 = vld [vmem:[%s216_s1 + $0x10] sm:$0xff]  }
   0x2   :  { %140 = vmatpush3.bf16.msra.mxu0 %v161_v1  ;;  %v164_v4 = vld [vmem:[%s216_s1 + $0x18] sm:$0xff]   ;;  %v165_v5 = vld [vmem:[%s216_s1 + $0x20] sm:$0xff]   ;;  %v166_v6 = vld [vmem:[%s216_s1 + $0x28] sm:$0xff]  }
   0x3   :  { %141 = vmatprep.subr.bf16.mxu0 %v169_v0  ;;  %v167_v7 = vld [vmem:[%s216_s1 + $0x30] sm:$0xff]   ;;  %v168_v8 = vld [vmem:[%s216_s1 + $0x38] sm:$0xff]   ;;  %v12_v9 = vld [vmem:[%s217_s0] sm:$0xf] }
   0x6   :  { %142 = vmatpush3.bf16.msra.mxu0 %v162_v2 }
   0x7   :  { %143 = vmatprep.subr.bf16.mxu0 %v169_v0 }
   0xa   :  { %144 = vmatpush3.bf16.msra.mxu0 %v163_v3 }
   0xb   :  { %145 = vmatprep.subr.bf16.mxu0 %v169_v0 }
   0xe   :  { %146 = vmatpush3.bf16.msra.mxu0 %v164_v4 }
   0xf   :  { %147 = vmatprep.subr.bf16.mxu0 %v169_v0 }
  0x12   :  { %148 = vmatpush3.bf16.msra.mxu0 %v165_v5 }
  0x13   :  { %149 = vmatprep.subr.bf16.mxu0 %v169_v0 }
  0x16   :  { %150 = vmatpush3.bf16.msra.mxu0 %v166_v6 }
  0x17   :  { %151 = vmatprep.subr.bf16.mxu0 %v169_v0 }
  0x1a   :  { %152 = vmatpush3.bf16.msra.mxu0 %v167_v7 }
  0x1b   :  { %153 = vmatprep.subr.bf16.mxu0 %v169_v0 }
  0x1e   :  { %154 = vmatpush3.bf16.msra.mxu0 %v168_v8 }
  0x21   :  { %156 = vmatmul.mubr.bf16.vlgmr.msra.gmra.mrb[0].mxu0 %v12_v9 }
  0xf4   :  { %v111_v10 = vpop.f32.mrb[0].mxu0 }
  0xf5   :  { %117 = vst [vmem:[%s218_s2] sm:$0xff] %v111_v10  ;;  %v157_v11 = vpop.f32.mrb[1].mxu0 }
  0xf6   :  { %v114_v12 = vpop.f32.mrb[2].mxu0 }
  0xf7   :  { %v158_v13 = vpop.f32.mrb[3].mxu0 }

// kernel: clip_forward.53
= control target key start
LH: loop header
LB: loop body
LE: loop exit
PB: predicated region body
PF: predicated region fallthrough
CT: control target
= control target key end

     0   :  { %v208_v0 = vmov 0.0   ;;  %vm209_vm0 = vmmov 0   ;;  %s263_s1 = inlined_call_operand.vmem [shape: bf16[128,128], index: 1, kind: input, shape index: {}]   ;;  %s264_s0 = inlined_call_operand.vmem [shape: bf16[16,128], index: 0, kind: input, shape index: {}]   ;;  %s265_s2 = inlined_call_operand.vmem [shape: f32[1,128], index: 2, kind: input, shape index: {}]   ;;  %s266_s3 = inlined_call_operand.vmem [shape: bf16[16,128], index: 3, kind: output, shape index: {}]  }
   0x1   :  { %177 = vmatprep.subr.bf16.mxu0 %v208_v0  ;;  %v199_v1 = vld [vmem:[%s263_s1] sm:$0xff]   ;;  %193 = vmatprep.mubr.msk.bf16.mxu0 %vm209_vm0, %v208_v0  ;;  %v200_v2 = vld [vmem:[%s263_s1 + $0x8] sm:$0xff]   ;;  %v201_v3 = vld [vmem:[%s263_s1 + $0x10] sm:$0xff]  }
   0x2   :  { %178 = vmatpush3.bf16.msra.mxu0 %v199_v1  ;;  %v202_v4 = vld [vmem:[%s263_s1 + $0x18] sm:$0xff]   ;;  %v203_v5 = vld [vmem:[%s263_s1 + $0x20] sm:$0xff]   ;;  %v204_v6 = vld [vmem:[%s263_s1 + $0x28] sm:$0xff]  }
   0x3   :  { %179 = vmatprep.subr.bf16.mxu0 %v208_v0  ;;  %v205_v7 = vld [vmem:[%s263_s1 + $0x30] sm:$0xff]   ;;  %v206_v8 = vld [vmem:[%s263_s1 + $0x38] sm:$0xff]   ;;  %v207_v9 = vld [vmem:[%s264_s0] sm:$0xff]  }
   0x4   :  { %v149_v10 = vld [vmem:[%s265_s2] ss:$0 sm:$0xff] }
   0x6   :  { %180 = vmatpush3.bf16.msra.mxu0 %v200_v2 }
   0x7   :  { %181 = vmatprep.subr.bf16.mxu0 %v208_v0 }
   0xa   :  { %182 = vmatpush3.bf16.msra.mxu0 %v201_v3 }
   0xb   :  { %183 = vmatprep.subr.bf16.mxu0 %v208_v0 }
   0xe   :  { %184 = vmatpush3.bf16.msra.mxu0 %v202_v4 }
   0xf   :  { %185 = vmatprep.subr.bf16.mxu0 %v208_v0 }
  0x12   :  { %186 = vmatpush3.bf16.msra.mxu0 %v203_v5 }
  0x13   :  { %187 = vmatprep.subr.bf16.mxu0 %v208_v0 }
  0x16   :  { %188 = vmatpush3.bf16.msra.mxu0 %v204_v6 }
  0x17   :  { %189 = vmatprep.subr.bf16.mxu0 %v208_v0 }
  0x1a   :  { %190 = vmatpush3.bf16.msra.mxu0 %v205_v7 }
  0x1b   :  { %191 = vmatprep.subr.bf16.mxu0 %v208_v0 }
  0x1e   :  { %192 = vmatpush3.bf16.msra.mxu0 %v206_v8 }
  0x21   :  { %194 = vmatmul.mubr.bf16.vlgmr.msra.gmra.mrb[0].mxu0 %v207_v9 }
  0xf4   :  { %v128_v11 = vpop.f32.mrb[0].mxu0 }
  0xf5   :  { %v195_v12 = vpop.f32.mrb[1].mxu0  ;;  %v129_v14 = vadd.f32 %v149_v10, %v128_v11 }
  0xf6   :  { %v131_v13 = vpop.f32.mrb[2].mxu0 }
  0xf7   :  { %v132_v15 = vadd.f32 %v149_v10, %v131_v13  ;;  %v196_v16 = vpop.f32.mrb[3].mxu0 }
  0xf9   :  { %v166_v17 = vpack.c.bf16 %v132_v15, %v129_v14 }
  0xfb   :  { %167 = vst [vmem:[%s266_s3] sm:$0xff] %v166_v17  }

// kernel: clip_forward.52
= control target key start
LH: loop header
LB: loop body
LE: loop exit
PB: predicated region body
PF: predicated region fallthrough
CT: control target
= control target key end

     0   :  { %vm18_vm0 = vcmask 261120   ;;  %vm72_vm1 = vcmask 257024   ;;  %s132_s0 = inlined_call_operand.vmem [shape: bf16[16,32], index: 0, kind: input, shape index: {}]   ;;  %s133_s1 = inlined_call_operand.vmem [shape: f32[1,32], index: 1, kind: input, shape index: {}]   ;;  %s134_s2 = inlined_call_operand.vmem [shape: f32[1,32], index: 2, kind: input, shape index: {}]   ;;  %s135_s3 = inlined_call_operand.vmem [shape: bf16[16,32], index: 3, kind: output, shape index: {}]  }
   0x1   :  { %v86_v0 = vld [vmem:[%s132_s0] sm:$0xff]  }
   0x2   :  { %v87_v1 = vunpack.c.l.bf16 %v86_v0  ;;  %v88_v2 = vunpack.c.h.bf16 %v86_v0  ;;  %v79_v22 = vld [vmem:[%s133_s1] ss:$0 sm:$0xff] }
   0x3   :  { %v80_v24 = vld [vmem:[%s134_s2] ss:$0 sm:$0xff] }
   0x4   :  { %v19_v3 = vsel %vm18_vm0, %v87_v1, 0.0  ;;  %v22_v4 = vsel %vm18_vm0, %v88_v2, 0.0 }
   0x5   :  { %20 = vadd.xlane.f32.xlu0 %v19_v3 }
   0x9   :  { %23 = vadd.xlane.f32.xlu0 %v22_v4 }
  0x92   :  { %v21_v5 = vpop.xlane.xlu0 %20 }
  0x93   :  { %v26_v6 = vmul.f32 0.03125, %v21_v5 }
  0x95   :  { %v28_v7 = vsub.f32 %v87_v1, %v26_v6 }
  0x96   :  { %v24_v8 = vpop.xlane.xlu0 %23 }
  0x97   :  { %v27_v9 = vmul.f32 0.03125, %v24_v8  ;;  %v30_v10 = vmul.f32 %v28_v7, %v28_v7 }
  0x99   :  { %v29_v11 = vsub.f32 %v88_v2, %v27_v9  ;;  %v32_v12 = vsel %vm18_vm0, %v30_v10, 0.0 }
  0x9a   :  { %33 = vadd.xlane.f32.xlu1 %v32_v12 }
  0x9b   :  { %v31_v13 = vmul.f32 %v29_v11, %v29_v11 }
  0x9d   :  { %v35_v14 = vsel %vm18_vm0, %v31_v13, 0.0 }
  0x9e   :  { %36 = vadd.xlane.f32.xlu1 %v35_v14 }
 0x127   :  { %v34_v15 = vpop.xlane.xlu1 %33 }
 0x128   :  { %v38_v16 = vmul.f32 0.03125, %v34_v15 }
 0x12a   :  { %v40_v17 = vadd.f32 1e-05, %v38_v16 }
 0x12b   :  { %v37_v18 = vpop.xlane.xlu1 %36 }
 0x12c   :  { %89 = vrsqrt.f32 %v40_v17  ;;  %v39_v19 = vmul.f32 0.03125, %v37_v18 }
 0x12e   :  { %v41_v20 = vadd.f32 1e-05, %v39_v19 }
 0x130   :  { %91 = vrsqrt.f32 %v41_v20 }
 0x136   :  { %v90_v21 = vpop.eup %89 }
 0x137   :  { %v44_v23 = vmul.f32 %v90_v21, %v28_v7 }
 0x139   :  { %v53_v25 = vmul.f32 %v79_v22, %v44_v23 }
 0x13a   :  { %v92_v26 = vpop.eup %91 }
 0x13b   :  { %v62_v27 = vadd.f32 %v80_v24, %v53_v25  ;;  %v45_v28 = vmul.f32 %v92_v26, %v29_v11 }
 0x13d   :  { %v83_v29 = vpack.c.bf16 %v62_v27, %v62_v27  ;;  %v54_v30 = vmul.f32 %v79_v22, %v45_v28 }
 0x13f   :  { %73 = vst.msk [vmem:[%s135_s3] sm:$0xf] %vm72_vm1, %v83_v29  ;;  %v63_v31 = vadd.f32 %v80_v24, %v54_v30 }
 0x141   :  { %v84_v32 = vpack.c.bf16 %v63_v31, %v63_v31 }
 0x143   :  { %74 = vst.msk [vmem:[%s135_s3 + $0x4] sm:$0xf] %vm72_vm1, %v84_v32 }

// kernel: clip_forward.57
= control target key start
LH: loop header
LB: loop body
LE: loop exit
PB: predicated region body
PF: predicated region fallthrough
CT: control target
= control target key end

     0   :  { %v234_v0 = vmov 0.0   ;;  %vm235_vm0 = vmmov 0   ;;  %s289_s1 = inlined_call_operand.vmem [shape: bf16[128,128], index: 1, kind: input, shape index: {}]   ;;  %s290_s0 = inlined_call_operand.vmem [shape: bf16[16,128], index: 0, kind: input, shape index: {}]   ;;  %s291_s2 = inlined_call_operand.vmem [shape: f32[1,128], index: 2, kind: input, shape index: {}]   ;;  %s292_s3 = inlined_call_operand.vmem [shape: bf16[16,128], index: 3, kind: output, shape index: {}]  }
   0x1   :  { %195 = vmatprep.subr.bf16.mxu0 %v234_v0  ;;  %v217_v1 = vld [vmem:[%s289_s1] sm:$0xff]   ;;  %211 = vmatprep.mubr.msk.bf16.mxu0 %vm235_vm0, %v234_v0  ;;  %v218_v2 = vld [vmem:[%s289_s1 + $0x8] sm:$0xff]   ;;  %v219_v3 = vld [vmem:[%s289_s1 + $0x10] sm:$0xff]  }
   0x2   :  { %196 = vmatpush3.bf16.msra.mxu0 %v217_v1  ;;  %v220_v4 = vld [vmem:[%s289_s1 + $0x18] sm:$0xff]   ;;  %v221_v5 = vld [vmem:[%s289_s1 + $0x20] sm:$0xff]   ;;  %v222_v6 = vld [vmem:[%s289_s1 + $0x28] sm:$0xff]  }
   0x3   :  { %197 = vmatprep.subr.bf16.mxu0 %v234_v0  ;;  %v223_v7 = vld [vmem:[%s289_s1 + $0x30] sm:$0xff]   ;;  %v224_v8 = vld [vmem:[%s289_s1 + $0x38] sm:$0xff]   ;;  %v225_v9 = vld [vmem:[%s290_s0] sm:$0xff]  }
   0x4   :  { %v165_v10 = vld [vmem:[%s291_s2] ss:$0 sm:$0xff] }
   0x6   :  { %198 = vmatpush3.bf16.msra.mxu0 %v218_v2 }
   0x7   :  { %199 = vmatprep.subr.bf16.mxu0 %v234_v0 }
   0xa   :  { %200 = vmatpush3.bf16.msra.mxu0 %v219_v3 }
   0xb   :  { %201 = vmatprep.subr.bf16.mxu0 %v234_v0 }
   0xe   :  { %202 = vmatpush3.bf16.msra.mxu0 %v220_v4 }
   0xf   :  { %203 = vmatprep.subr.bf16.mxu0 %v234_v0 }
  0x12   :  { %204 = vmatpush3.bf16.msra.mxu0 %v221_v5 }
  0x13   :  { %205 = vmatprep.subr.bf16.mxu0 %v234_v0 }
  0x16   :  { %206 = vmatpush3.bf16.msra.mxu0 %v222_v6 }
  0x17   :  { %207 = vmatprep.subr.bf16.mxu0 %v234_v0 }
  0x1a   :  { %208 = vmatpush3.bf16.msra.mxu0 %v223_v7 }
  0x1b   :  { %209 = vmatprep.subr.bf16.mxu0 %v234_v0 }
  0x1e   :  { %210 = vmatpush3.bf16.msra.mxu0 %v224_v8 }
  0x21   :  { %212 = vmatmul.mubr.bf16.vlgmr.msra.gmra.mrb[0].mxu0 %v225_v9 }
  0xf4   :  { %v128_v11 = vpop.f32.mrb[0].mxu0 }
  0xf5   :  { %v129_v12 = vadd.f32 %v165_v10, %v128_v11  ;;  %v213_v13 = vpop.f32.mrb[1].mxu0 }
  0xf6   :  { %v131_v14 = vpop.f32.mrb[2].mxu0 }
  0xf7   :  { %v175_v15 = vmul.f32 -1.702, %v129_v12  ;;  %v132_v16 = vadd.f32 %v165_v10, %v131_v14  ;;  %v214_v17 = vpop.f32.mrb[3].mxu0 }
  0xf9   :  { %v139_v18 = vmul.f32 1.442695, %v175_v15  ;;  %v176_v19 = vmul.f32 -1.702, %v132_v16 }
  0xfb   :  { %226 = vpow2.f32 %v139_v18  ;;  %v141_v20 = vmul.f32 1.442695, %v176_v19 }
  0xfd   :  { %228 = vpow2.f32 %v141_v20 }
 0x105   :  { %v227_v21 = vpop.eup %226 }
 0x106   :  { %v143_v22 = vadd.f32 1.0, %v227_v21 }
 0x107   :  { %v229_v23 = vpop.eup %228 }
 0x108   :  { %230 = vrcp.f32 %v143_v22  ;;  %v144_v24 = vadd.f32 1.0, %v229_v23 }
 0x10a   :  { %232 = vrcp.f32 %v144_v24 }
 0x112   :  { %v231_v25 = vpop.eup %230 }
 0x113   :  { %v149_v27 = vmul.f32 %v231_v25, %v129_v12 }
 0x114   :  { %v233_v26 = vpop.eup %232 }
 0x115   :  { %v150_v28 = vmul.f32 %v233_v26, %v132_v16 }
 0x117   :  { %v184_v29 = vpack.c.bf16 %v150_v28, %v149_v27 }
 0x119   :  { %185 = vst [vmem:[%s292_s3] sm:$0xff] %v184_v29  }

// kernel: clip_forward.54
= control target key start
LH: loop header
LB: loop body
LE: loop exit
PB: predicated region body
PF: predicated region fallthrough
CT: control target
= control target key end

     0   :  { %s1303_s12 = smov 0   ;;  %s1305_s13 = smov 0   ;;  %s1471_s0 = inlined_call_operand.vmem [shape: bf16[2,4,8,8], index: 0, kind: input, shape index: {}]   ;;  %s1472_s1 = inlined_call_operand.vmem [shape: bf16[2,4,8,8], index: 1, kind: input, shape index: {}]   ;;  %s1473_s2 = inlined_call_operand.vmem [shape: bf16[2,4,8,8], index: 2, kind: input, shape index: {}]   ;;  %s1474_s3 = inlined_call_operand.vmem [shape: bf16[2,8,32], index: 3, kind: output, shape index: {}]  }
   0x1   :  { %s1307_s14 = smov 0  }
   0x2 LB: > { %s39_s15 = sadd.s32 1, %s1270_s13  ;;  %p1104_p0 = scmp.ge.s32.totalorder %s1274_s14, 1  ;;  %s1274_s14 = sphi %s1307_s14, %s13_s14   ;;  %s1270_s13 = sphi %s1305_s13, %s1476_s13   ;;  %s1266_s12 = sphi %s1303_s12, %s1475_s12  }
   0x3   : > { %p41_p1 = scmp.ge.s32.totalorder %s39_s15, 2  ;;  %p223_p2 = scmp.lt.s32.totalorder %s1274_s14, 3 }
   0x5   : > { %s1478_s15 = smov (%p41_p1, %s39_s15), 0  ;;  %p224_p3 = pnand %p1104_p0, %p223_p2 }
   0x6   : > { %p284_p4 = scmp.lt.s32.totalorder (!%p224_p3), %s1266_s12, 1  ;;  %vm346_vm0 = vcmask (!%p224_p3), 64512   ;;  %v1276_v0 = vmov (!%p224_p3), 0.0   ;;  %vm1277_vm1 = vmmov (!%p224_p3), 0   ;;  %vm337_vm2 = vcmask (!%p224_p3), 7168   ;;  %s1280_s26 = smov (!%p224_p3), 8  }
   0x7   : > { %227 = sbr.rel (%p224_p3) target bundleno = 953 (0x3b9), region = 32  ;;  %1147 = vmatprep.subr.bf16.mxu0 (!%p224_p3), %v1276_v0  ;;  %347 = vst.msk [vmem:[#allocation4] sm:$0xff] (!%p224_p3), %vm346_vm0, %v1276_v0  ;;  %348 = vst.msk [vmem:[#allocation4 + $0x8] sm:$0xff] (!%p224_p3), %vm346_vm0, %v1276_v0  ;;  %1153 = vmatprep.subr.bf16.mxu1 (!%p224_p3), %v1276_v0  ;;  %v1278_v13 = vmov (!%p224_p3), -1e+30   ;;  %v557_v14 = vlaneseq (!%p224_p3)  ;;  %v1279_v45 = vmov (!%p224_p3), 0  }
   0x8   : > { %349 = vst.msk [vmem:[#allocation4 + $0x10] sm:$0xff] (!%p224_p3), %vm346_vm0, %v1276_v0  ;;  %350 = vst.msk [vmem:[#allocation4 + $0x18] sm:$0xff] (!%p224_p3), %vm346_vm0, %v1276_v0  ;;  %1149 = vmatprep.mubr.msk.bf16.mxu0 (!%p224_p3), %vm1277_vm1, %v1276_v0  ;;  %1155 = vmatprep.mubr.msk.bf16.mxu1 (!%p224_p3), %vm1277_vm1, %v1276_v0  ;;  %vm699_vm4 = vcmask (!%p224_p3), 1043456   ;;  %s1281_s27 = smov (!%p224_p3), 16   ;;  %s1282_s28 = smov (!%p224_p3), 24   ;;  %vm933_vm5 = vcmask (!%p224_p3), 60416  }
   0x9   : > { %338 = vst.msk [vmem:[#allocation2] sm:$0xff] (!%p224_p3), %vm337_vm2, %v1278_v13  ;;  %339 = vst.msk [vmem:[#allocation2 + $0x8] sm:$0xff] (!%p224_p3), %vm337_vm2, %v1278_v13  ;;  %v558_v15 = vand.u32 (!%p224_p3), 127, %v557_v14  ;;  %v563_v16 = vshrl.u32 (!%p224_p3), %v557_v14, 7  ;;  %1226 = vset.pattern.permute.xlu0 (!%p224_p3), %v1279_v45  ;;  %1227 = vset.pattern.permute.xlu1 (!%p224_p3), %v1279_v45  ;;  %vm942_vm6 = vcmask (!%p224_p3), 126016   ;;  %vm951_vm7 = vcmask (!%p224_p3), 191616  }
   0xa   : > { %340 = vst.msk [vmem:[#allocation2 + $0x10] sm:$0xff] (!%p224_p3), %vm337_vm2, %v1278_v13  ;;  %341 = vst.msk [vmem:[#allocation2 + $0x18] sm:$0xff] (!%p224_p3), %vm337_vm2, %v1278_v13  ;;  %vm960_vm8 = vcmask (!%p224_p3), 257216  }
   0xb   : > { %342 = vst.msk [vmem:[#allocation3] sm:$0xff] (!%p224_p3), %vm337_vm2, %v1276_v0  ;;  %343 = vst.msk [vmem:[#allocation3 + $0x8] sm:$0xff] (!%p224_p3), %vm337_vm2, %v1276_v0  ;;  %vm566_vm3 = vcmp.le.s32.totalorder (!%p224_p3), %v558_v15, %v563_v16 }
   0xc   : > { %344 = vst.msk [vmem:[#allocation3 + $0x10] sm:$0xff] (!%p224_p3), %vm337_vm2, %v1276_v0  ;;  %345 = vst.msk [vmem:[#allocation3 + $0x18] sm:$0xff] (!%p224_p3), %vm337_vm2, %v1276_v0 }
   0xe   : > { %s1480_s12 = smov (!%p284_p4, %s1266_s12), 1 }
   0xf   : > { %s1338_s16 = sshll.u32 %s1480_s12, 4  ;;  %s1111_s29 = sshll.u32 %s1480_s12, 2 }
  0x10   : > { %s307_s19 = scalar_lea.vmem %s1472_s1, %s1338_s16  ;;  %s294_s22 = scalar_lea.vmem %s1471_s0, %s1338_s16  ;;  %v1394_v46 = vld [vmem:[#allocation2] sm:$0xff]  ;;  %v1399_v49 = vld [vmem:[#allocation2 + $0x8] sm:$0xff] }
  0x11   : > { %v359_v1 = vld [vmem:[%s307_s19] sm:$0xf]  ;;  %v360_v2 = vld [vmem:[%s307_s19 + $0x4] sm:$0xf]  ;;  %v361_v5 = vld [vmem:[%s307_s19 + $0x8] sm:$0xf]  ;;  %s320_s25 = scalar_lea.vmem %s1473_s2, %s1338_s16  ;;  %s331_s5 = scalar_lea.vmem %s1474_s3, %s1111_s29 }
  0x12   : > { %v372_v3 = vsel %vm346_vm0, %v359_v1, 0  ;;  %v418_v4 = vsel %vm346_vm0, %v360_v2, 0  ;;  %v362_v6 = vld [vmem:[%s307_s19 + $0xc] sm:$0xf]  ;;  %v355_v7 = vld [vmem:[%s294_s22] sm:$0xf] }
  0x13   : > { %1148 = vmatpush3.bf16.xpose.msra.mxu0 %v372_v3  ;;  %1154 = vmatpush3.bf16.xpose.msra.mxu1 %v418_v4  ;;  %v356_v8 = vld [vmem:[%s294_s22 + $0x4] sm:$0xf]  ;;  %v464_v9 = vsel %vm346_vm0, %v361_v5, 0  ;;  %v510_v10 = vsel %vm346_vm0, %v362_v6, 0  ;;  %v357_v11 = vld [vmem:[%s294_s22 + $0x8] sm:$0xf] }
  0x14   : > { %1159 = vmatprep.subr.bf16.mxu0 %v1276_v0  ;;  %1165 = vmatprep.subr.bf16.mxu1 %v1276_v0  ;;  %v358_v12 = vld [vmem:[%s294_s22 + $0xc] sm:$0xf]  ;;  %v1409_v53 = vld [vmem:[#allocation2 + $0x10] sm:$0xff]  ;;  %v1417_v57 = vld [vmem:[#allocation2 + $0x18] sm:$0xff] }
  0x15   : > { %v363_v62 = vld [vmem:[%s320_s25] sm:$0xf]  ;;  %v364_v1 = vld [vmem:[%s320_s25 + $0x4] sm:$0xf]  ;;  %v365_v3 = vld [vmem:[%s320_s25 + $0x8] sm:$0xf] }
  0x16   : > { %v701_v63 = vsel %vm699_vm4, %v363_v62, 0  ;;  %v747_v2 = vsel %vm699_vm4, %v364_v1, 0  ;;  %v793_v4 = vsel %vm699_vm4, %v365_v3, 0  ;;  %v366_v5 = vld [vmem:[%s320_s25 + $0xc] sm:$0xf] }
  0x17   : > { %v839_v6 = vsel %vm699_vm4, %v366_v5, 0  ;;  %v665_v62 = vld [vmem:[#allocation4 + $0x8] sm:$0xff] }
  0x1a   : > { %1150 = vmatmul.mubr.msk.bf16.vlgmr.msra.gmra.mrb[0].mxu0 %vm346_vm0, %v355_v7  ;;  %1156 = vmatmul.mubr.msk.bf16.vlgmr.msra.gmra.mrb[0].mxu1 %vm346_vm0, %v356_v8 }
  0x1b   : > { %1160 = vmatpush3.bf16.xpose.msra.mxu0 %v464_v9  ;;  %1166 = vmatpush3.bf16.xpose.msra.mxu1 %v510_v10 }
  0x1c   : > { %1161 = vmatprep.mubr.msk.bf16.mxu0 %vm1277_vm1, %v1276_v0  ;;  %1167 = vmatprep.mubr.msk.bf16.mxu1 %vm1277_vm1, %v1276_v0 }
  0x1d   : > { %1171 = vmatprep.subr.bf16.mxu0 %v1276_v0  ;;  %1177 = vmatprep.subr.bf16.mxu1 %v1276_v0 }
  0x22   : > { %1162 = vmatmul.mubr.msk.bf16.vlgmr.msra.gmra.mrb[4].mxu0 %vm346_vm0, %v357_v11  ;;  %1168 = vmatmul.mubr.msk.bf16.vlgmr.msra.gmra.mrb[4].mxu1 %vm346_vm0, %v358_v12 }
  0x23   : > { %1173 = vmatprep.mubr.msk.bf16.mxu0 %vm1277_vm1, %v1276_v0  ;;  %1179 = vmatprep.mubr.msk.bf16.mxu1 %vm1277_vm1, %v1276_v0 }
  0x24   : > { %1172 = vmatpush3.bf16.msra.mxu0 %v701_v63  ;;  %1178 = vmatpush3.bf16.msra.mxu1 %v747_v2 }
  0x25   : > { %1183 = vmatprep.subr.bf16.mxu0 %v1276_v0  ;;  %1189 = vmatprep.subr.bf16.mxu1 %v1276_v0 }
  0xed   : > { %v408_v17 = vpop.f32.mrb[0].mxu0  ;;  %v454_v18 = vpop.f32.mrb[0].mxu1 }
  0xee   : > { %v552_v19 = vmul.f32 0.35355338, %v408_v17  ;;  %v1151_v20 = vpop.f32.mrb[1].mxu0  ;;  %v553_v21 = vmul.f32 0.35355338, %v454_v18  ;;  %v1157_v22 = vpop.f32.mrb[1].mxu1 }
  0xef   : > { %v411_v23 = vpop.f32.mrb[2].mxu0  ;;  %v457_v24 = vpop.f32.mrb[2].mxu1 }
  0xf0   : > { %v1152_v25 = vpop.f32.mrb[3].mxu0  ;;  %v1158_v26 = vpop.f32.mrb[3].mxu1  ;;  %v1381_v27 = vsel %vm566_vm3, %v552_v19, -1e+30  ;;  %v1384_v28 = vsel %vm566_vm3, %v553_v21, -1e+30 }
  0xf1   : > { %v575_v29 = vsel %vm346_vm0, %v1381_v27, -inf  ;;  %v578_v30 = vsel %vm346_vm0, %v1384_v28, -inf }
  0xf2   : > { %576 = vmax.xlane.f32.xlu0 %v575_v29 }
  0xf5   : > { %v500_v31 = vpop.f32.mrb[4].mxu0  ;;  %v546_v32 = vpop.f32.mrb[4].mxu1 }
  0xf6   : > { %v554_v33 = vmul.f32 0.35355338, %v500_v31  ;;  %579 = vmax.xlane.f32.xlu0 %v578_v30  ;;  %v1163_v34 = vpop.f32.mrb[5].mxu0  ;;  %v555_v35 = vmul.f32 0.35355338, %v546_v32  ;;  %v1169_v36 = vpop.f32.mrb[5].mxu1 }
  0xf7   : > { %v503_v37 = vpop.f32.mrb[6].mxu0  ;;  %v549_v38 = vpop.f32.mrb[6].mxu1 }
  0xf8   : > { %v1164_v39 = vpop.f32.mrb[7].mxu0  ;;  %v1170_v40 = vpop.f32.mrb[7].mxu1  ;;  %v569_v41 = vsel %vm566_vm3, %v554_v33, -1e+30  ;;  %v570_v42 = vsel %vm566_vm3, %v555_v35, -1e+30 }
  0xf9   : > { %v581_v43 = vsel %vm346_vm0, %v569_v41, -inf  ;;  %v584_v44 = vsel %vm346_vm0, %v570_v42, -inf  ;;  %v636_v37 = vld [vmem:[#allocation3 + $0x8] sm:$0xff]  ;;  %v637_v40 = vld [vmem:[#allocation3 + $0x10] sm:$0xff] }
  0xfa   : > { %582 = vmax.xlane.f32.xlu1 %v581_v43 }
  0xfe   : > { %585 = vmax.xlane.f32.xlu1 %v584_v44  ;;  %v638_v44 = vld [vmem:[#allocation3 + $0x18] sm:$0xff] }
 0x17f   : > { %v577_v47 = vpop.xlane.xlu0 %576 }
 0x180   : > { %v1397_v48 = vmax.f32 %v1394_v46, %v577_v47 }
 0x182   : > { %v591_v50 = vsub.f32 %v1394_v46, %v1397_v48  ;;  %889 = vst.msk [vmem:[#allocation2] sm:$0xff] %vm337_vm2, %v1397_v48  ;;  %605 = vperm.xlu0 %1226, %v1397_v48  }
 0x183   : > { %v580_v51 = vpop.xlane.xlu0 %579 }
 0x184   : > { %v1407_v52 = vmax.f32 %v1399_v49, %v580_v51  ;;  %v595_v36 = vmul.f32 1.442695, %v591_v50 }
 0x186   : > { %v592_v54 = vsub.f32 %v1399_v49, %v1407_v52  ;;  %890 = vst.msk [vmem:[#allocation2 + $0x8] sm:$0xff] %vm337_vm2, %v1407_v52  ;;  %610 = vperm.xlu1 %1227, %v1407_v52   ;;  %v635_v52 = vld [vmem:[#allocation3] sm:$0xff] }
 0x187   : > { %v583_v55 = vpop.xlane.xlu1 %582 }
 0x188   : > { %v589_v56 = vmax.f32 %v1409_v53, %v583_v55 }
 0x18a   : > { %v593_v58 = vsub.f32 %v1409_v53, %v589_v56  ;;  %891 = vst.msk [vmem:[#allocation2 + $0x10] sm:$0xff] %vm337_vm2, %v589_v56  ;;  %615 = vperm.xlu1 %1227, %v589_v56  }
 0x18b   : > { %v586_v59 = vpop.xlane.xlu1 %585 }
 0x18c   : > { %v590_v60 = vmax.f32 %v1417_v57, %v586_v59  ;;  %v599_v30 = vmul.f32 1.442695, %v593_v58 }
 0x18e   : > { %v594_v61 = vsub.f32 %v1417_v57, %v590_v60  ;;  %892 = vst.msk [vmem:[#allocation2 + $0x18] sm:$0xff] %vm337_vm2, %v590_v60  ;;  %620 = vperm.xlu1 %1227, %v590_v60  }
 0x190   : > { %v601_v32 = vmul.f32 1.442695, %v594_v61 }
 0x201   : > { %v606_v7 = vpop.permute.xlu0 %605 }
 0x202   : > { %v623_v8 = vsub.f32 %v1381_v27, %v606_v7 }
 0x204   : > { %v627_v9 = vmul.f32 1.442695, %v623_v8 }
 0x205   : > { %v611_v10 = vpop.permute.xlu1 %610 }
 0x206   : > { %1228 = vpow2.f32 %v627_v9  ;;  %v624_v11 = vsub.f32 %v1384_v28, %v611_v10 }
 0x208   : > { %v629_v12 = vmul.f32 1.442695, %v624_v11 }
 0x209   : > { %v616_v13 = vpop.permute.xlu1 %615 }
 0x20a   : > { %1230 = vpow2.f32 %v629_v12  ;;  %v625_v14 = vsub.f32 %v569_v41, %v616_v13 }
 0x20c   : > { %v631_v15 = vmul.f32 1.442695, %v625_v14  ;;  %v667_v14 = vld [vmem:[#allocation4 + $0x18] sm:$0xff] }
 0x20d   : > { %v621_v16 = vpop.permute.xlu1 %620 }
 0x20e   : > { %1232 = vpow2.f32 %v631_v15  ;;  %v626_v17 = vsub.f32 %v570_v42, %v621_v16 }
 0x210   : > { %v1229_v18 = vpop.eup %1228  ;;  %v633_v19 = vmul.f32 1.442695, %v626_v17 }
 0x211   : > { %v692_v20 = vpack.c.bf16 %v1229_v18, %v1229_v18  ;;  %v643_v31 = vsel %vm346_vm0, %v1229_v18, 0.0 }
 0x212   : > { %1234 = vpow2.f32 %v633_v19 }
 0x213   : > { %1174 = vmatmul.mubr.msk.bf16.vlgmr.msra.gmra.mrb[8].mxu0 %vm346_vm0, %v692_v20  ;;  %1236 = vpow2.f32 %v599_v30 }
 0x214   : > { %v1231_v21 = vpop.eup %1230  ;;  %1184 = vmatpush3.bf16.msra.mxu0 %v793_v4  ;;  %1185 = vmatprep.mubr.msk.bf16.mxu0 %vm1277_vm1, %v1276_v0 }
 0x215   : > { %v646_v22 = vsel %vm346_vm0, %v1231_v21, 0.0  ;;  %v693_v23 = vpack.c.bf16 %v1231_v21, %v1231_v21 }
 0x216   : > { %647 = vadd.xlane.f32.xlu1 %v646_v22 }
 0x217   : > { %1180 = vmatmul.mubr.msk.bf16.vlgmr.msra.gmra.mrb[8].mxu1 %vm346_vm0, %v693_v23 }
 0x218   : > { %v1233_v24 = vpop.eup %1232  ;;  %1190 = vmatpush3.bf16.msra.mxu1 %v839_v6  ;;  %1191 = vmatprep.mubr.msk.bf16.mxu1 %vm1277_vm1, %v1276_v0  ;;  %v597_v0 = vmul.f32 1.442695, %v592_v54  ;;  %v666_v6 = vld [vmem:[#allocation4 + $0x10] sm:$0xff] }
 0x219   : > { %v649_v25 = vsel %vm346_vm0, %v1233_v24, 0.0  ;;  %v694_v26 = vpack.c.bf16 %v1233_v24, %v1233_v24 }
 0x21a   : > { %650 = vadd.xlane.f32.xlu0 %v649_v25  ;;  %1238 = vpow2.f32 %v597_v0 }
 0x21b   : > { %1186 = vmatmul.mubr.msk.bf16.vlgmr.msra.gmra.mrb[12].mxu0 %vm346_vm0, %v694_v26  ;;  %1240 = vpow2.f32 %v601_v32 }
 0x21c   : > { %v1235_v27 = vpop.eup %1234  ;;  %1242 = vpow2.f32 %v595_v36 }
 0x21d   : > { %v652_v28 = vsel %vm346_vm0, %v1235_v27, 0.0  ;;  %v695_v29 = vpack.c.bf16 %v1235_v27, %v1235_v27  ;;  %v1237_v33 = vpop.eup %1236 }
 0x21e   : > { %653 = vadd.xlane.f32.xlu1 %v652_v28  ;;  %v641_v42 = vmul.f32 %v1237_v33, %v637_v40 }
 0x21f   : > { %1192 = vmatmul.mubr.msk.bf16.vlgmr.msra.gmra.mrb[12].mxu1 %vm346_vm0, %v695_v29 }
 0x222   : > { %644 = vadd.xlane.f32.xlu1 %v643_v31 }
 0x224   : > { %v1239_v34 = vpop.eup %1238 }
 0x225   : > { %v1241_v35 = vpop.eup %1240  ;;  %v640_v38 = vmul.f32 %v1239_v34, %v636_v37 }
 0x226   : > { %v642_v47 = vmul.f32 %v1241_v35, %v638_v44  ;;  %v1243_v49 = vpop.eup %1242 }
 0x227   : > { %v639_v50 = vmul.f32 %v1243_v49, %v635_v52 }
 0x230   : > { %680 = vperm.xlu0 %1226, %v1237_v33   ;;  %v664_v33 = vld [vmem:[#allocation4] sm:$0xff] }
 0x233   : > { %675 = vperm.xlu1 %1227, %v1239_v34  }
 0x237   : > { %685 = vperm.xlu1 %1227, %v1241_v35  }
 0x2a3   : > { %v648_v39 = vpop.xlane.xlu1 %647 }
 0x2a4   : > { %v656_v41 = vadd.f32 %v648_v39, %v640_v38 }
 0x2a6   : > { %661 = vst.msk [vmem:[#allocation3 + $0x8] sm:$0xff] %vm337_vm2, %v656_v41 }
 0x2a7   : > { %v651_v43 = vpop.xlane.xlu0 %650 }
 0x2a8   : > { %v657_v45 = vadd.f32 %v651_v43, %v641_v42 }
 0x2aa   : > { %662 = vst.msk [vmem:[#allocation3 + $0x10] sm:$0xff] %vm337_vm2, %v657_v45 }
 0x2ab   : > { %v654_v51 = vpop.xlane.xlu1 %653 }
 0x2ac   : > { %v658_v46 = vadd.f32 %v654_v51, %v642_v47 }
 0x2ad   : > { %v897_v48 = vld [vmem:[#allocation3 + $0x8] sm:$0xff] }
 0x2ae   : > { %663 = vst.msk [vmem:[#allocation3 + $0x18] sm:$0xff] %vm337_vm2, %v658_v46  ;;  %1244 = vrcp.f32 %v897_v48 }
 0x2af   : > { %v645_v53 = vpop.xlane.xlu1 %644  ;;  %v681_v7 = vpop.permute.xlu0 %680 }
 0x2b0   : > { %v655_v54 = vadd.f32 %v645_v53, %v639_v50  ;;  %v690_v12 = vmul.f32 %v681_v7, %v666_v6 }
 0x2b1   : > { %v898_v55 = vld [vmem:[#allocation3 + $0x10] sm:$0xff] }
 0x2b2   : > { %660 = vst.msk [vmem:[#allocation3] sm:$0xff] %vm337_vm2, %v655_v54  ;;  %1246 = vrcp.f32 %v898_v55 }
 0x2b3   : > { %v676_v63 = vpop.permute.xlu1 %675 }
 0x2b4   : > { %v689_v4 = vmul.f32 %v676_v63, %v665_v62 }
 0x2b5   : > { %v899_v56 = vld [vmem:[#allocation3 + $0x18] sm:$0xff] }
 0x2b6   : > { %1248 = vrcp.f32 %v899_v56 }
 0x2b7   : > { %v686_v15 = vpop.permute.xlu1 %685 }
 0x2b8   : > { %v1245_v57 = vpop.eup %1244  ;;  %v691_v20 = vmul.f32 %v686_v15, %v667_v14 }
 0x2b9   : > { %915 = vperm.xlu1 %1227, %v1245_v57   ;;  %v896_v58 = vld [vmem:[#allocation3] sm:$0xff] }
 0x2ba   : > { %1250 = vrcp.f32 %v896_v58 }
 0x2bc   : > { %v1247_v59 = vpop.eup %1246 }
 0x2bd   : > { %920 = vperm.xlu1 %1227, %v1247_v59  }
 0x2c0   : > { %v1249_v60 = vpop.eup %1248 }
 0x2c1   : > { %670 = vperm.xlu1 %1227, %v1243_v49   ;;  %925 = vperm.xlu0 %1226, %v1249_v60  }
 0x2c4   : > { %v1251_v61 = vpop.eup %1250 }
 0x2c5   : > { %910 = vperm.xlu0 %1226, %v1251_v61  }
 0x2e6   : > { %v737_v1 = vpop.f32.mrb[8].mxu0 }
 0x2e7   : > { %v1175_v2 = vpop.f32.mrb[9].mxu0 }
 0x2e8   : > { %v740_v3 = vpop.f32.mrb[10].mxu0 }
 0x2e9   : > { %v1176_v5 = vpop.f32.mrb[11].mxu0 }
 0x2ea   : > { %v783_v8 = vpop.f32.mrb[8].mxu1 }
 0x2eb   : > { %v882_v9 = vadd.f32 %v783_v8, %v689_v4  ;;  %v1181_v10 = vpop.f32.mrb[9].mxu1 }
 0x2ec   : > { %v786_v11 = vpop.f32.mrb[10].mxu1 }
 0x2ed   : > { %886 = vst.msk [vmem:[#allocation4 + $0x8] sm:$0xff] %vm346_vm0, %v882_v9  ;;  %v1182_v13 = vpop.f32.mrb[11].mxu1 }
 0x2ee   : > { %v829_v16 = vpop.f32.mrb[12].mxu0 }
 0x2ef   : > { %v883_v17 = vadd.f32 %v829_v16, %v690_v12  ;;  %v1187_v18 = vpop.f32.mrb[13].mxu0 }
 0x2f0   : > { %v832_v19 = vpop.f32.mrb[14].mxu0 }
 0x2f1   : > { %887 = vst.msk [vmem:[#allocation4 + $0x10] sm:$0xff] %vm346_vm0, %v883_v17  ;;  %v1188_v21 = vpop.f32.mrb[15].mxu0 }
 0x2f2   : > { %v875_v22 = vpop.f32.mrb[12].mxu1 }
 0x2f3   : > { %v884_v23 = vadd.f32 %v875_v22, %v691_v20  ;;  %v1193_v24 = vpop.f32.mrb[13].mxu1 }
 0x2f4   : > { %v878_v25 = vpop.f32.mrb[14].mxu1  ;;  %v905_v27 = vld [vmem:[#allocation4 + $0x8] sm:$0xff] }
 0x2f5   : > { %888 = vst.msk [vmem:[#allocation4 + $0x18] sm:$0xff] %vm346_vm0, %v884_v23  ;;  %v1194_v26 = vpop.f32.mrb[15].mxu1 }
 0x2f8   : > { %v906_v0 = vld [vmem:[#allocation4 + $0x10] sm:$0xff] }
 0x2fc   : > { %v907_v36 = vld [vmem:[#allocation4 + $0x18] sm:$0xff] }
 0x338   : > { %v916_v28 = vpop.permute.xlu1 %915 }
 0x339   : > { %v929_v29 = vmul.f32 %v916_v28, %v905_v27 }
 0x33b   : > { %v1128_v30 = vpack.c.bf16 %v929_v29, %v929_v29 }
 0x33c   : > { %v921_v31 = vpop.permute.xlu1 %920 }
 0x33d   : > { %v930_v32 = vmul.f32 %v921_v31, %v906_v0  ;;  %939 = vrot.lane.b32.xlu1 %v1128_v30, %s1280_s26 }
 0x33f   : > { %v1129_v34 = vpack.c.bf16 %v930_v32, %v930_v32 }
 0x340   : > { %v926_v35 = vpop.permute.xlu0 %925  ;;  %v671_v37 = vpop.permute.xlu1 %670 }
 0x341   : > { %v931_v38 = vmul.f32 %v926_v35, %v907_v36  ;;  %v688_v39 = vmul.f32 %v671_v37, %v664_v33  ;;  %948 = vrot.lane.b32.xlu0 %v1129_v34, %s1281_s27 }
 0x343   : > { %v1130_v40 = vpack.c.bf16 %v931_v38, %v931_v38  ;;  %v881_v41 = vadd.f32 %v737_v1, %v688_v39 }
 0x344   : > { %v911_v42 = vpop.permute.xlu0 %910 }
 0x345   : > { %885 = vst.msk [vmem:[#allocation4] sm:$0xff] %vm346_vm0, %v881_v41  ;;  %957 = vrot.lane.b32.xlu1 %v1130_v40, %s1282_s28 }
 0x34c   : > { %v904_v43 = vld [vmem:[#allocation4] sm:$0xff] }
 0x34d   : > { %v928_v44 = vmul.f32 %v911_v42, %v904_v43 }
 0x34f   : > { %v932_v45 = vpack.c.bf16 %v928_v44, %v928_v44 }
 0x351   : > { %934 = vst.msk [vmem:[%s331_s5] sm:$0xf] %vm933_vm5, %v932_v45 }
 0x3af   : > { %v940_v47 = vpop.permute.xlu1 %939 }
 0x3b0   : > { %943 = vst.msk [vmem:[%s331_s5] sm:$0xf] %vm942_vm6, %v940_v47 }
 0x3b3   : > { %v949_v49 = vpop.permute.xlu0 %948 }
 0x3b4   : > { %952 = vst.msk [vmem:[%s331_s5] sm:$0xf] %vm951_vm7, %v949_v49 }
 0x3b7   : > { %v958_v51 = vpop.permute.xlu1 %957 }
 0x3b8   : > { %961 = vst.msk [vmem:[%s331_s5] sm:$0xf] %vm960_vm8, %v958_v51 }
 0x3b9 PF: > { %s13_s14 = sadd.s32 1, %s1274_s14   ;;  %s1475_s12 = smov %s1270_s13 }
 0x3ba   : > { %p10_p5 = scmp.ge.s32.totalorder %s13_s14, 4   ;;  %s1476_s13 = smov %s1478_s15 }
 0x3bc   :  { %12 = sbr.rel (!%p10_p5) target bundleno = 2 (0x2), region = 80 }

</bundles_post_ra>
